<compile_context>
chip_gen: v6e
topology: v6e:2x2x1
jax: 0.10.0
libtpu: 0.0.40
codegen_flags: <defaults>
</compile_context>

<pallas_src>
import functools

import jax
import jax.numpy as jnp
import numpy as np
from jax import lax
from jax.experimental import pallas as pl
from jax.experimental.pallas import tpu as pltpu


def _pick_row_chunk(H, W, target_rows=128):
    """Largest divisor rh of H with rh*W <= target_rows (fallback rh=1)."""
    best = 1
    for rh in range(1, H + 1):
        if H % rh == 0 and rh * W <= target_rows:
            best = rh
    return best


def _make_crossm_kernel(H, W, C, d0, d1, rh):
    """Fused CrossM kernel for one image (grid step)."""
    p0, p1 = d0, d1                    # padding == dilation for both convs
    Hp0 = H + 2 * p0                   # im2col scratch rows for conv0
    Hp1 = H + 2 * p1                   # im2col scratch rows for conv1
    n_chunks = H // rh

    def kernel(x_ref, low_ref, w0_ref, w1_ref, s0_ref, b0_ref, s1_ref, b1_ref,
               out_ref, xcat0_ref, xcat1_ref):
        dt0 = xcat0_ref.dtype
        dt1 = xcat1_ref.dtype

        def build_cat(x3, d):
            # x3: (rh, W, C). Returns (rh, W, 3C): channel blocks are the
            # kx = 0/1/2 taps, i.e. [shift-right-by-d | identity | shift-left-by-d]
            # with zero fill (this realizes the width padding).
            zc = jnp.zeros((x3.shape[0], d, C), x3.dtype)
            left = jnp.concatenate([zc, x3[:, :W - d, :]], axis=1)    # kx = 0
            right = jnp.concatenate([x3[:, d:, :], zc], axis=1)       # kx = 2
            return jnp.concatenate([left, x3, right], axis=-1)

        # Zero halo row bands every step (cheap; safe under megacore sharding).
        xcat0_ref[0:p0] = jnp.zeros((p0, W, 3 * C), dt0)
        xcat0_ref[p0 + H:Hp0] = jnp.zeros((p0, W, 3 * C), dt0)
        xcat1_ref[0:p1] = jnp.zeros((p1, W, 3 * C), dt1)
        xcat1_ref[p1 + H:Hp1] = jnp.zeros((p1, W, 3 * C), dt1)

        # Phase A: im2col-along-kx of the high-res input (conv0, dilation d0).
        for ci in range(n_chunks):
            h0 = ci * rh
            xc = x_ref[0, h0:h0 + rh]                        # (rh, W, C)
            xcat0_ref[p0 + h0:p0 + h0 + rh] = build_cat(xc.astype(dt0), d0)

        # Phase B: conv0 + BN0 + residual(low) + ReLU -> xcat1 (pre-shifted).
        s0 = s0_ref[...].astype(jnp.float32)                 # (1, C)
        b0 = b0_ref[...].astype(jnp.float32)
        for ci in range(n_chunks):
            h0 = ci * rh
            acc = jnp.zeros((rh * W, C), jnp.float32)
            for ky in range(3):
                slab = xcat0_ref[h0 + ky * d0:h0 + ky * d0 + rh]   # (rh, W, 3C)
                acc = acc + jnp.dot(slab.reshape(rh * W, 3 * C), w0_ref[ky],
                                    preferred_element_type=jnp.float32)
            y = acc * s0 + b0
            y = y + low_ref[0, h0:h0 + rh].reshape(rh * W, C).astype(jnp.float32)
            hch = jnp.maximum(y, 0.0).reshape(rh, W, C).astype(dt1)
            xcat1_ref[p1 + h0:p1 + h0 + rh] = build_cat(hch, d1)

        # Phase C: conv1 + BN1 + ReLU -> output.
        s1 = s1_ref[...].astype(jnp.float32)
        b1 = b1_ref[...].astype(jnp.float32)
        for ci in range(n_chunks):
            h0 = ci * rh
            acc = jnp.zeros((rh * W, C), jnp.float32)
            for ky in range(3):
                slab = xcat1_ref[h0 + ky * d1:h0 + ky * d1 + rh]   # (rh, W, 3C)
                acc = acc + jnp.dot(slab.reshape(rh * W, 3 * C), w1_ref[ky],
                                    preferred_element_type=jnp.float32)
            y = jnp.maximum(acc * s1 + b1, 0.0)
            out_ref[0, h0:h0 + rh] = y.reshape(rh, W, C).astype(out_ref.dtype)

    return kernel


def cross_m_pallas(high_nhwc, low_nhwc, w0_hwio, w1_hwio, s0, b0, s1, b1):
    """Fused CrossM forward on NHWC inputs. Returns NHWC."""
    N, H, W, Cin = high_nhwc.shape
    Cout = w0_hwio.shape[-1]
    assert Cin == Cout, "CrossM uses mid_channels for both convs"
    C = Cin
    d0, d1 = 2, 1
    rh = _pick_row_chunk(H, W)

    # Per-ky weight slabs: (3, 3*Cin, Cout); row order (kx-major, ci-minor)
    # matches the im2col channel order [kx=0 | kx=1 | kx=2].
    w0_slab = w0_hwio.reshape(3, 3 * C, C)
    w1_slab = w1_hwio.reshape(3, 3 * C, C)

    s0_2d = s0.reshape(1, C).astype(jnp.float32)
    b0_2d = b0.reshape(1, C).astype(jnp.float32)
    s1_2d = s1.reshape(1, C).astype(jnp.float32)
    b1_2d = b1.reshape(1, C).astype(jnp.float32)

    kernel = _make_crossm_kernel(H, W, C, d0, d1, rh)
    dt = high_nhwc.dtype

    return pl.pallas_call(
        kernel,
        out_shape=jax.ShapeDtypeStruct((N, H, W, C), dt),
        grid=(N,),
        in_specs=[
            pl.BlockSpec((1, H, W, C), lambda n: (n, 0, 0, 0)),    # high_x1
            pl.BlockSpec((1, H, W, C), lambda n: (n, 0, 0, 0)),    # low_x2
            pl.BlockSpec((3, 3 * C, C), lambda n: (0, 0, 0)),      # conv0 weight slab
            pl.BlockSpec((3, 3 * C, C), lambda n: (0, 0, 0)),      # conv1 weight slab
            pl.BlockSpec((1, C), lambda n: (0, 0)),                # BN0 scale
            pl.BlockSpec((1, C), lambda n: (0, 0)),                # BN0 bias
            pl.BlockSpec((1, C), lambda n: (0, 0)),                # BN1 scale
            pl.BlockSpec((1, C), lambda n: (0, 0)),                # BN1 bias
        ],
        out_specs=pl.BlockSpec((1, H, W, C), lambda n: (n, 0, 0, 0)),
        scratch_shapes=[
            pltpu.VMEM((H + 2 * d0, W, 3 * C), dt),   # im2col scratch, conv0
            pltpu.VMEM((H + 2 * d1, W, 3 * C), dt),   # im2col scratch, conv1 (holds h)
        ],
        compiler_params=pltpu.CompilerParams(
            dimension_semantics=("parallel",),
            vmem_limit_bytes=32 * 1024 * 1024,
        ),
    )(high_nhwc, low_nhwc, w0_slab, w1_slab, s0_2d, b0_2d, s1_2d, b1_2d)


def _fold_bn(gamma, beta, running_mean, running_var, eps=1e-5):
    scale = gamma / jnp.sqrt(running_var + eps)
    bias = beta - running_mean * scale
    return scale, bias


@functools.partial(jax.jit, static_argnames=())
def cross_m_forward(high_x1_nchw, low_x2_nchw, params):
    """CrossM forward. Inputs NCHW (PyTorch convention), output NCHW."""
    # TODO(synk): if the surrounding model stays NHWC, these transposes (one
    # full HBM read+write each) can be dropped entirely.
    high = jnp.transpose(high_x1_nchw, (0, 2, 3, 1))  # -> NHWC
    low = jnp.transpose(low_x2_nchw, (0, 2, 3, 1))

    s0, b0 = _fold_bn(params["bn0_gamma"], params["bn0_beta"],
                      params["bn0_mean"], params["bn0_var"])
    s1, b1 = _fold_bn(params["bn1_gamma"], params["bn1_beta"],
                      params["bn1_mean"], params["bn1_var"])

    out = cross_m_pallas(high, low, params["w0_hwio"], params["w1_hwio"],
                         s0, b0, s1, b1)
    return jnp.transpose(out, (0, 3, 1, 2))  # -> NCHW


def _reference_forward(high_nchw, low_nchw, params):
    """Pure-JAX (lax.conv) reference for correctness check."""
    def conv(x_nhwc, w_hwio, dilation, padding):
        return lax.conv_general_dilated(
            x_nhwc, w_hwio, window_strides=(1, 1),
            padding=[(padding, padding), (padding, padding)],
            rhs_dilation=(dilation, dilation),
            dimension_numbers=("NHWC", "HWIO", "NHWC"))

    high = jnp.transpose(high_nchw, (0, 2, 3, 1))
    low = jnp.transpose(low_nchw, (0, 2, 3, 1))
    s0, b0 = _fold_bn(params["bn0_gamma"], params["bn0_beta"],
                      params["bn0_mean"], params["bn0_var"])
    s1, b1 = _fold_bn(params["bn1_gamma"], params["bn1_beta"],
                      params["bn1_mean"], params["bn1_var"])
    h = jax.nn.relu(conv(high, params["w0_hwio"], 2, 2) * s0 + b0 + low)
    h = jax.nn.relu(conv(h, params["w1_hwio"], 1, 1) * s1 + b1)
    return jnp.transpose(h, (0, 3, 1, 2))


if __name__ == "__main__":
    mid_channels = 64
    N, H, W = 2, 16, 16

    key = jax.random.PRNGKey(0)
    keys = jax.random.split(key, 12)

    # Inputs (NCHW, matching the PyTorch module).
    high_x1 = jax.random.normal(keys[0], (N, mid_channels, H, W), jnp.float32)
    low_x2 = jax.random.normal(keys[1], (N, mid_channels, H, W), jnp.float32)

    # Deterministic parameters. Conv weights created PyTorch-style
    # (Cout, Cin, kh, kw) then transposed to HWIO for the NHWC kernel.
    w0_oihw = 0.05 * jax.random.normal(keys[2], (mid_channels, mid_channels, 3, 3), jnp.float32)
    w1_oihw = 0.05 * jax.random.normal(keys[3], (mid_channels, mid_channels, 3, 3), jnp.float32)

    params = {
        "w0_hwio": jnp.transpose(w0_oihw, (2, 3, 1, 0)),
        "w1_hwio": jnp.transpose(w1_oihw, (2, 3, 1, 0)),
        # BatchNorm (inference-mode) parameters for conv_L0 and conv1_L1.
        "bn0_gamma": 1.0 + 0.1 * jax.random.normal(keys[4], (mid_channels,), jnp.float32),
        "bn0_beta": 0.1 * jax.random.normal(keys[5], (mid_channels,), jnp.float32),
        "bn0_mean": 0.1 * jax.random.normal(keys[6], (mid_channels,), jnp.float32),
        "bn0_var": jnp.abs(jax.random.normal(keys[7], (mid_channels,), jnp.float32)) + 0.5,
        "bn1_gamma": 1.0 + 0.1 * jax.random.normal(keys[8], (mid_channels,), jnp.float32),
        "bn1_beta": 0.1 * jax.random.normal(keys[9], (mid_channels,), jnp.float32),
        "bn1_mean": 0.1 * jax.random.normal(keys[10], (mid_channels,), jnp.float32),
        "bn1_var": jnp.abs(jax.random.normal(keys[11], (mid_channels,), jnp.float32)) + 0.5,
    }

    out = cross_m_forward(high_x1, low_x2, params)
    out = jax.block_until_ready(out)
    assert out.shape == (N, mid_channels, H, W), out.shape

    ref = jax.block_until_ready(_reference_forward(high_x1, low_x2, params))
    np.testing.assert_allclose(np.asarray(out), np.asarray(ref), rtol=1e-4, atol=1e-4)

    print("KERNEL_OK")
</pallas_src>

<mosaic_0001>
module attributes {stable_mosaic.version = 11 : i64} {
  func.func @kernel(%arg0: i32, %arg1: memref<1x16x16x64xf32, #tpu.memory_space<vmem>>, %arg2: memref<1x16x16x64xf32, #tpu.memory_space<vmem>>, %arg3: memref<3x192x64xf32, #tpu.memory_space<vmem>>, %arg4: memref<3x192x64xf32, #tpu.memory_space<vmem>>, %arg5: memref<1x64xf32, #tpu.memory_space<vmem>>, %arg6: memref<1x64xf32, #tpu.memory_space<vmem>>, %arg7: memref<1x64xf32, #tpu.memory_space<vmem>>, %arg8: memref<1x64xf32, #tpu.memory_space<vmem>>, %arg9: memref<1x16x16x64xf32, #tpu.memory_space<vmem>>, %arg10: memref<20x16x192xf32, #tpu.memory_space<vmem>>, %arg11: memref<18x16x192xf32, #tpu.memory_space<vmem>>) attributes {dimension_semantics = [#tpu.dimension_semantics<parallel>], iteration_bounds = array<i64: 2>, scalar_prefetch = 0 : i64, scratch_operands = 2 : i64, tpu.core_type = #tpu.core_type<tc>, window_params = [{transform_indices = @transform_0, window_bounds = array<i64: 1, 16, 16, 64>}, {transform_indices = @transform_1, window_bounds = array<i64: 1, 16, 16, 64>}, {pipeline_mode = #tpu.pipeline_mode<synchronous>, transform_indices = @transform_2, window_bounds = array<i64: 3, 192, 64>}, {pipeline_mode = #tpu.pipeline_mode<synchronous>, transform_indices = @transform_3, window_bounds = array<i64: 3, 192, 64>}, {pipeline_mode = #tpu.pipeline_mode<synchronous>, transform_indices = @transform_4, window_bounds = array<i64: 1, 64>}, {pipeline_mode = #tpu.pipeline_mode<synchronous>, transform_indices = @transform_5, window_bounds = array<i64: 1, 64>}, {pipeline_mode = #tpu.pipeline_mode<synchronous>, transform_indices = @transform_6, window_bounds = array<i64: 1, 64>}, {pipeline_mode = #tpu.pipeline_mode<synchronous>, transform_indices = @transform_7, window_bounds = array<i64: 1, 64>}, {transform_indices = @transform_8, window_bounds = array<i64: 1, 16, 16, 64>}]} {
    %cst = arith.constant 0.000000e+00 : f32
    %0 = vector.broadcast %cst : f32 to vector<2x16x192xf32>
    %c0 = arith.constant 0 : index
    %c0_0 = arith.constant 0 : index
    %c0_1 = arith.constant 0 : index
    %1 = vector.load %arg10[%c0, %c0_0, %c0_1] : memref<20x16x192xf32, #tpu.memory_space<vmem>>, vector<2x16x192xf32>
    tpu.vector_store %arg10[%c0, %c0_0, %c0_1], %0 {strides = array<i32>} : memref<20x16x192xf32, #tpu.memory_space<vmem>>, vector<2x16x192xf32>,
    %cst_2 = arith.constant 0.000000e+00 : f32
    %2 = vector.broadcast %cst_2 : f32 to vector<2x16x192xf32>
    %c18 = arith.constant 18 : index
    %c0_3 = arith.constant 0 : index
    %c0_4 = arith.constant 0 : index
    %3 = vector.load %arg10[%c18, %c0_3, %c0_4] : memref<20x16x192xf32, #tpu.memory_space<vmem>>, vector<2x16x192xf32>
    tpu.vector_store %arg10[%c18, %c0_3, %c0_4], %2 {strides = array<i32>} : memref<20x16x192xf32, #tpu.memory_space<vmem>>, vector<2x16x192xf32>,
    %cst_5 = arith.constant 0.000000e+00 : f32
    %4 = vector.broadcast %cst_5 : f32 to vector<1x16x192xf32>
    %c0_6 = arith.constant 0 : index
    %c0_7 = arith.constant 0 : index
    %c0_8 = arith.constant 0 : index
    %5 = vector.load %arg11[%c0_6, %c0_7, %c0_8] : memref<18x16x192xf32, #tpu.memory_space<vmem>>, vector<1x16x192xf32>
    tpu.vector_store %arg11[%c0_6, %c0_7, %c0_8], %4 {strides = array<i32>} : memref<18x16x192xf32, #tpu.memory_space<vmem>>, vector<1x16x192xf32>,
    %cst_9 = arith.constant 0.000000e+00 : f32
    %6 = vector.broadcast %cst_9 : f32 to vector<1x16x192xf32>
    %c17 = arith.constant 17 : index
    %c0_10 = arith.constant 0 : index
    %c0_11 = arith.constant 0 : index
    %7 = vector.load %arg11[%c17, %c0_10, %c0_11] : memref<18x16x192xf32, #tpu.memory_space<vmem>>, vector<1x16x192xf32>
    tpu.vector_store %arg11[%c17, %c0_10, %c0_11], %6 {strides = array<i32>} : memref<18x16x192xf32, #tpu.memory_space<vmem>>, vector<1x16x192xf32>,
    %c0_12 = arith.constant 0 : index
    %c0_13 = arith.constant 0 : index
    %c0_14 = arith.constant 0 : index
    %c0_15 = arith.constant 0 : index
    %8 = vector.load %arg1[%c0_12, %c0_13, %c0_14, %c0_15] : memref<1x16x16x64xf32, #tpu.memory_space<vmem>>, vector<1x8x16x64xf32>
    %9 = vector.shape_cast %8 : vector<1x8x16x64xf32> to vector<8x16x64xf32>
    %cst_16 = arith.constant 0.000000e+00 : f32
    %10 = vector.broadcast %cst_16 : f32 to vector<8x2x64xf32>
    %11 = vector.extract_strided_slice %9 {offsets = [0, 0, 0], sizes = [8, 14, 64], strides = [1, 1, 1]} : vector<8x16x64xf32> to vector<8x14x64xf32>
    %12 = tpu.concatenate %10, %11 in 1 : vector<8x2x64xf32>, vector<8x14x64xf32> -> vector<8x16x64xf32>
    %13 = vector.extract_strided_slice %9 {offsets = [0, 2, 0], sizes = [8, 14, 64], strides = [1, 1, 1]} : vector<8x16x64xf32> to vector<8x14x64xf32>
    %14 = tpu.concatenate %13, %10 in 1 : vector<8x14x64xf32>, vector<8x2x64xf32> -> vector<8x16x64xf32>
    %15 = tpu.concatenate %12, %9, %14 in 2 : vector<8x16x64xf32>, vector<8x16x64xf32>, vector<8x16x64xf32> -> vector<8x16x192xf32>
    %c2 = arith.constant 2 : index
    %c0_17 = arith.constant 0 : index
    %c0_18 = arith.constant 0 : index
    %16 = vector.load %arg10[%c2, %c0_17, %c0_18] : memref<20x16x192xf32, #tpu.memory_space<vmem>>, vector<8x16x192xf32>
    tpu.vector_store %arg10[%c2, %c0_17, %c0_18], %15 {strides = array<i32>} : memref<20x16x192xf32, #tpu.memory_space<vmem>>, vector<8x16x192xf32>,
    %c0_19 = arith.constant 0 : index
    %c8 = arith.constant 8 : index
    %c0_20 = arith.constant 0 : index
    %c0_21 = arith.constant 0 : index
    %17 = vector.load %arg1[%c0_19, %c8, %c0_20, %c0_21] : memref<1x16x16x64xf32, #tpu.memory_space<vmem>>, vector<1x8x16x64xf32>
    %18 = vector.shape_cast %17 : vector<1x8x16x64xf32> to vector<8x16x64xf32>
    %cst_22 = arith.constant 0.000000e+00 : f32
    %19 = vector.broadcast %cst_22 : f32 to vector<8x2x64xf32>
    %20 = vector.extract_strided_slice %18 {offsets = [0, 0, 0], sizes = [8, 14, 64], strides = [1, 1, 1]} : vector<8x16x64xf32> to vector<8x14x64xf32>
    %21 = tpu.concatenate %19, %20 in 1 : vector<8x2x64xf32>, vector<8x14x64xf32> -> vector<8x16x64xf32>
    %22 = vector.extract_strided_slice %18 {offsets = [0, 2, 0], sizes = [8, 14, 64], strides = [1, 1, 1]} : vector<8x16x64xf32> to vector<8x14x64xf32>
    %23 = tpu.concatenate %22, %19 in 1 : vector<8x14x64xf32>, vector<8x2x64xf32> -> vector<8x16x64xf32>
    %24 = tpu.concatenate %21, %18, %23 in 2 : vector<8x16x64xf32>, vector<8x16x64xf32>, vector<8x16x64xf32> -> vector<8x16x192xf32>
    %c10 = arith.constant 10 : index
    %c0_23 = arith.constant 0 : index
    %c0_24 = arith.constant 0 : index
    %25 = vector.load %arg10[%c10, %c0_23, %c0_24] : memref<20x16x192xf32, #tpu.memory_space<vmem>>, vector<8x16x192xf32>
    tpu.vector_store %arg10[%c10, %c0_23, %c0_24], %24 {strides = array<i32>} : memref<20x16x192xf32, #tpu.memory_space<vmem>>, vector<8x16x192xf32>,
    %c0_25 = arith.constant 0 : index
    %c0_26 = arith.constant 0 : index
    %26 = vector.load %arg5[%c0_25, %c0_26] : memref<1x64xf32, #tpu.memory_space<vmem>>, vector<1x64xf32>
    %c0_27 = arith.constant 0 : index
    %c0_28 = arith.constant 0 : index
    %27 = vector.load %arg6[%c0_27, %c0_28] : memref<1x64xf32, #tpu.memory_space<vmem>>, vector<1x64xf32>
    %cst_29 = arith.constant 0.000000e+00 : f32
    %28 = vector.broadcast %cst_29 : f32 to vector<128x64xf32>
    %c0_30 = arith.constant 0 : index
    %c0_31 = arith.constant 0 : index
    %c0_32 = arith.constant 0 : index
    %29 = vector.load %arg10[%c0_30, %c0_31, %c0_32] : memref<20x16x192xf32, #tpu.memory_space<vmem>>, vector<8x16x192xf32>
    %30 = vector.shape_cast %29 : vector<8x16x192xf32> to vector<128x192xf32>
    %c0_33 = arith.constant 0 : index
    %c0_34 = arith.constant 0 : index
    %c0_35 = arith.constant 0 : index
    %31 = vector.load %arg3[%c0_33, %c0_34, %c0_35] : memref<3x192x64xf32, #tpu.memory_space<vmem>>, vector<1x192x64xf32>
    %32 = vector.shape_cast %31 : vector<1x192x64xf32> to vector<192x64xf32>
    %cst_36 = arith.constant dense<0.000000e+00> : vector<128x64xf32>
    %33 = tpu.matmul %30, %32, %cst_36 {dimension_numbers = #tpu.dot_dimension_numbers<[1], [0], [0], [1], [0, 0, 1, 1], [], []>} : vector<128x192xf32>, vector<192x64xf32>, vector<128x64xf32> -> vector<128x64xf32>
    %34 = arith.addf %28, %33 : vector<128x64xf32>
    %c2_37 = arith.constant 2 : index
    %c0_38 = arith.constant 0 : index
    %c0_39 = arith.constant 0 : index
    %35 = vector.load %arg10[%c2_37, %c0_38, %c0_39] : memref<20x16x192xf32, #tpu.memory_space<vmem>>, vector<8x16x192xf32>
    %36 = vector.shape_cast %35 : vector<8x16x192xf32> to vector<128x192xf32>
    %c1 = arith.constant 1 : index
    %c0_40 = arith.constant 0 : index
    %c0_41 = arith.constant 0 : index
    %37 = vector.load %arg3[%c1, %c0_40, %c0_41] : memref<3x192x64xf32, #tpu.memory_space<vmem>>, vector<1x192x64xf32>
    %38 = vector.shape_cast %37 : vector<1x192x64xf32> to vector<192x64xf32>
    %cst_42 = arith.constant dense<0.000000e+00> : vector<128x64xf32>
    %39 = tpu.matmul %36, %38, %cst_42 {dimension_numbers = #tpu.dot_dimension_numbers<[1], [0], [0], [1], [0, 0, 1, 1], [], []>} : vector<128x192xf32>, vector<192x64xf32>, vector<128x64xf32> -> vector<128x64xf32>
    %40 = arith.addf %34, %39 : vector<128x64xf32>
    %c4 = arith.constant 4 : index
    %c0_43 = arith.constant 0 : index
    %c0_44 = arith.constant 0 : index
    %41 = vector.load %arg10[%c4, %c0_43, %c0_44] : memref<20x16x192xf32, #tpu.memory_space<vmem>>, vector<8x16x192xf32>
    %42 = vector.shape_cast %41 : vector<8x16x192xf32> to vector<128x192xf32>
    %c2_45 = arith.constant 2 : index
    %c0_46 = arith.constant 0 : index
    %c0_47 = arith.constant 0 : index
    %43 = vector.load %arg3[%c2_45, %c0_46, %c0_47] : memref<3x192x64xf32, #tpu.memory_space<vmem>>, vector<1x192x64xf32>
    %44 = vector.shape_cast %43 : vector<1x192x64xf32> to vector<192x64xf32>
    %cst_48 = arith.constant dense<0.000000e+00> : vector<128x64xf32>
    %45 = tpu.matmul %42, %44, %cst_48 {dimension_numbers = #tpu.dot_dimension_numbers<[1], [0], [0], [1], [0, 0, 1, 1], [], []>} : vector<128x192xf32>, vector<192x64xf32>, vector<128x64xf32> -> vector<128x64xf32>
    %46 = arith.addf %40, %45 : vector<128x64xf32>
    %47 = vector.broadcast %26 : vector<1x64xf32> to vector<128x64xf32>
    %48 = arith.mulf %46, %47 : vector<128x64xf32>
    %49 = vector.broadcast %27 : vector<1x64xf32> to vector<128x64xf32>
    %50 = arith.addf %48, %49 : vector<128x64xf32>
    %c0_49 = arith.constant 0 : index
    %c0_50 = arith.constant 0 : index
    %c0_51 = arith.constant 0 : index
    %c0_52 = arith.constant 0 : index
    %51 = vector.load %arg2[%c0_49, %c0_50, %c0_51, %c0_52] : memref<1x16x16x64xf32, #tpu.memory_space<vmem>>, vector<1x8x16x64xf32>
    %52 = vector.shape_cast %51 : vector<1x8x16x64xf32> to vector<8x16x64xf32>
    %53 = vector.shape_cast %52 : vector<8x16x64xf32> to vector<128x64xf32>
    %54 = arith.addf %50, %53 : vector<128x64xf32>
    %cst_53 = arith.constant 0.000000e+00 : f32
    %55 = vector.broadcast %cst_53 : f32 to vector<128x64xf32>
    %56 = arith.maximumf %54, %55 : vector<128x64xf32>
    %57 = vector.shape_cast %56 : vector<128x64xf32> to vector<8x16x64xf32>
    %cst_54 = arith.constant 0.000000e+00 : f32
    %58 = vector.broadcast %cst_54 : f32 to vector<8x1x64xf32>
    %59 = vector.extract_strided_slice %57 {offsets = [0, 0, 0], sizes = [8, 15, 64], strides = [1, 1, 1]} : vector<8x16x64xf32> to vector<8x15x64xf32>
    %60 = tpu.concatenate %58, %59 in 1 : vector<8x1x64xf32>, vector<8x15x64xf32> -> vector<8x16x64xf32>
    %61 = vector.extract_strided_slice %57 {offsets = [0, 1, 0], sizes = [8, 15, 64], strides = [1, 1, 1]} : vector<8x16x64xf32> to vector<8x15x64xf32>
    %62 = tpu.concatenate %61, %58 in 1 : vector<8x15x64xf32>, vector<8x1x64xf32> -> vector<8x16x64xf32>
    %63 = tpu.concatenate %60, %57, %62 in 2 : vector<8x16x64xf32>, vector<8x16x64xf32>, vector<8x16x64xf32> -> vector<8x16x192xf32>
    %c1_55 = arith.constant 1 : index
    %c0_56 = arith.constant 0 : index
    %c0_57 = arith.constant 0 : index
    %64 = vector.load %arg11[%c1_55, %c0_56, %c0_57] : memref<18x16x192xf32, #tpu.memory_space<vmem>>, vector<8x16x192xf32>
    tpu.vector_store %arg11[%c1_55, %c0_56, %c0_57], %63 {strides = array<i32>} : memref<18x16x192xf32, #tpu.memory_space<vmem>>, vector<8x16x192xf32>,
    %cst_58 = arith.constant 0.000000e+00 : f32
    %65 = vector.broadcast %cst_58 : f32 to vector<128x64xf32>
    %c8_59 = arith.constant 8 : index
    %c0_60 = arith.constant 0 : index
    %c0_61 = arith.constant 0 : index
    %66 = vector.load %arg10[%c8_59, %c0_60, %c0_61] : memref<20x16x192xf32, #tpu.memory_space<vmem>>, vector<8x16x192xf32>
    %67 = vector.shape_cast %66 : vector<8x16x192xf32> to vector<128x192xf32>
    %c0_62 = arith.constant 0 : index
    %c0_63 = arith.constant 0 : index
    %c0_64 = arith.constant 0 : index
    %68 = vector.load %arg3[%c0_62, %c0_63, %c0_64] : memref<3x192x64xf32, #tpu.memory_space<vmem>>, vector<1x192x64xf32>
    %69 = vector.shape_cast %68 : vector<1x192x64xf32> to vector<192x64xf32>
    %cst_65 = arith.constant dense<0.000000e+00> : vector<128x64xf32>
    %70 = tpu.matmul %67, %69, %cst_65 {dimension_numbers = #tpu.dot_dimension_numbers<[1], [0], [0], [1], [0, 0, 1, 1], [], []>} : vector<128x192xf32>, vector<192x64xf32>, vector<128x64xf32> -> vector<128x64xf32>
    %71 = arith.addf %65, %70 : vector<128x64xf32>
    %c10_66 = arith.constant 10 : index
    %c0_67 = arith.constant 0 : index
    %c0_68 = arith.constant 0 : index
    %72 = vector.load %arg10[%c10_66, %c0_67, %c0_68] : memref<20x16x192xf32, #tpu.memory_space<vmem>>, vector<8x16x192xf32>
    %73 = vector.shape_cast %72 : vector<8x16x192xf32> to vector<128x192xf32>
    %c1_69 = arith.constant 1 : index
    %c0_70 = arith.constant 0 : index
    %c0_71 = arith.constant 0 : index
    %74 = vector.load %arg3[%c1_69, %c0_70, %c0_71] : memref<3x192x64xf32, #tpu.memory_space<vmem>>, vector<1x192x64xf32>
    %75 = vector.shape_cast %74 : vector<1x192x64xf32> to vector<192x64xf32>
    %cst_72 = arith.constant dense<0.000000e+00> : vector<128x64xf32>
    %76 = tpu.matmul %73, %75, %cst_72 {dimension_numbers = #tpu.dot_dimension_numbers<[1], [0], [0], [1], [0, 0, 1, 1], [], []>} : vector<128x192xf32>, vector<192x64xf32>, vector<128x64xf32> -> vector<128x64xf32>
    %77 = arith.addf %71, %76 : vector<128x64xf32>
    %c12 = arith.constant 12 : index
    %c0_73 = arith.constant 0 : index
    %c0_74 = arith.constant 0 : index
    %78 = vector.load %arg10[%c12, %c0_73, %c0_74] : memref<20x16x192xf32, #tpu.memory_space<vmem>>, vector<8x16x192xf32>
    %79 = vector.shape_cast %78 : vector<8x16x192xf32> to vector<128x192xf32>
    %c2_75 = arith.constant 2 : index
    %c0_76 = arith.constant 0 : index
    %c0_77 = arith.constant 0 : index
    %80 = vector.load %arg3[%c2_75, %c0_76, %c0_77] : memref<3x192x64xf32, #tpu.memory_space<vmem>>, vector<1x192x64xf32>
    %81 = vector.shape_cast %80 : vector<1x192x64xf32> to vector<192x64xf32>
    %cst_78 = arith.constant dense<0.000000e+00> : vector<128x64xf32>
    %82 = tpu.matmul %79, %81, %cst_78 {dimension_numbers = #tpu.dot_dimension_numbers<[1], [0], [0], [1], [0, 0, 1, 1], [], []>} : vector<128x192xf32>, vector<192x64xf32>, vector<128x64xf32> -> vector<128x64xf32>
    %83 = arith.addf %77, %82 : vector<128x64xf32>
    %84 = vector.broadcast %26 : vector<1x64xf32> to vector<128x64xf32>
    %85 = arith.mulf %83, %84 : vector<128x64xf32>
    %86 = vector.broadcast %27 : vector<1x64xf32> to vector<128x64xf32>
    %87 = arith.addf %85, %86 : vector<128x64xf32>
    %c0_79 = arith.constant 0 : index
    %c8_80 = arith.constant 8 : index
    %c0_81 = arith.constant 0 : index
    %c0_82 = arith.constant 0 : index
    %88 = vector.load %arg2[%c0_79, %c8_80, %c0_81, %c0_82] : memref<1x16x16x64xf32, #tpu.memory_space<vmem>>, vector<1x8x16x64xf32>
    %89 = vector.shape_cast %88 : vector<1x8x16x64xf32> to vector<8x16x64xf32>
    %90 = vector.shape_cast %89 : vector<8x16x64xf32> to vector<128x64xf32>
    %91 = arith.addf %87, %90 : vector<128x64xf32>
    %cst_83 = arith.constant 0.000000e+00 : f32
    %92 = vector.broadcast %cst_83 : f32 to vector<128x64xf32>
    %93 = arith.maximumf %91, %92 : vector<128x64xf32>
    %94 = vector.shape_cast %93 : vector<128x64xf32> to vector<8x16x64xf32>
    %cst_84 = arith.constant 0.000000e+00 : f32
    %95 = vector.broadcast %cst_84 : f32 to vector<8x1x64xf32>
    %96 = vector.extract_strided_slice %94 {offsets = [0, 0, 0], sizes = [8, 15, 64], strides = [1, 1, 1]} : vector<8x16x64xf32> to vector<8x15x64xf32>
    %97 = tpu.concatenate %95, %96 in 1 : vector<8x1x64xf32>, vector<8x15x64xf32> -> vector<8x16x64xf32>
    %98 = vector.extract_strided_slice %94 {offsets = [0, 1, 0], sizes = [8, 15, 64], strides = [1, 1, 1]} : vector<8x16x64xf32> to vector<8x15x64xf32>
    %99 = tpu.concatenate %98, %95 in 1 : vector<8x15x64xf32>, vector<8x1x64xf32> -> vector<8x16x64xf32>
    %100 = tpu.concatenate %97, %94, %99 in 2 : vector<8x16x64xf32>, vector<8x16x64xf32>, vector<8x16x64xf32> -> vector<8x16x192xf32>
    %c9 = arith.constant 9 : index
    %c0_85 = arith.constant 0 : index
    %c0_86 = arith.constant 0 : index
    %101 = vector.load %arg11[%c9, %c0_85, %c0_86] : memref<18x16x192xf32, #tpu.memory_space<vmem>>, vector<8x16x192xf32>
    tpu.vector_store %arg11[%c9, %c0_85, %c0_86], %100 {strides = array<i32>} : memref<18x16x192xf32, #tpu.memory_space<vmem>>, vector<8x16x192xf32>,
    %c0_87 = arith.constant 0 : index
    %c0_88 = arith.constant 0 : index
    %102 = vector.load %arg7[%c0_87, %c0_88] : memref<1x64xf32, #tpu.memory_space<vmem>>, vector<1x64xf32>
    %c0_89 = arith.constant 0 : index
    %c0_90 = arith.constant 0 : index
    %103 = vector.load %arg8[%c0_89, %c0_90] : memref<1x64xf32, #tpu.memory_space<vmem>>, vector<1x64xf32>
    %cst_91 = arith.constant 0.000000e+00 : f32
    %104 = vector.broadcast %cst_91 : f32 to vector<128x64xf32>
    %c0_92 = arith.constant 0 : index
    %c0_93 = arith.constant 0 : index
    %c0_94 = arith.constant 0 : index
    %105 = vector.load %arg11[%c0_92, %c0_93, %c0_94] : memref<18x16x192xf32, #tpu.memory_space<vmem>>, vector<8x16x192xf32>
    %106 = vector.shape_cast %105 : vector<8x16x192xf32> to vector<128x192xf32>
    %c0_95 = arith.constant 0 : index
    %c0_96 = arith.constant 0 : index
    %c0_97 = arith.constant 0 : index
    %107 = vector.load %arg4[%c0_95, %c0_96, %c0_97] : memref<3x192x64xf32, #tpu.memory_space<vmem>>, vector<1x192x64xf32>
    %108 = vector.shape_cast %107 : vector<1x192x64xf32> to vector<192x64xf32>
    %cst_98 = arith.constant dense<0.000000e+00> : vector<128x64xf32>
    %109 = tpu.matmul %106, %108, %cst_98 {dimension_numbers = #tpu.dot_dimension_numbers<[1], [0], [0], [1], [0, 0, 1, 1], [], []>} : vector<128x192xf32>, vector<192x64xf32>, vector<128x64xf32> -> vector<128x64xf32>
    %110 = arith.addf %104, %109 : vector<128x64xf32>
    %c1_99 = arith.constant 1 : index
    %c0_100 = arith.constant 0 : index
    %c0_101 = arith.constant 0 : index
    %111 = vector.load %arg11[%c1_99, %c0_100, %c0_101] : memref<18x16x192xf32, #tpu.memory_space<vmem>>, vector<8x16x192xf32>
    %112 = vector.shape_cast %111 : vector<8x16x192xf32> to vector<128x192xf32>
    %c1_102 = arith.constant 1 : index
    %c0_103 = arith.constant 0 : index
    %c0_104 = arith.constant 0 : index
    %113 = vector.load %arg4[%c1_102, %c0_103, %c0_104] : memref<3x192x64xf32, #tpu.memory_space<vmem>>, vector<1x192x64xf32>
    %114 = vector.shape_cast %113 : vector<1x192x64xf32> to vector<192x64xf32>
    %cst_105 = arith.constant dense<0.000000e+00> : vector<128x64xf32>
    %115 = tpu.matmul %112, %114, %cst_105 {dimension_numbers = #tpu.dot_dimension_numbers<[1], [0], [0], [1], [0, 0, 1, 1], [], []>} : vector<128x192xf32>, vector<192x64xf32>, vector<128x64xf32> -> vector<128x64xf32>
    %116 = arith.addf %110, %115 : vector<128x64xf32>
    %c2_106 = arith.constant 2 : index
    %c0_107 = arith.constant 0 : index
    %c0_108 = arith.constant 0 : index
    %117 = vector.load %arg11[%c2_106, %c0_107, %c0_108] : memref<18x16x192xf32, #tpu.memory_space<vmem>>, vector<8x16x192xf32>
    %118 = vector.shape_cast %117 : vector<8x16x192xf32> to vector<128x192xf32>
    %c2_109 = arith.constant 2 : index
    %c0_110 = arith.constant 0 : index
    %c0_111 = arith.constant 0 : index
    %119 = vector.load %arg4[%c2_109, %c0_110, %c0_111] : memref<3x192x64xf32, #tpu.memory_space<vmem>>, vector<1x192x64xf32>
    %120 = vector.shape_cast %119 : vector<1x192x64xf32> to vector<192x64xf32>
    %cst_112 = arith.constant dense<0.000000e+00> : vector<128x64xf32>
    %121 = tpu.matmul %118, %120, %cst_112 {dimension_numbers = #tpu.dot_dimension_numbers<[1], [0], [0], [1], [0, 0, 1, 1], [], []>} : vector<128x192xf32>, vector<192x64xf32>, vector<128x64xf32> -> vector<128x64xf32>
    %122 = arith.addf %116, %121 : vector<128x64xf32>
    %123 = vector.broadcast %102 : vector<1x64xf32> to vector<128x64xf32>
    %124 = arith.mulf %122, %123 : vector<128x64xf32>
    %125 = vector.broadcast %103 : vector<1x64xf32> to vector<128x64xf32>
    %126 = arith.addf %124, %125 : vector<128x64xf32>
    %cst_113 = arith.constant 0.000000e+00 : f32
    %127 = vector.broadcast %cst_113 : f32 to vector<128x64xf32>
    %128 = arith.maximumf %126, %127 : vector<128x64xf32>
    %129 = vector.shape_cast %128 : vector<128x64xf32> to vector<8x16x64xf32>
    %c0_114 = arith.constant 0 : index
    %c0_115 = arith.constant 0 : index
    %c0_116 = arith.constant 0 : index
    %c0_117 = arith.constant 0 : index
    %130 = vector.load %arg9[%c0_114, %c0_115, %c0_116, %c0_117] : memref<1x16x16x64xf32, #tpu.memory_space<vmem>>, vector<1x8x16x64xf32>
    %131 = vector.shape_cast %130 : vector<1x8x16x64xf32> to vector<8x16x64xf32>
    %132 = vector.shape_cast %129 : vector<8x16x64xf32> to vector<1x8x16x64xf32>
    tpu.vector_store %arg9[%c0_114, %c0_115, %c0_116, %c0_117], %132 {strides = array<i32>} : memref<1x16x16x64xf32, #tpu.memory_space<vmem>>, vector<1x8x16x64xf32>,
    %cst_118 = arith.constant 0.000000e+00 : f32
    %133 = vector.broadcast %cst_118 : f32 to vector<128x64xf32>
    %c8_119 = arith.constant 8 : index
    %c0_120 = arith.constant 0 : index
    %c0_121 = arith.constant 0 : index
    %134 = vector.load %arg11[%c8_119, %c0_120, %c0_121] : memref<18x16x192xf32, #tpu.memory_space<vmem>>, vector<8x16x192xf32>
    %135 = vector.shape_cast %134 : vector<8x16x192xf32> to vector<128x192xf32>
    %c0_122 = arith.constant 0 : index
    %c0_123 = arith.constant 0 : index
    %c0_124 = arith.constant 0 : index
    %136 = vector.load %arg4[%c0_122, %c0_123, %c0_124] : memref<3x192x64xf32, #tpu.memory_space<vmem>>, vector<1x192x64xf32>
    %137 = vector.shape_cast %136 : vector<1x192x64xf32> to vector<192x64xf32>
    %cst_125 = arith.constant dense<0.000000e+00> : vector<128x64xf32>
    %138 = tpu.matmul %135, %137, %cst_125 {dimension_numbers = #tpu.dot_dimension_numbers<[1], [0], [0], [1], [0, 0, 1, 1], [], []>} : vector<128x192xf32>, vector<192x64xf32>, vector<128x64xf32> -> vector<128x64xf32>
    %139 = arith.addf %133, %138 : vector<128x64xf32>
    %c9_126 = arith.constant 9 : index
    %c0_127 = arith.constant 0 : index
    %c0_128 = arith.constant 0 : index
    %140 = vector.load %arg11[%c9_126, %c0_127, %c0_128] : memref<18x16x192xf32, #tpu.memory_space<vmem>>, vector<8x16x192xf32>
    %141 = vector.shape_cast %140 : vector<8x16x192xf32> to vector<128x192xf32>
    %c1_129 = arith.constant 1 : index
    %c0_130 = arith.constant 0 : index
    %c0_131 = arith.constant 0 : index
    %142 = vector.load %arg4[%c1_129, %c0_130, %c0_131] : memref<3x192x64xf32, #tpu.memory_space<vmem>>, vector<1x192x64xf32>
    %143 = vector.shape_cast %142 : vector<1x192x64xf32> to vector<192x64xf32>
    %cst_132 = arith.constant dense<0.000000e+00> : vector<128x64xf32>
    %144 = tpu.matmul %141, %143, %cst_132 {dimension_numbers = #tpu.dot_dimension_numbers<[1], [0], [0], [1], [0, 0, 1, 1], [], []>} : vector<128x192xf32>, vector<192x64xf32>, vector<128x64xf32> -> vector<128x64xf32>
    %145 = arith.addf %139, %144 : vector<128x64xf32>
    %c10_133 = arith.constant 10 : index
    %c0_134 = arith.constant 0 : index
    %c0_135 = arith.constant 0 : index
    %146 = vector.load %arg11[%c10_133, %c0_134, %c0_135] : memref<18x16x192xf32, #tpu.memory_space<vmem>>, vector<8x16x192xf32>
    %147 = vector.shape_cast %146 : vector<8x16x192xf32> to vector<128x192xf32>
    %c2_136 = arith.constant 2 : index
    %c0_137 = arith.constant 0 : index
    %c0_138 = arith.constant 0 : index
    %148 = vector.load %arg4[%c2_136, %c0_137, %c0_138] : memref<3x192x64xf32, #tpu.memory_space<vmem>>, vector<1x192x64xf32>
    %149 = vector.shape_cast %148 : vector<1x192x64xf32> to vector<192x64xf32>
    %cst_139 = arith.constant dense<0.000000e+00> : vector<128x64xf32>
    %150 = tpu.matmul %147, %149, %cst_139 {dimension_numbers = #tpu.dot_dimension_numbers<[1], [0], [0], [1], [0, 0, 1, 1], [], []>} : vector<128x192xf32>, vector<192x64xf32>, vector<128x64xf32> -> vector<128x64xf32>
    %151 = arith.addf %145, %150 : vector<128x64xf32>
    %152 = vector.broadcast %102 : vector<1x64xf32> to vector<128x64xf32>
    %153 = arith.mulf %151, %152 : vector<128x64xf32>
    %154 = vector.broadcast %103 : vector<1x64xf32> to vector<128x64xf32>
    %155 = arith.addf %153, %154 : vector<128x64xf32>
    %cst_140 = arith.constant 0.000000e+00 : f32
    %156 = vector.broadcast %cst_140 : f32 to vector<128x64xf32>
    %157 = arith.maximumf %155, %156 : vector<128x64xf32>
    %158 = vector.shape_cast %157 : vector<128x64xf32> to vector<8x16x64xf32>
    %c0_141 = arith.constant 0 : index
    %c8_142 = arith.constant 8 : index
    %c0_143 = arith.constant 0 : index
    %c0_144 = arith.constant 0 : index
    %159 = vector.load %arg9[%c0_141, %c8_142, %c0_143, %c0_144] : memref<1x16x16x64xf32, #tpu.memory_space<vmem>>, vector<1x8x16x64xf32>
    %160 = vector.shape_cast %159 : vector<1x8x16x64xf32> to vector<8x16x64xf32>
    %161 = vector.shape_cast %158 : vector<8x16x64xf32> to vector<1x8x16x64xf32>
    tpu.vector_store %arg9[%c0_141, %c8_142, %c0_143, %c0_144], %161 {strides = array<i32>} : memref<1x16x16x64xf32, #tpu.memory_space<vmem>>, vector<1x8x16x64xf32>,
    return
  }
  func.func @transform_0(%arg0: i32) -> (i32, i32, i32, i32) {
    %c0_i32 = arith.constant 0 : i32
    %c0_i32_0 = arith.constant 0 : i32
    %c0_i32_1 = arith.constant 0 : i32
    %c0_i32_2 = arith.constant 0 : i32
    return %arg0, %c0_i32, %c0_i32_0, %c0_i32_1 : i32, i32, i32, i32
  }
  func.func @transform_1(%arg0: i32) -> (i32, i32, i32, i32) {
    %c0_i32 = arith.constant 0 : i32
    %c0_i32_0 = arith.constant 0 : i32
    %c0_i32_1 = arith.constant 0 : i32
    %c0_i32_2 = arith.constant 0 : i32
    return %arg0, %c0_i32, %c0_i32_0, %c0_i32_1 : i32, i32, i32, i32
  }
  func.func @transform_2(%arg0: i32) -> (i32, i32, i32) {
    %c0_i32 = arith.constant 0 : i32
    %c0_i32_0 = arith.constant 0 : i32
    %c0_i32_1 = arith.constant 0 : i32
    %c0_i32_2 = arith.constant 0 : i32
    return %c0_i32, %c0_i32_0, %c0_i32_1 : i32, i32, i32
  }
  func.func @transform_3(%arg0: i32) -> (i32, i32, i32) {
    %c0_i32 = arith.constant 0 : i32
    %c0_i32_0 = arith.constant 0 : i32
    %c0_i32_1 = arith.constant 0 : i32
    %c0_i32_2 = arith.constant 0 : i32
    return %c0_i32, %c0_i32_0, %c0_i32_1 : i32, i32, i32
  }
  func.func @transform_4(%arg0: i32) -> (i32, i32) {
    %c0_i32 = arith.constant 0 : i32
    %c0_i32_0 = arith.constant 0 : i32
    %c0_i32_1 = arith.constant 0 : i32
    return %c0_i32, %c0_i32_0 : i32, i32
  }
  func.func @transform_5(%arg0: i32) -> (i32, i32) {
    %c0_i32 = arith.constant 0 : i32
    %c0_i32_0 = arith.constant 0 : i32
    %c0_i32_1 = arith.constant 0 : i32
    return %c0_i32, %c0_i32_0 : i32, i32
  }
  func.func @transform_6(%arg0: i32) -> (i32, i32) {
    %c0_i32 = arith.constant 0 : i32
    %c0_i32_0 = arith.constant 0 : i32
    %c0_i32_1 = arith.constant 0 : i32
    return %c0_i32, %c0_i32_0 : i32, i32
  }
  func.func @transform_7(%arg0: i32) -> (i32, i32) {
    %c0_i32 = arith.constant 0 : i32
    %c0_i32_0 = arith.constant 0 : i32
    %c0_i32_1 = arith.constant 0 : i32
    return %c0_i32, %c0_i32_0 : i32, i32
  }
  func.func @transform_8(%arg0: i32) -> (i32, i32, i32, i32) {
    %c0_i32 = arith.constant 0 : i32
    %c0_i32_0 = arith.constant 0 : i32
    %c0_i32_1 = arith.constant 0 : i32
    %c0_i32_2 = arith.constant 0 : i32
    return %arg0, %c0_i32, %c0_i32_0, %c0_i32_1 : i32, i32, i32, i32
  }
}

</mosaic_0001>

<bundles_post_ra>
// kernel: cross_m_forward.1
= control target key start
LH: loop header
LB: loop body
LE: loop exit
PB: predicated region body
PF: predicated region fallthrough
CT: control target
= control target key end

     0   :  { %s8360_s0 = inlined_call_operand.hbm [shape: f32[2,16,16,64], index: 0, kind: input, shape index: {}]   ;;  %s8361_s1 = inlined_call_operand.hbm [shape: f32[2,16,16,64], index: 1, kind: input, shape index: {}]   ;;  %s8362_s2 = inlined_call_operand.hbm [shape: f32[3,192,64], index: 2, kind: input, shape index: {}]   ;;  %s8363_s3 = inlined_call_operand.hbm [shape: f32[3,192,64], index: 3, kind: input, shape index: {}]   ;;  %s8364_s4 = inlined_call_operand.vmem [shape: f32[1,64], index: 4, kind: input, shape index: {}]   ;;  %s8365_s5 = inlined_call_operand.vmem [shape: f32[1,64], index: 5, kind: input, shape index: {}]   ;;  %s8366_s6 = inlined_call_operand.vmem [shape: f32[1,64], index: 6, kind: input, shape index: {}]   ;;  %s8367_s7 = inlined_call_operand.vmem [shape: f32[1,64], index: 7, kind: input, shape index: {}]   ;;  %s8368_s8 = inlined_call_operand.hbm [shape: f32[2,16,16,64], index: 8, kind: output, shape index: {}]  }
   0x1   :  { %8428 = sst [smem:[#allocation33_spill]] %s8360_s0 }
   0x2   :  { %8429 = sst [smem:[#allocation34_spill]] %s8362_s2 }
   0x3   :  { %8430 = sst [smem:[#allocation35_spill]] %s8363_s3 }
   0x4   :  { %13 = vsyncpa [#allocation5], 0 }
   0x5   :  { %15 = vsyncpa [#allocation5 + $0x1], 0 }
   0x6   :  { %16 = vsyncpa [#allocation8], 0 }
   0x7   :  { %18 = vsyncpa [#allocation8 + $0x1], 0 }
   0x8   :  { %19 = vsyncpa [#allocation11], 0 }
   0x9   :  { %20 = vsyncpa [#allocation6], 0 }
   0xa   :  { %22 = vsyncpa [#allocation6 + $0x1], 0  ;;  %s5397_s27 = smov 0   ;;  %s5399_s28 = smov 0  }
   0xb   :  { %s5401_s29 = smov 0   ;;  %s5403_s30 = smov 0  }
   0xc LB: > { %8431 = sst [smem:[#allocation18_spill]] %s5335_s29  ;;  %s5418_s9 = sadd.s32 4294967295, %s5339_s30   ;;  %s5339_s30 = sphi %s5403_s30, %s8524_s30   ;;  %s5335_s29 = sphi %s5401_s29, %s8521_s29   ;;  %s5331_s28 = sphi %s5399_s28, %s8523_s28   ;;  %s5327_s27 = sphi %s5397_s27, %s8522_s27  }
   0xd   : > { %s4802_s10 = sadd.s32 4294967294, %s5339_s30   ;;  %p48_p0 = scmp.ne.s32.totalorder %s5331_s28, %s5327_s27 }
   0xe   : > { %p8374_p1 = scmp.eq.s32.totalorder %s5418_s9, 0  ;;  %p224_p2 = scmp.eq.s32.totalorder %s5418_s9, 1 }
   0xf   : > { %p230_p3 = scmp.eq.s32.totalorder %s4802_s10, 1  ;;  %p4803_p5 = scmp.ge.s32.totalorder %s5339_s30, 1 }
  0x10   : > { %p5427_p4 = por %p8374_p1, %p48_p0  ;;  %p237_p7 = scmp.lt.s32.totalorder %s5339_s30, 3 }
  0x11   : > { %p5432_p6 = por %p230_p3, %p48_p0  ;;  %s5341_s14 = smov [#allocation9]  }
  0x12   : > { %s8432_s11 = scalar_select %p5427_p4, 1, 0 }
  0x13   : > { %s8433_s12 = scalar_select %p5432_p6, 1, 0 }
  0x14   : > { %p5437_p8 = pnand %p4803_p5, %p237_p7  ;;  %s249_s15 = sshll.u32 %s5341_s14, 4  ;;  %s250_s15 = int_to_ptr.vmem [resolvable:$true] %s249_s15 }
  0x15   : > { %s5342_s17 = smov [#allocation10]   ;;  %s5166_s19 = scalar_lea.vmem %s250_s15, 9216 }
  0x16   : > { %p5085_p9 = pneg %p5437_p8  ;;  %s262_s18 = sshll.u32 %s5342_s17, 4  ;;  %s263_s18 = int_to_ptr.vmem [resolvable:$true] %s262_s18 }
  0x17   : > { %p5167_p13 = scmp.ne.s32.totalorder %s250_s15, %s5166_s19  ;;  %p5174_p5 = scmp.lt.s32.totalorder %s250_s15, %s250_s15 }
  0x18   : > { %p5446_p11 = pnand %p5085_p9, %p8374_p1  ;;  %p5175_p7 = scmp.lt.s32.totalorder %s5166_s19, %s5166_s19 }
  0x1a   : > { %p5157_p12 = pneg %p5446_p11  ;;  %p5176_p10 = por %p5175_p7, %p5174_p5 }
  0x1c   : > { %p5169_p0 = pnand %p5167_p13, %p5157_p12 }
  0x1e   : > { %p5170_p3 = pneg %p5169_p0 }
  0x20   : > { %p5177_p9 = pnand %p5176_p10, %p5170_p3 }
  0x22   : > { %5180 = shalt.err (!%p5177_p9)
}
  0x23   : > { %s8369_s20 = smov 128   ;;  %s8371_s21 = smov 8  }
  0x24   : > { %s8436_s2 = sld [smem:[#allocation34_spill]]  ;;  %s5192_s24 = scalar_lea.vmem %s263_s18, 9216 }
  0x25   : > { %p5193_p13 = scmp.ne.s32.totalorder %s263_s18, %s5192_s24  ;;  %p5200_p10 = scmp.lt.s32.totalorder %s263_s18, %s263_s18 }
  0x26   : > { %p5201_p3 = scmp.lt.s32.totalorder %s5192_s24, %s5192_s24 }
  0x27   : > { %p5195_p0 = pnand %p5193_p13, %p5157_p12 }
  0x28   : > { %p5202_p7 = por %p5201_p3, %p5200_p10 }
  0x29   : > { %p5196_p5 = pneg %p5195_p0 }
  0x2a   : > { %5088 = dma.hbm_to_vmem [thread:$0]  (!%p5446_p11), %s8436_s2, 9216, %s250_s15, [#allocation8], %s8369_s20, %s8369_s20, %s8371_s21  }
  0x2b   : > { %p5203_p9 = pnand %p5202_p7, %p5196_p5 }
  0x2d   : > { %5206 = shalt.err (!%p5203_p9)
}
  0x2e   : > { %s8437_s3 = sld [smem:[#allocation35_spill]]  ;;  %s5475_s10 = sadd.s32 1, %s5339_s30  }
  0x2f   : > { %s35_s14 = sadd.s32 1, %s5335_s29  ;;  %s32_s15 = ssub.s32 %s5339_s30, %s5475_s10 }
  0x30   : > { %p42_p12 = scmp.ne.s32.totalorder %s5335_s29, %s5331_s28  ;;  %p33_p13 = scmp.eq.s32.totalorder %s32_s15, 0 }
  0x31   : > { %p43_p0 = scmp.eq.s32.totalorder %s5339_s30, 0  ;;  %p5105_p10 = scmp.lt.s32.totalorder %s5339_s30, 2 }
  0x32   : > { %p5485_p5 = por %p224_p2, %p42_p12  ;;  %s288_s19 = sand.u32 1, %s5335_s29  }
  0x33   : > { %s5491_s17 = scalar_select %p33_p13, %s5335_s29, %s35_s14  }
  0x34   : > { %5091 = dma.hbm_to_vmem [thread:$0]  (!%p5446_p11), %s8437_s3, 9216, %s263_s18, [#allocation11], %s8369_s20, %s8369_s20, %s8371_s21  }
  0x35   : > { %s8438_s16 = scalar_select %p5485_p5, 1, 0 }
  0x36   : > { %8439 = sst [smem:[#allocation19_spill]] %s5491_s17  ;;  %p44_p3 = por %p43_p0, %p42_p12 }
  0x37   : > { %s4807_s22 = sshll.u32 %s288_s19, 8  ;;  %s5068_s18 = sshll.u32 %s5339_s30, 12 }
  0x38   : > { %s8440_s0 = sld [smem:[#allocation33_spill]]  ;;  %s292_s26 = scalar_lea.vmem [#allocation4], %s4807_s22 }
  0x39   : > { %s299_s15 = sshll.u32 %s292_s26, 4  ;;  %p5502_p2 = pnand %p5105_p10, %p44_p3  ;;  %s5500_s15 = int_to_ptr.vmem [resolvable:$true] %s299_s15 }
  0x3a   : > { %s5509_s2 = scalar_lea.hbm %s8361_s1, %s5068_s18  ;;  %s313_s23 = scalar_lea.vmem [#allocation7], %s4807_s22 }
  0x3b   : > { %s5511_s24 = sshll.u32 %s313_s23, 4  ;;  %s5513_s3 = scalar_lea.sflag [#allocation5], %s288_s19  ;;  %s5544_s24 = int_to_ptr.vmem [resolvable:$true] %s5511_s24 }
  0x3c   : > { %p5209_p7 = pneg %p5502_p2 }
  0x3e   : > { %s5498_s25 = scalar_lea.hbm %s8440_s0, %s5068_s18  ;;  %s5212_s21 = scalar_lea.hbm %s8440_s0, 8192 }
  0x3f   : > { %s5207_s17 = scalar_lea.hbm %s5498_s25, 4096  ;;  %p5213_p13 = scmp.lt.s32.totalorder %s5498_s25, %s8440_s0 }
  0x40   : > { %p5208_p11 = scmp.ne.s32.totalorder %s5498_s25, %s5207_s17  ;;  %p5214_p0 = scmp.lt.s32.totalorder %s5212_s21, %s5207_s17 }
  0x42   : > { %p5210_p9 = pnand %p5209_p7, %p5208_p11  ;;  %p5215_p10 = por %p5214_p0, %p5213_p13 }
  0x44   : > { %p5211_p12 = pneg %p5210_p9 }
  0x46   : > { %p5216_p3 = pnand %p5215_p10, %p5211_p12 }
  0x48   : > { %5219 = shalt.err (!%p5216_p3)
}
  0x49   : > { %s5220_s19 = scalar_lea.vmem %s5500_s15, 4096  ;;  %s5345_s29 = smov [#allocation4]  }
  0x4a   : > { %p5221_p1 = scmp.ne.s32.totalorder %s5500_s15, %s5220_s19  ;;  %s5225_s22 = sshll.u32 %s5345_s29, 4  ;;  %s5226_s22 = int_to_ptr.vmem [resolvable:$false] %s5225_s22 }
  0x4b   : > { %s5227_s23 = scalar_lea.vmem %s5226_s22, 8192  ;;  %p5228_p6 = scmp.lt.s32.totalorder %s5500_s15, %s5226_s22 }
  0x4c   : > { %p5223_p11 = pnand %p5221_p1, %p5209_p7  ;;  %p5229_p5 = scmp.lt.s32.totalorder %s5227_s23, %s5220_s19 }
  0x4e   : > { %p5224_p9 = pneg %p5223_p11  ;;  %p5230_p4 = por %p5229_p5, %p5228_p6 }
  0x50   : > { %p5231_p13 = pnand %p5230_p4, %p5224_p9 }
  0x52   : > { %5234 = shalt.err (!%p5231_p13)
}
  0x53   : > { %s8442_s17 = smov 8   ;;  %s8443_s26 = smov 128  }
  0x54   : > { %5095 = dma.hbm_to_vmem [thread:$0]  (!%p5502_p2), %s5498_s25, 4096, %s5500_s15, %s5513_s3, %s8443_s26, %s8443_s26, %s8442_s17  }
  0x55   : > { %s309_s21 = sand.u32 1, %s5339_s30   ;;  %s5235_s18 = scalar_lea.hbm %s5509_s2, 4096 }
  0x56   : > { %s310_s14 = scalar_lea.sflag [#allocation8], %s309_s21  ;;  %p5236_p1 = scmp.ne.s32.totalorder %s5509_s2, %s5235_s18 }
  0x57   : > { %s5240_s22 = scalar_lea.hbm %s8361_s1, 8192  ;;  %p5241_p5 = scmp.lt.s32.totalorder %s5509_s2, %s8361_s1 }
  0x58   : > { %p5238_p4 = pnand %p5236_p1, %p5209_p7  ;;  %p5242_p12 = scmp.lt.s32.totalorder %s5240_s22, %s5235_s18 }
  0x5a   : > { %p5239_p6 = pneg %p5238_p4  ;;  %p5243_p0 = por %p5242_p12, %p5241_p5 }
  0x5c   : > { %p5244_p10 = pnand %p5243_p0, %p5239_p6 }
  0x5e   : > { %5247 = shalt.err (!%p5244_p10)
}
  0x5f   : > { %s5248_s3 = scalar_lea.vmem %s5544_s24, 4096  ;;  %s5346_s25 = smov [#allocation7]  }
  0x60   : > { %p5249_p3 = scmp.ne.s32.totalorder %s5544_s24, %s5248_s3  ;;  %s5253_s15 = sshll.u32 %s5346_s25, 4  ;;  %s5254_s15 = int_to_ptr.vmem [resolvable:$false] %s5253_s15 }
  0x61   : > { %s5255_s21 = scalar_lea.vmem %s5254_s15, 8192  ;;  %p5256_p13 = scmp.lt.s32.totalorder %s5544_s24, %s5254_s15 }
  0x62   : > { %p5251_p11 = pnand %p5249_p3, %p5209_p7  ;;  %p5257_p1 = scmp.lt.s32.totalorder %s5255_s21, %s5248_s3 }
  0x64   : > { %p5252_p9 = pneg %p5251_p11  ;;  %p5258_p4 = por %p5257_p1, %p5256_p13 }
  0x66   : > { %p5259_p5 = pnand %p5258_p4, %p5252_p9 }
  0x68   : > { %5262 = shalt.err (!%p5259_p5)
}
  0x69   : > { %5098 = dma.hbm_to_vmem [thread:$0]  (!%p5502_p2), %s5509_s2, 4096, %s5544_s24, %s310_s14, %s8443_s26, %s8443_s26, %s8442_s17  }
  0x6a   : > { %332 = sbr.rel (%p5437_p8) target bundleno = 1062 (0x426), region = 52 }
  0x6f   : > { %s5575_s0 = sand.u32 1, %s5331_s28   ;;  %p8444_p7 = scmp.ne.s32.totalorder %s8432_s11, 0 }
  0x70   : > { %s5578_s18 = sshll.u32 %s5575_s0, 8  ;;  %s335_s19 = scalar_lea.sflag [#allocation5], %s5575_s0 }
  0x71   : > { %s5582_s20 = scalar_lea.vmem [#allocation4], %s5578_s18 }
  0x72   : > { %5306 = dma.done.wait (%p8444_p7), %s335_s19, 4096  }
  0x73   : > { %5308 = vsyncadd (%p8444_p7), %s335_s19, 4294963200  ;;  %s343_s2 = sand.u32 1, %s5418_s9   ;;  %s5590_s24 = scalar_lea.vmem [#allocation7], %s5578_s18 }
  0x74   : > { %s344_s13 = scalar_lea.sflag [#allocation8], %s343_s2 }
  0x75   : > { %5310 = dma.done.wait (%p8444_p7), %s344_s13, 4096  }
  0x76   : > { %5312 = vsyncadd (%p8444_p7), %s344_s13, 4294963200  ;;  %p8445_p8 = scmp.eq.s32.totalorder %s5418_s9, 0 }
  0x78   : > { %5314 = dma.done.wait (%p8445_p8), [#allocation8], 9216   ;;  %p8446_p2 = pmov %p8445_p8 }
  0x7a   : > { %5316 = vsyncadd (%p8446_p2), [#allocation8], 4294958080  ;;  %p8447_p6 = pmov %p8446_p2 }
  0x7b   : > { %p8448_p12 = pmov %p8446_p2 }
  0x7c   : > { %5318 = dma.done.wait (%p8447_p6), [#allocation11], 9216  }
  0x7d   : > { %5320 = vsyncadd (%p8448_p12), [#allocation11], 4294958080  ;;  %vm394_vm0 = vcmask 523264   ;;  %v5347_v0 = vmov 0.0   ;;  %v5632_v1 = vld [vmem:[%s5582_s20] sm:$0xff]  ;;  %v5635_v2 = vld [vmem:[%s5582_s20 + $0x8] sm:$0xff] }
  0x7e   : > { %1229 = vmatprep.subr.mxu1 %v5347_v0  ;;  %393 = vst [vmem:[#allocation2] sm:$0xff] %v5347_v0  ;;  %395 = vst.msk [vmem:[#allocation2 + $0x8] sm:$0xff] %vm394_vm0, %v5347_v0  ;;  %1036 = vmatprep.subr.mxu0 %v5347_v0  ;;  %vm501_vm1 = vcmask 1045504   ;;  %v5638_v3 = vld [vmem:[%s5582_s20 + $0x10] sm:$0xff]  ;;  %s5348_s11 = smov 64   ;;  %v502_v4 = vrot.slane %v5632_v1, 2 }
  0x7f   : > { %397 = vst.msk [vmem:[#allocation2 + $0x18] sm:$0xff] %vm394_vm0, %v5347_v0  ;;  %399 = vst.msk [vmem:[#allocation2 + $0x28] sm:$0xff] %vm394_vm0, %v5347_v0  ;;  %550 = vrot.lane.b32.xlu0 %v5632_v1, %s5348_s11  ;;  %v503_v5 = vrot.slane %v5635_v2, 2  ;;  %554 = vrot.lane.b32.xlu1 %v5638_v3, %s5348_s11  ;;  %v5647_v6 = vld [vmem:[%s5582_s20 + $0x18] sm:$0xff]  ;;  %v505_v7 = vrot.slane %v5638_v3, 2  ;;  %v5652_v9 = vld [vmem:[%s5582_s20 + $0x20] sm:$0xff] }
  0x80   : > { %401 = vst.msk [vmem:[#allocation2 + $0x38] sm:$0xff] %vm394_vm0, %v5347_v0  ;;  %404 = vst.msk [vmem:[#allocation2 + $0x248] sm:$0xff] %vm394_vm0, %v5347_v0  ;;  %v506_v8 = vrot.slane %v5647_v6, 2  ;;  %v508_v12 = vrot.slane %v5652_v9, 2  ;;  %v5658_v13 = vld [vmem:[%s5582_s20 + $0x28] sm:$0xff]  ;;  %v5666_v17 = vld [vmem:[%s5582_s20 + $0x30] sm:$0xff] }
  0x81   : > { %406 = vst.msk [vmem:[#allocation2 + $0x258] sm:$0xff] %vm394_vm0, %v5347_v0  ;;  %408 = vst.msk [vmem:[#allocation2 + $0x268] sm:$0xff] %vm394_vm0, %v5347_v0  ;;  %v542_v10 = vsel %vm501_vm1, %v503_v5, 0.0  ;;  %v504_v11 = vsel %vm501_vm1, %v502_v4, %v503_v5  ;;  %v509_v16 = vrot.slane %v5658_v13, 2  ;;  %v5669_v18 = vld [vmem:[%s5582_s20 + $0x38] sm:$0xff]  ;;  %v511_v19 = vrot.slane %v5666_v17, 2 }
  0x82   : > { %410 = vst.msk [vmem:[#allocation2 + $0x278] sm:$0xff] %vm394_vm0, %v5347_v0  ;;  %412 = vst.msk [vmem:[#allocation3 + $0x8] sm:$0xff] %vm394_vm0, %v5347_v0  ;;  %v543_v14 = vsel %vm501_vm1, %v506_v8, 0.0  ;;  %v507_v15 = vsel %vm501_vm1, %v505_v7, %v506_v8  ;;  %v512_v20 = vrot.slane %v5669_v18, 2  ;;  %v5680_v21 = vld [vmem:[%s5582_s20 + $0x40] sm:$0xff]  ;;  %v5686_v25 = vld [vmem:[%s5582_s20 + $0x48] sm:$0xff] }
  0x83   : > { %414 = vst.msk [vmem:[#allocation3 + $0x18] sm:$0xff] %vm394_vm0, %v5347_v0  ;;  %417 = vst.msk [vmem:[#allocation3 + $0x228] sm:$0xff] %vm394_vm0, %v5347_v0  ;;  %552 = vrot.lane.b32.xlu0 %v5635_v2, %s5348_s11  ;;  %556 = vrot.lane.b32.xlu1 %v5647_v6, %s5348_s11  ;;  %v510_v22 = vsel %vm501_vm1, %v508_v12, %v509_v16  ;;  %v544_v23 = vsel %vm501_vm1, %v509_v16, 0.0  ;;  %v514_v24 = vrot.slane %v5680_v21, 2  ;;  %v515_v28 = vrot.slane %v5686_v25, 2  ;;  %v5694_v29 = vld [vmem:[%s5582_s20 + $0x50] sm:$0xff] }
  0x84   : > { %419 = vst.msk [vmem:[#allocation3 + $0x238] sm:$0xff] %vm394_vm0, %v5347_v0  ;;  %618 = vst.msk [vmem:[#allocation2 + $0x58] sm:$0xff] %vm394_vm0, %v542_v10  ;;  %v513_v26 = vsel %vm501_vm1, %v511_v19, %v512_v20  ;;  %v545_v27 = vsel %vm501_vm1, %v512_v20, 0.0  ;;  %v5697_v30 = vld [vmem:[%s5582_s20 + $0x58] sm:$0xff]  ;;  %v517_v32 = vrot.slane %v5694_v29, 2  ;;  %v5704_v34 = vld [vmem:[%s5582_s20 + $0x60] sm:$0xff] }
  0x85   : > { %616 = vst.msk [vmem:[#allocation2 + $0x48] sm:$0xff] %vm394_vm0, %v504_v11  ;;  %622 = vst.msk [vmem:[#allocation2 + $0x78] sm:$0xff] %vm394_vm0, %v543_v14  ;;  %v922_v31 = vld [vmem:[#allocation9 + $0x78] sm:$0xff]  ;;  %v518_v33 = vrot.slane %v5697_v30, 2  ;;  %v921_v35 = vld [vmem:[#allocation9 + $0x70] sm:$0xff]  ;;  %v516_v36 = vsel %vm501_vm1, %v514_v24, %v515_v28  ;;  %v546_v37 = vsel %vm501_vm1, %v515_v28, 0.0 }
  0x86   : > { %620 = vst.msk [vmem:[#allocation2 + $0x68] sm:$0xff] %vm394_vm0, %v507_v15  ;;  %624 = vst.msk [vmem:[#allocation2 + $0x88] sm:$0xff] %vm394_vm0, %v510_v22  ;;  %1230 = vmatpush1.msra.mxu1 %v922_v31  ;;  %v520_v38 = vrot.slane %v5704_v34, 2  ;;  %v5714_v39 = vld [vmem:[%s5582_s20 + $0x68] sm:$0xff]  ;;  %v5722_v43 = vld [vmem:[%s5582_s20 + $0x70] sm:$0xff]  ;;  %vm452_vm2 = vcmask 1041408  }
  0x87   : > { %626 = vst.msk [vmem:[#allocation2 + $0x98] sm:$0xff] %vm394_vm0, %v544_v23  ;;  %628 = vst.msk [vmem:[#allocation2 + $0xa8] sm:$0xff] %vm394_vm0, %v513_v26  ;;  %558 = vrot.lane.b32.xlu0 %v5652_v9, %s5348_s11  ;;  %560 = vrot.lane.b32.xlu1 %v5658_v13, %s5348_s11  ;;  %v519_v40 = vsel %vm501_vm1, %v517_v32, %v518_v33  ;;  %v547_v41 = vsel %vm501_vm1, %v518_v33, 0.0  ;;  %v521_v42 = vrot.slane %v5714_v39, 2  ;;  %v5725_v44 = vld [vmem:[%s5582_s20 + $0x78] sm:$0xff]  ;;  %v523_v45 = vrot.slane %v5722_v43, 2 }
  0x88   : > { %630 = vst.msk [vmem:[#allocation2 + $0xb8] sm:$0xff] %vm394_vm0, %v545_v27  ;;  %632 = vst.msk [vmem:[#allocation2 + $0xc8] sm:$0xff] %vm394_vm0, %v516_v36  ;;  %1231 = vmatprep.subr.mxu1 %v5347_v0  ;;  %v524_v46 = vrot.slane %v5725_v44, 2  ;;  %v5733_v47 = vld [vmem:[%s5582_s20 + $0x80] sm:$0xff]  ;;  %v920_v48 = vld [vmem:[#allocation9 + $0x68] sm:$0xff]  ;;  %v453_v61 = vrot.slane %v5632_v1, 6 }
  0x89   : > { %634 = vst.msk [vmem:[#allocation2 + $0xd8] sm:$0xff] %vm394_vm0, %v546_v37  ;;  %636 = vst.msk [vmem:[#allocation2 + $0xe8] sm:$0xff] %vm394_vm0, %v519_v40  ;;  %1232 = vmatpush1.msra.mxu1 %v921_v35  ;;  %v522_v49 = vsel %vm501_vm1, %v520_v38, %v521_v42  ;;  %v548_v50 = vsel %vm501_vm1, %v521_v42, 0.0  ;;  %v728_v51 = vrot.slane %v5733_v47, 2  ;;  %v5739_v52 = vld [vmem:[%s5582_s20 + $0x88] sm:$0xff]  ;;  %v5742_v53 = vld [vmem:[%s5582_s20 + $0x90] sm:$0xff] }
  0x8a   : > { %638 = vst.msk [vmem:[#allocation2 + $0xf8] sm:$0xff] %vm394_vm0, %v547_v41  ;;  %1233 = vmatprep.subr.mxu1 %v5347_v0  ;;  %v5745_v54 = vld [vmem:[#allocation9 + $0x138] sm:$0xff]  ;;  %640 = vst.msk [vmem:[#allocation2 + $0x108] sm:$0xff] %vm394_vm0, %v522_v49  ;;  %v525_v55 = vsel %vm501_vm1, %v523_v45, %v524_v46  ;;  %v549_v56 = vsel %vm501_vm1, %v524_v46, 0.0  ;;  %v729_v57 = vrot.slane %v5739_v52, 2  ;;  %v919_v59 = vld [vmem:[#allocation9 + $0x60] sm:$0xff] }
  0x8b   : > { %562 = vrot.lane.b32.xlu0 %v5666_v17, %s5348_s11  ;;  %564 = vrot.lane.b32.xlu1 %v5669_v18, %s5348_s11  ;;  %642 = vst.msk [vmem:[#allocation2 + $0x118] sm:$0xff] %vm394_vm0, %v548_v50  ;;  %v5757_v58 = vld [vmem:[%s5582_s20 + $0x98] sm:$0xff]  ;;  %v5759_v60 = vld [vmem:[#allocation9 + $0x130] sm:$0xff]  ;;  %v454_v62 = vrot.slane %v5635_v2, 6  ;;  %644 = vst.msk [vmem:[#allocation2 + $0x128] sm:$0xff] %vm394_vm0, %v525_v55  ;;  %v731_v63 = vrot.slane %v5742_v53, 2 }
  0x8c   : > { %646 = vst.msk [vmem:[#allocation2 + $0x138] sm:$0xff] %vm394_vm0, %v549_v56  ;;  %v732_v4 = vrot.slane %v5757_v58, 2  ;;  %v5768_v5 = vld [vmem:[%s5582_s20 + $0xa0] sm:$0xff]  ;;  %1234 = vmatpush1.msra.mxu1 %v920_v48  ;;  %1037 = vmatpush1.msra.mxu0 %v5745_v54  ;;  %v456_v7 = vrot.slane %v5638_v3, 6  ;;  %v730_v8 = vsel %vm501_vm1, %v728_v51, %v729_v57  ;;  %v768_v10 = vsel %vm501_vm1, %v729_v57, 0.0  ;;  %v5777_v12 = vld [vmem:[%s5582_s20 + $0xa8] sm:$0xff] }
  0x8d   : > { %v734_v11 = vrot.slane %v5768_v5, 2  ;;  %1235 = vmatprep.subr.mxu1 %v5347_v0  ;;  %v918_v14 = vld [vmem:[#allocation9 + $0x58] sm:$0xff]  ;;  %1038 = vmatprep.subr.mxu0 %v5347_v0  ;;  %v457_v15 = vrot.slane %v5647_v6, 6  ;;  %842 = vst.msk [vmem:[#allocation2 + $0x148] sm:$0xff] %vm394_vm0, %v730_v8  ;;  %844 = vst.msk [vmem:[#allocation2 + $0x158] sm:$0xff] %vm394_vm0, %v768_v10  ;;  %v735_v20 = vrot.slane %v5777_v12, 2  ;;  %v5857_v8 = vsel %vm452_vm2, %v453_v61, %v454_v62 }
  0x8e   : > { %v733_v16 = vsel %vm501_vm1, %v731_v63, %v732_v4  ;;  %v769_v19 = vsel %vm501_vm1, %v732_v4, 0.0  ;;  %1236 = vmatpush1.msra.mxu1 %v919_v59  ;;  %v5787_v22 = vld [vmem:[%s5582_s20 + $0xb0] sm:$0xff]  ;;  %v5790_v23 = vld [vmem:[%s5582_s20 + $0xb8] sm:$0xff]  ;;  %1039 = vmatpush1.msra.mxu0 %v5759_v60  ;;  %v5793_v24 = vld [vmem:[#allocation9 + $0x128] sm:$0xff]  ;;  %v8387_v26 = vrot.slane %v5652_v9, 6  ;;  %v460_v27 = vrot.slane %v5658_v13, 6 }
  0x8f   : > { %566 = vrot.lane.b32.xlu0 %v5680_v21, %s5348_s11  ;;  %568 = vrot.lane.b32.xlu1 %v5686_v25, %s5348_s11  ;;  %846 = vst.msk [vmem:[#allocation2 + $0x168] sm:$0xff] %vm394_vm0, %v733_v16  ;;  %848 = vst.msk [vmem:[#allocation2 + $0x178] sm:$0xff] %vm394_vm0, %v769_v19  ;;  %v737_v28 = vrot.slane %v5787_v22, 2  ;;  %v738_v31 = vrot.slane %v5790_v23, 2  ;;  %v5806_v32 = vld [vmem:[%s5582_s20 + $0xc0] sm:$0xff]  ;;  %v8386_v33 = vrot.slane %v5666_v17, 6  ;;  %v736_v13 = vsel %vm501_vm1, %v734_v11, %v735_v20 }
  0x90   : > { %1237 = vmatprep.subr.mxu1 %v5347_v0  ;;  %v770_v35 = vsel %vm501_vm1, %v735_v20, 0.0  ;;  %v917_v36 = vld [vmem:[#allocation9 + $0x50] sm:$0xff]  ;;  %1040 = vmatprep.subr.mxu0 %v5347_v0  ;;  %v740_v37 = vrot.slane %v5806_v32, 2  ;;  %v5815_v38 = vld [vmem:[%s5582_s20 + $0xc8] sm:$0xff]  ;;  %v463_v40 = vrot.slane %v5669_v18, 6  ;;  %850 = vst.msk [vmem:[#allocation2 + $0x188] sm:$0xff] %vm394_vm0, %v736_v13  ;;  %v5880_v19 = vsel %vm452_vm2, %v456_v7, %v457_v15 }
  0x91   : > { %852 = vst.msk [vmem:[#allocation2 + $0x198] sm:$0xff] %vm394_vm0, %v770_v35  ;;  %1238 = vmatpush1.msra.mxu1 %v918_v14  ;;  %v739_v41 = vsel %vm501_vm1, %v737_v28, %v738_v31  ;;  %v771_v42 = vsel %vm501_vm1, %v738_v31, 0.0  ;;  %1041 = vmatpush1.msra.mxu0 %v5793_v24  ;;  %v5823_v45 = vld [vmem:[#allocation9 + $0x120] sm:$0xff]  ;;  %v741_v46 = vrot.slane %v5815_v38, 2  ;;  %v5827_v48 = vld [vmem:[%s5582_s20 + $0xd0] sm:$0xff]  ;;  %v5830_v49 = vld [vmem:[%s5582_s20 + $0xd8] sm:$0xff]  ;;  %v5885_v20 = vsel %vm452_vm2, %v8387_v26, %v460_v27 }
  0x92   : > { %v8385_v18 = vrot.slane %v5680_v21, 6  ;;  %v466_v50 = vrot.slane %v5686_v25, 6  ;;  %1239 = vmatprep.subr.mxu1 %v5347_v0  ;;  %854 = vst.msk [vmem:[#allocation2 + $0x1a8] sm:$0xff] %vm394_vm0, %v739_v41  ;;  %856 = vst.msk [vmem:[#allocation2 + $0x1b8] sm:$0xff] %vm394_vm0, %v771_v42  ;;  %1042 = vmatprep.subr.mxu0 %v5347_v0  ;;  %v743_v51 = vrot.slane %v5827_v48, 2  ;;  %v744_v55 = vrot.slane %v5830_v49, 2 }
  0x93   : > { %570 = vrot.lane.b32.xlu0 %v5694_v29, %s5348_s11  ;;  %v469_v56 = vrot.slane %v5697_v30, 6  ;;  %572 = vrot.lane.b32.xlu1 %v5697_v30, %s5348_s11  ;;  %v916_v25 = vld [vmem:[#allocation9 + $0x48] sm:$0xff]  ;;  %v5845_v57 = vld [vmem:[#allocation9 + $0x118] sm:$0xff]  ;;  %v742_v59 = vsel %vm501_vm1, %v740_v37, %v741_v46  ;;  %v772_v63 = vsel %vm501_vm1, %v741_v46, 0.0  ;;  %v5850_v4 = vld [vmem:[%s5582_s20 + $0xe0] sm:$0xff]  ;;  %v8383_v10 = vrot.slane %v5694_v29, 6 }
  0x94   : > { %1240 = vmatpush1.msra.mxu1 %v917_v36  ;;  %1043 = vmatpush1.msra.mxu0 %v5823_v45  ;;  %858 = vst.msk [vmem:[#allocation2 + $0x1c8] sm:$0xff] %vm394_vm0, %v742_v59  ;;  %860 = vst.msk [vmem:[#allocation2 + $0x1d8] sm:$0xff] %vm394_vm0, %v772_v63  ;;  %v745_v30 = vsel %vm501_vm1, %v743_v51, %v744_v55  ;;  %v773_v11 = vsel %vm501_vm1, %v744_v55, 0.0  ;;  %v746_v2 = vrot.slane %v5850_v4, 2  ;;  %v472_v14 = vrot.slane %v5714_v39, 6  ;;  %v5873_v16 = vld [vmem:[%s5582_s20 + $0xe8] sm:$0xff] }
  0x95   : > { %v475_v62 = vrot.slane %v5725_v44, 6  ;;  %1241 = vmatprep.subr.mxu1 %v5347_v0  ;;  %1044 = vmatprep.subr.mxu0 %v5347_v0  ;;  %862 = vst.msk [vmem:[#allocation2 + $0x1e8] sm:$0xff] %vm394_vm0, %v745_v30  ;;  %864 = vst.msk [vmem:[#allocation2 + $0x1f8] sm:$0xff] %vm394_vm0, %v773_v11  ;;  %v915_v28 = vld [vmem:[#allocation9 + $0x40] sm:$0xff]  ;;  %v5888_v31 = vld [vmem:[#allocation9 + $0x110] sm:$0xff]  ;;  %v747_v13 = vrot.slane %v5873_v16, 2  ;;  %v5894_v6 = vsel %vm452_vm2, %v8386_v33, %v463_v40 }
  0x96   : > { %1242 = vmatpush1.msra.mxu1 %v916_v25  ;;  %1045 = vmatpush1.msra.mxu0 %v5845_v57  ;;  %v8382_v15 = vrot.slane %v5704_v34, 6  ;;  %v8381_v27 = vrot.slane %v5722_v43, 6  ;;  %v5903_v35 = vld [vmem:[%s5582_s20 + $0xf0] sm:$0xff]  ;;  %v5908_v36 = vsel %vm452_vm2, %v8385_v18, %v466_v50  ;;  %v5913_v37 = vsel %vm452_vm2, %v8383_v10, %v469_v56  ;;  %v914_v46 = vld [vmem:[#allocation9 + $0x38] sm:$0xff]  ;;  %v5922_v50 = vld [vmem:[#allocation9 + $0x108] sm:$0xff]  ;;  %s8125_s2 = scalar_lea.vmem [#allocation12], %s5578_s18 }
  0x97   : > { %574 = vrot.lane.b32.xlu0 %v5704_v34, %s5348_s11  ;;  %576 = vrot.lane.b32.xlu1 %v5714_v39, %s5348_s11  ;;  %v681_v40 = vrot.slane %v5739_v52, 6  ;;  %v748_v39 = vsel %vm501_vm1, %v746_v2, %v747_v13  ;;  %v774_v41 = vsel %vm501_vm1, %v747_v13, 0.0  ;;  %v749_v42 = vrot.slane %v5903_v35, 2  ;;  %v5927_v51 = vld [vmem:[%s5582_s20 + $0xf8] sm:$0xff]  ;;  %v913_v63 = vld [vmem:[#allocation9 + $0x30] sm:$0xff]  ;;  %v5947_v30 = vld [vmem:[#allocation9 + $0x100] sm:$0xff] }
  0x98   : > { %1243 = vmatprep.subr.mxu1 %v5347_v0  ;;  %1046 = vmatprep.subr.mxu0 %v5347_v0  ;;  %866 = vst.msk [vmem:[#allocation2 + $0x208] sm:$0xff] %vm394_vm0, %v748_v39  ;;  %868 = vst.msk [vmem:[#allocation2 + $0x218] sm:$0xff] %vm394_vm0, %v774_v41  ;;  %v5932_v55 = vsel %vm452_vm2, %v8382_v15, %v472_v14  ;;  %v5937_v56 = vsel %vm452_vm2, %v8381_v27, %v475_v62  ;;  %v8379_v25 = vrot.slane %v5733_v47, 6  ;;  %v5962_v62 = vld [vmem:[#allocation9 + $0xf8] sm:$0xff]  ;;  %v911_v13 = vld [vmem:[#allocation9 + $0x20] sm:$0xff]  ;;  %vm1798_vm3 = vcmask 1046528  }
  0x99   : > { %1244 = vmatpush1.msra.mxu1 %v915_v28  ;;  %1047 = vmatpush1.msra.mxu0 %v5888_v31  ;;  %v750_v59 = vrot.slane %v5927_v51, 2  ;;  %v684_v28 = vrot.slane %v5757_v58, 6  ;;  %v8378_v39 = vrot.slane %v5742_v53, 6  ;;  %v5981_v41 = vld [vmem:[#allocation9 + $0xe8] sm:$0xff]  ;;  %v6084_v10 = vld [vmem:[#allocation9 + $0x158] sm:$0xff]  ;;  %v696_v18 = vrot.slane %v5830_v49, 6 }
  0x9a   : > { %1245 = vmatprep.subr.mxu1 %v5347_v0  ;;  %1048 = vmatprep.subr.mxu0 %v5347_v0  ;;  %v5955_v14 = vsel %vm452_vm2, %v8379_v25, %v681_v40  ;;  %v5972_v40 = vld [vmem:[#allocation9 + $0xf0] sm:$0xff]  ;;  %v6050_v25 = vld [vmem:[#allocation9 + $0x178] sm:$0xff]  ;;  %v6069_v27 = vld [vmem:[#allocation9 + $0x168] sm:$0xff]  ;;  %v8390_v33 = vrot.slane %v5827_v48, 6  ;;  %vm1749_vm4 = vcmask 1040384   ;;  %s5070_s18 = sshll.u32 %s5418_s9, 12 }
  0x9b   : > { %578 = vrot.lane.b32.xlu0 %v5722_v43, %s5348_s11  ;;  %580 = vrot.lane.b32.xlu1 %v5725_v44, %s5348_s11  ;;  %v751_v11 = vsel %vm501_vm1, %v749_v42, %v750_v59  ;;  %v775_v2 = vsel %vm501_vm1, %v750_v59, 0.0  ;;  %v912_v44 = vld [vmem:[#allocation9 + $0x28] sm:$0xff]  ;;  %v5987_v42 = vsel %vm452_vm2, %v8378_v39, %v684_v28  ;;  %v687_v59 = vrot.slane %v5777_v12, 6  ;;  %v927_v39 = vld [vmem:[#allocation9 + $0xa0] sm:$0xff]  ;;  %v882_v26 = vld [vmem:[#allocation2 + $0x38] sm:$0xff]  ;;  %s4687_s13 = sshll.u32 %s8125_s2, 4  ;;  %s8313_s17 = scalar_lea.hbm %s8368_s8, %s5070_s18  ;;  %s8315_s13 = int_to_ptr.vmem [resolvable:$true] %s4687_s13 }
  0x9c   : > { %1246 = vmatpush1.msra.mxu1 %v914_v46  ;;  %1049 = vmatpush1.msra.mxu0 %v5922_v50  ;;  %870 = vst.msk [vmem:[#allocation2 + $0x228] sm:$0xff] %vm394_vm0, %v751_v11  ;;  %872 = vst.msk [vmem:[#allocation2 + $0x238] sm:$0xff] %vm394_vm0, %v775_v2  ;;  %v909_v46 = vld [vmem:[#allocation9 + $0x10] sm:$0xff]  ;;  %v6002_v11 = vld [vmem:[#allocation9 + $0xd8] sm:$0xff]  ;;  %v8377_v2 = vrot.slane %v5768_v5, 6  ;;  %s4674_s26 = scalar_lea.sflag [#allocation6], %s5575_s0 }
  0x9d   : > { %1247 = vmatprep.subr.mxu1 %v5347_v0  ;;  %1050 = vmatprep.subr.mxu0 %v5347_v0  ;;  %v6184_v3 = vld [vmem:[#allocation9 + $0x1f0] sm:$0xff]  ;;  %s5263_s9 = scalar_lea.vmem %s8315_s13, 4096  ;;  %p8517_p10 = scmp.ne.s32.totalorder %s8438_s16, 0 }
  0x9e   : > { %1248 = vmatpush1.msra.mxu1 %v913_v63  ;;  %1051 = vmatpush1.msra.mxu0 %v5947_v30  ;;  %v908_v63 = vld [vmem:[#allocation9 + $0x8] sm:$0xff]  ;;  %v6017_v28 = vsel %vm452_vm2, %v8377_v2, %v687_v59  ;;  %v929_v59 = vld [vmem:[#allocation9 + $0xb0] sm:$0xff]  ;;  %p5264_p0 = scmp.ne.s32.totalorder %s8315_s13, %s5263_s9  ;;  %s5349_s14 = smov [#allocation12]  }
  0x9f   : > { %776 = vrot.lane.b32.xlu0 %v5733_v47, %s5348_s11  ;;  %778 = vrot.lane.b32.xlu1 %v5739_v52, %s5348_s11  ;;  %v910_v52 = vld [vmem:[#allocation9 + $0x18] sm:$0xff]  ;;  %v876_v2 = vld [vmem:[#allocation2 + $0x8] sm:$0xff]  ;;  %s5267_s29 = sshll.u32 %s5349_s14, 4  ;;  %s5268_s29 = int_to_ptr.vmem [resolvable:$false] %s5267_s29 }
  0xa0   : > { %1249 = vmatprep.subr.mxu1 %v5347_v0  ;;  %1052 = vmatprep.subr.mxu0 %v5347_v0  ;;  %p5265_p3 = pnand %p5264_p0, %p8517_p10  ;;  %s5269_s22 = scalar_lea.vmem %s5268_s29, 8192 }
  0xa1   : > { %1250 = vmatpush1.msra.mxu1 %v912_v44  ;;  %1053 = vmatpush1.msra.mxu0 %v5962_v62  ;;  %v6011_v44 = vld [vmem:[#allocation9 + $0xd0] sm:$0xff]  ;;  %p5270_p9 = scmp.lt.s32.totalorder %s8315_s13, %s5268_s29  ;;  %p5271_p13 = scmp.lt.s32.totalorder %s5269_s22, %s5263_s9 }
  0xa2   : > { %1251 = vmatprep.subr.mxu1 %v5347_v0  ;;  %1054 = vmatprep.subr.mxu0 %v5347_v0  ;;  %p5266_p11 = pneg %p5265_p3 }
  0xa3   : > { %780 = vrot.lane.b32.xlu0 %v5742_v53, %s5348_s11  ;;  %782 = vrot.lane.b32.xlu1 %v5757_v58, %s5348_s11  ;;  %v5992_v58 = vld [vmem:[#allocation9 + $0xe0] sm:$0xff]  ;;  %p5272_p1 = por %p5271_p13, %p5270_p9 }
  0xa4   : > { %1252 = vmatpush1.msra.mxu1 %v911_v13  ;;  %1055 = vmatpush1.msra.mxu0 %v5972_v40  ;;  %v930_v13 = vld [vmem:[#allocation9 + $0xb8] sm:$0xff] }
  0xa5   : > { %1253 = vmatprep.subr.mxu1 %v5347_v0  ;;  %1056 = vmatprep.subr.mxu0 %v5347_v0  ;;  %p5273_p4 = pnand %p5272_p1, %p5266_p11 }
  0xa6   : > { %1254 = vmatpush1.msra.mxu1 %v910_v52  ;;  %1057 = vmatpush1.msra.mxu0 %v5981_v41  ;;  %v6022_v52 = vld [vmem:[#allocation9 + $0xc8] sm:$0xff] }
  0xa7   : > { %784 = vrot.lane.b32.xlu0 %v5768_v5, %s5348_s11  ;;  %786 = vrot.lane.b32.xlu1 %v5777_v12, %s5348_s11  ;;  %v907_v12 = vld [vmem:[#allocation9] sm:$0xff] }
  0xa8   : > { %1255 = vmatprep.subr.mxu1 %v5347_v0  ;;  %1058 = vmatprep.subr.mxu0 %v5347_v0 }
  0xa9   : > { %1256 = vmatpush1.msra.mxu1 %v909_v46  ;;  %1059 = vmatpush1.msra.mxu0 %v5992_v58  ;;  %v690_v46 = vrot.slane %v5790_v23, 6 }
  0xaa   : > { %1257 = vmatprep.subr.mxu1 %v5347_v0  ;;  %1060 = vmatprep.subr.mxu0 %v5347_v0 }
  0xab   : > { %788 = vrot.lane.b32.xlu0 %v5787_v22, %s5348_s11  ;;  %790 = vrot.lane.b32.xlu1 %v5790_v23, %s5348_s11  ;;  %v928_v23 = vld [vmem:[#allocation9 + $0xa8] sm:$0xff] }
  0xac   : > { %1258 = vmatpush1.msra.mxu1 %v908_v63  ;;  %1061 = vmatpush1.msra.mxu0 %v6002_v11  ;;  %v6032_v63 = vld [vmem:[#allocation9 + $0xc0] sm:$0xff] }
  0xad   : > { %1259 = vmatprep.subr.mxu1 %v5347_v0  ;;  %1062 = vmatprep.subr.mxu0 %v5347_v0 }
  0xae   : > { %1260 = vmatpush1.msra.mxu1 %v907_v12  ;;  %1063 = vmatpush1.msra.mxu0 %v6011_v44  ;;  %v8380_v12 = vrot.slane %v5787_v22, 6 }
  0xaf   : > { %792 = vrot.lane.b32.xlu0 %v5806_v32, %s5348_s11  ;;  %794 = vrot.lane.b32.xlu1 %v5815_v38, %s5348_s11 }
  0xb0   : > { %1277 = vmatprep.subr.mxu1 %v5347_v0  ;;  %1064 = vmatprep.subr.mxu0 %v5347_v0 }
  0xb1   : > { %1278 = vmatpush2.msra.mxu1 %v930_v13  ;;  %1065 = vmatpush1.msra.mxu0 %v6022_v52  ;;  %v6045_v13 = vsel %vm452_vm2, %v8380_v12, %v690_v46  ;;  %v925_v46 = vld [vmem:[#allocation9 + $0x90] sm:$0xff]  ;;  %v8384_v12 = vrot.slane %v5806_v32, 6 }
  0xb2   : > { %1279 = vmatprep.subr.mxu1 %v5347_v0  ;;  %1066 = vmatprep.subr.mxu0 %v5347_v0 }
  0xb3   : > { %796 = vrot.lane.b32.xlu0 %v5827_v48, %s5348_s11  ;;  %798 = vrot.lane.b32.xlu1 %v5830_v49, %s5348_s11  ;;  %v6115_v49 = vsel %vm452_vm2, %v8390_v33, %v696_v18 }
  0xb4   : > { %1280 = vmatpush2.msra.mxu1 %v929_v59  ;;  %1067 = vmatpush1.msra.mxu0 %v6032_v63  ;;  %v926_v59 = vld [vmem:[#allocation9 + $0x98] sm:$0xff] }
  0xb5   : > { %1281 = vmatprep.subr.mxu1 %v5347_v0  ;;  %1084 = vmatprep.subr.mxu0 %v5347_v0 }
  0xb6   : > { %1282 = vmatpush2.msra.mxu1 %v928_v23  ;;  %4851 = vmatprep.mubr.msk.f32.mxu1 %vm394_vm0, %v876_v2  ;;  %v693_v23 = vrot.slane %v5815_v38, 6  ;;  %v6061_v2 = vld [vmem:[#allocation9 + $0x170] sm:$0xff]  ;;  %v923_v38 = vld [vmem:[#allocation9 + $0x80] sm:$0xff] }
  0xb7   : > { %800 = vrot.lane.b32.xlu0 %v5850_v4, %s5348_s11  ;;  %1283 = vmatprep.subr.mxu1 %v5347_v0 }
  0xb8   : > { %1284 = vmatpush2.msra.mxu1 %v927_v39  ;;  %802 = vrot.lane.b32.xlu1 %v5873_v16, %s5348_s11  ;;  %v924_v39 = vld [vmem:[#allocation9 + $0x88] sm:$0xff]  ;;  %v6079_v15 = vsel %vm452_vm2, %v8384_v12, %v693_v23  ;;  %v6090_v23 = vld [vmem:[#allocation9 + $0x150] sm:$0xff] }
  0xb9   : > { %1285 = vmatprep.subr.mxu1 %v5347_v0  ;;  %1085 = vmatpush2.msra.mxu0 %v6050_v25  ;;  %v880_v12 = vld [vmem:[#allocation2 + $0x28] sm:$0xff] }
  0xba   : > { %1286 = vmatpush2.msra.mxu1 %v926_v59  ;;  %1086 = vmatprep.subr.mxu0 %v5347_v0  ;;  %v6074_v59 = vld [vmem:[#allocation9 + $0x160] sm:$0xff] }
  0xbb   : > { %1287 = vmatprep.subr.mxu1 %v5347_v0  ;;  %804 = vrot.lane.b32.xlu0 %v5903_v35, %s5348_s11 }
  0xbc   : > { %1288 = vmatpush2.msra.mxu1 %v925_v46  ;;  %806 = vrot.lane.b32.xlu1 %v5927_v51, %s5348_s11  ;;  %v878_v46 = vld [vmem:[#allocation2 + $0x18] sm:$0xff] }
  0xbd   : > { %1289 = vmatprep.subr.mxu1 %v5347_v0  ;;  %1087 = vmatpush2.msra.mxu0 %v6061_v2 }
  0xbe   : > { %1290 = vmatpush2.msra.mxu1 %v924_v39  ;;  %1088 = vmatprep.subr.mxu0 %v5347_v0  ;;  %v932_v39 = vld [vmem:[#allocation2 + $0x48] sm:$0xff] }
  0xbf   : > { %1291 = vmatprep.subr.mxu1 %v5347_v0  ;;  %1089 = vmatpush2.msra.mxu0 %v6069_v27 }
  0xc0   : > { %1292 = vmatpush2.msra.mxu1 %v923_v38  ;;  %1090 = vmatprep.subr.mxu0 %v5347_v0  ;;  %v6095_v38 = vld [vmem:[#allocation9 + $0x148] sm:$0xff] }
  0xc1   : > { %1294 = vmatmul.mubr.f32.vlgmr.msra.gmra.mxu1 %v5347_v0  ;;  %1091 = vmatpush2.msra.mxu0 %v6074_v59 }
  0xc2   : > { %4852 = vmatprep.mubr.msk.f32.mxu1 %vm394_vm0, %v878_v46  ;;  %1092 = vmatprep.subr.mxu0 %v5347_v0  ;;  %v6103_v46 = vld [vmem:[#allocation9 + $0x140] sm:$0xff] }
  0xc3   : > { %1093 = vmatpush2.msra.mxu0 %v6084_v10  ;;  %4835 = vmatprep.mubr.msk.f32.mxu0 %vm394_vm0, %v932_v39 }
  0xc4   : > { %1094 = vmatprep.subr.mxu0 %v5347_v0  ;;  %2105 = vmatprep.subr.mxu1 %v5347_v0 }
  0xc5   : > { %1299 = vmatmul.mubr.f32.gmra.mxu1 %v5347_v0  ;;  %1095 = vmatpush2.msra.mxu0 %v6090_v23 }
  0xc6   : > { %4853 = vmatprep.mubr.msk.f32.mxu1 %vm394_vm0, %v880_v12  ;;  %1096 = vmatprep.subr.mxu0 %v5347_v0  ;;  %v8450_v12 = vrot.slane %v5666_v17, 6  ;;  %v6231_v17 = vld [vmem:[#allocation9 + $0x1d0] sm:$0xff] }
  0xc7   : > { %1097 = vmatpush2.msra.mxu0 %v6095_v38  ;;  %2106 = vmatpush1.msra.mxu1 %v5745_v54  ;;  %v699_v54 = vrot.slane %v5873_v16, 6  ;;  %v494_v16 = vsel %vm452_vm2, 0.0, %v456_v7 }
  0xc8   : > { %1098 = vmatprep.subr.mxu0 %v5347_v0  ;;  %2107 = vmatprep.subr.mxu1 %v5347_v0 }
  0xc9   : > { %1304 = vmatmul.mubr.f32.gmra.mxu1 %v5347_v0  ;;  %1099 = vmatpush2.msra.mxu0 %v6103_v46 }
  0xca   : > { %4854 = vmatprep.mubr.msk.f32.mxu1 %vm394_vm0, %v882_v26  ;;  %1480 = vmatprep.subr.mxu0 %v5347_v0  ;;  %v8389_v26 = vrot.slane %v5850_v4, 6 }
  0xcb   : > { %2108 = vmatpush1.msra.mxu1 %v5759_v60 }
  0xcc   : > { %2109 = vmatprep.subr.mxu1 %v5347_v0  ;;  %v6135_v60 = vsel %vm452_vm2, %v8389_v26, %v699_v54 }
  0xcd   : > { %1309 = vmatmul.mubr.f32.gmra.mxu1 %v5347_v0 }
  0xce   : > { %4855 = vmatprep.mubr.msk.f32.mxu1 %vm394_vm0, %v932_v39  ;;  %2110 = vmatpush1.msra.mxu1 %v5793_v24  ;;  %v702_v24 = vrot.slane %v5927_v51, 6  ;;  %v6178_v51 = vld [vmem:[#allocation9 + $0x1f8] sm:$0xff] }
  0xcf   : > { %2111 = vmatprep.subr.mxu1 %v5347_v0 }
  0xd0   : > { %2112 = vmatpush1.msra.mxu1 %v5823_v45  ;;  %v8388_v45 = vrot.slane %v5903_v35, 6 }
  0xd1   : > { %2113 = vmatprep.subr.mxu1 %v5347_v0 }
  0xd2   : > { %2114 = vmatpush1.msra.mxu1 %v5845_v57  ;;  %v6153_v18 = vsel %vm452_vm2, %v8388_v45, %v702_v24  ;;  %v493_v57 = vsel %vm452_vm2, 0.0, %v453_v61  ;;  %v8451_v24 = vrot.slane %v5680_v21, 6  ;;  %v8464_v45 = vrot.slane %v5806_v32, 6  ;;  %v6452_v32 = vld [vmem:[#allocation2 + $0x158] sm:$0xff] }
  0xd3   : > { %2115 = vmatprep.subr.mxu1 %v5347_v0  ;;  %8465 = vst [vmem:[#allocation25_spill] sm:$0xff] %v6452_v32 }
  0xd4   : > { %2116 = vmatpush1.msra.mxu1 %v5888_v31  ;;  %v724_v26 = vsel %vm452_vm2, 0.0, %v8464_v45 }
  0xd5   : > { %2117 = vmatprep.subr.mxu1 %v5347_v0 }
  0xd6   : > { %2118 = vmatpush1.msra.mxu1 %v5922_v50 }
  0xd7   : > { %2119 = vmatprep.subr.mxu1 %v5347_v0 }
  0xd8   : > { %2120 = vmatpush1.msra.mxu1 %v5947_v30  ;;  %v936_v30 = vld [vmem:[#allocation2 + $0x68] sm:$0xff] }
  0xd9   : > { %2121 = vmatprep.subr.mxu1 %v5347_v0 }
  0xda   : > { %2122 = vmatpush1.msra.mxu1 %v5962_v62 }
  0xdb   : > { %2123 = vmatprep.subr.mxu1 %v5347_v0 }
  0xdc   : > { %2124 = vmatpush1.msra.mxu1 %v5972_v40  ;;  %v6195_v40 = vld [vmem:[#allocation9 + $0x1e8] sm:$0xff] }
  0xdd   : > { %2125 = vmatprep.subr.mxu1 %v5347_v0 }
  0xde   : > { %2126 = vmatpush1.msra.mxu1 %v5981_v41  ;;  %v8449_v41 = vrot.slane %v5652_v9, 6 }
  0xdf   : > { %2127 = vmatprep.subr.mxu1 %v5347_v0 }
  0xe0   : > { %2128 = vmatpush1.msra.mxu1 %v5992_v58  ;;  %v495_v58 = vsel %vm452_vm2, 0.0, %v8449_v41 }
  0xe1   : > { %2129 = vmatprep.subr.mxu1 %v5347_v0 }
  0xe2   : > { %2130 = vmatpush1.msra.mxu1 %v6002_v11 }
  0xe3   : > { %2131 = vmatprep.subr.mxu1 %v5347_v0 }
  0xe4   : > { %2132 = vmatpush1.msra.mxu1 %v6011_v44  ;;  %v938_v44 = vld [vmem:[#allocation2 + $0x78] sm:$0xff] }
  0xe5   : > { %2133 = vmatprep.subr.mxu1 %v5347_v0 }
  0xe6   : > { %2134 = vmatpush1.msra.mxu1 %v6022_v52 }
  0xe7   : > { %2135 = vmatprep.subr.mxu1 %v5347_v0 }
  0xe8   : > { %2136 = vmatpush1.msra.mxu1 %v6032_v63  ;;  %v6216_v63 = vld [vmem:[#allocation9 + $0x1d8] sm:$0xff] }
  0xe9   : > { %2153 = vmatprep.subr.mxu1 %v5347_v0 }
  0xea   : > { %2154 = vmatpush2.msra.mxu1 %v6050_v25  ;;  %v934_v25 = vld [vmem:[#allocation2 + $0x58] sm:$0xff] }
  0xeb   : > { %2155 = vmatprep.subr.mxu1 %v5347_v0 }
  0xec   : > { %2156 = vmatpush2.msra.mxu1 %v6061_v2  ;;  %v496_v2 = vsel %vm452_vm2, 0.0, %v8450_v12  ;;  %v6314_v12 = vld [vmem:[#allocation9 + $0x1a8] sm:$0xff] }
  0xed   : > { %2157 = vmatprep.subr.mxu1 %v5347_v0 }
  0xee   : > { %2158 = vmatpush2.msra.mxu1 %v6069_v27 }
  0xef   : > { %2159 = vmatprep.subr.mxu1 %v5347_v0 }
  0xf0   : > { %2160 = vmatpush2.msra.mxu1 %v6074_v59  ;;  %v6225_v59 = vld [vmem:[#allocation2 + $0x88] sm:$0xff] }
  0xf1   : > { %v551_v31 = vpop.permute.xlu0 %550  ;;  %v555_v50 = vpop.permute.xlu1 %554  ;;  %2161 = vmatprep.subr.mxu1 %v5347_v0 }
  0xf2   : > { %v598_v27 = vsel %vm394_vm0, %v493_v57, %v551_v31  ;;  %v600_v1 = vsel %vm394_vm0, %v494_v16, %v555_v50  ;;  %2162 = vmatpush2.msra.mxu1 %v6084_v10  ;;  %v497_v57 = vsel %vm452_vm2, 0.0, %v8451_v24  ;;  %v6249_v16 = vld [vmem:[#allocation2 + $0x98] sm:$0xff]  ;;  %v6328_v24 = vld [vmem:[#allocation9 + $0x1a0] sm:$0xff] }
  0xf3   : > { %1101 = vmatmul.mubr.f32.vlgmr.msra.gmra.mxu0 %v598_v27  ;;  %1314 = vmatmul.mubr.f32.gmra.mxu1 %v598_v27  ;;  %v6262_v27 = vld [vmem:[#allocation9 + $0x1c0] sm:$0xff] }
  0xf4   : > { %1481 = vmatpush1.msra.mxu0 %v6178_v51  ;;  %4836 = vmatprep.mubr.msk.f32.mxu0 %vm394_vm0, %v934_v25 }
  0xf5   : > { %v553_v61 = vpop.permute.xlu0 %552  ;;  %v557_v7 = vpop.permute.xlu1 %556  ;;  %1482 = vmatprep.subr.mxu0 %v5347_v0  ;;  %4856 = vmatprep.mubr.msk.f32.mxu1 %vm394_vm0, %v934_v25 }
  0xf6   : > { %v599_v62 = vsel %vm394_vm0, %v5857_v8, %v553_v61  ;;  %v601_v10 = vsel %vm394_vm0, %v5880_v19, %v557_v7  ;;  %1483 = vmatpush1.msra.mxu0 %v6184_v3  ;;  %2163 = vmatprep.subr.mxu1 %v5347_v0  ;;  %v6205_v19 = vld [vmem:[#allocation9 + $0x1e0] sm:$0xff] }
  0xf7   : > { %1106 = vmatmul.mubr.f32.gmra.mxu0 %v599_v62  ;;  %1319 = vmatmul.mubr.f32.gmra.mxu1 %v599_v62 }
  0xf8   : > { %1484 = vmatprep.subr.mxu0 %v5347_v0  ;;  %4837 = vmatprep.mubr.msk.f32.mxu0 %vm394_vm0, %v936_v30 }
  0xf9   : > { %v559_v8 = vpop.permute.xlu0 %558  ;;  %1485 = vmatpush1.msra.mxu0 %v6195_v40  ;;  %4857 = vmatprep.mubr.msk.f32.mxu1 %vm394_vm0, %v936_v30  ;;  %v561_v11 = vpop.permute.xlu1 %560 }
  0xfa   : > { %v6208_v52 = vsel %vm394_vm0, %v495_v58, %v559_v8  ;;  %1486 = vmatprep.subr.mxu0 %v5347_v0  ;;  %v6213_v9 = vsel %vm394_vm0, %v5885_v20, %v561_v11  ;;  %2164 = vmatpush2.msra.mxu1 %v6090_v23  ;;  %v6301_v58 = vld [vmem:[#allocation2 + $0xb8] sm:$0xff] }
  0xfb   : > { %1111 = vmatmul.mubr.f32.gmra.mxu0 %v600_v1  ;;  %1324 = vmatmul.mubr.f32.gmra.mxu1 %v600_v1  ;;  %v8452_v1 = vrot.slane %v5694_v29, 6  ;;  %v6278_v29 = vld [vmem:[#allocation9 + $0x1b8] sm:$0xff] }
  0xfc   : > { %1487 = vmatpush1.msra.mxu0 %v6205_v19  ;;  %4838 = vmatprep.mubr.msk.f32.mxu0 %vm394_vm0, %v938_v44 }
  0xfd   : > { %1488 = vmatprep.subr.mxu0 %v5347_v0  ;;  %4858 = vmatprep.mubr.msk.f32.mxu1 %vm394_vm0, %v938_v44  ;;  %v563_v20 = vpop.permute.xlu0 %562  ;;  %v565_v39 = vpop.permute.xlu1 %564  ;;  %v498_v61 = vsel %vm452_vm2, 0.0, %v8452_v1  ;;  %v6351_v1 = vld [vmem:[#allocation2 + $0xd8] sm:$0xff] }
  0xfe   : > { %1489 = vmatpush1.msra.mxu0 %v6216_v63  ;;  %v6229_v23 = vsel %vm394_vm0, %v496_v2, %v563_v20  ;;  %v6235_v54 = vsel %vm394_vm0, %v5894_v6, %v565_v39  ;;  %2165 = vmatprep.subr.mxu1 %v5347_v0  ;;  %v6247_v6 = vld [vmem:[#allocation9 + $0x1c8] sm:$0xff]  ;;  %v8454_v2 = vrot.slane %v5722_v43, 6 }
  0xff   : > { %1116 = vmatmul.mubr.f32.gmra.mxu0 %v601_v10  ;;  %1329 = vmatmul.mubr.f32.gmra.mxu1 %v601_v10  ;;  %v8453_v10 = vrot.slane %v5704_v34, 6 }
 0x100   : > { %1490 = vmatprep.subr.mxu0 %v5347_v0  ;;  %4839 = vmatprep.mubr.msk.f32.mxu0 %vm394_vm0, %v6225_v59  ;;  %v500_v20 = vsel %vm452_vm2, 0.0, %v8454_v2 }
 0x101   : > { %1491 = vmatpush1.msra.mxu0 %v6231_v17  ;;  %4859 = vmatprep.mubr.msk.f32.mxu1 %vm394_vm0, %v6225_v59  ;;  %v567_v31 = vpop.permute.xlu0 %566  ;;  %v569_v50 = vpop.permute.xlu1 %568  ;;  %v499_v41 = vsel %vm452_vm2, 0.0, %v8453_v10  ;;  %v6363_v10 = vld [vmem:[#allocation9 + $0x190] sm:$0xff] }
 0x102   : > { %1492 = vmatprep.subr.mxu0 %v5347_v0  ;;  %v6253_v21 = vsel %vm394_vm0, %v497_v57, %v567_v31  ;;  %v6257_v25 = vsel %vm394_vm0, %v5908_v36, %v569_v50  ;;  %2166 = vmatpush2.msra.mxu1 %v6095_v38  ;;  %v6270_v0 = vld [vmem:[#allocation2] sm:$0xff]  ;;  %v6275_v36 = vld [vmem:[#allocation2 + $0xa8] sm:$0xff]  ;;  %v8455_v31 = vrot.slane %v5733_v47, 6 }
 0x103   : > { %1121 = vmatmul.mubr.f32.gmra.mxu0 %v6208_v52  ;;  %1334 = vmatmul.mubr.f32.gmra.mxu1 %v6208_v52 }
 0x104   : > { %1493 = vmatpush1.msra.mxu0 %v6247_v6  ;;  %4840 = vmatprep.mubr.msk.f32.mxu0 %vm394_vm0, %v6249_v16  ;;  %v720_v50 = vsel %vm452_vm2, 0.0, %v8455_v31 }
 0x105   : > { %1494 = vmatprep.subr.mxu0 %v6270_v0  ;;  %4860 = vmatprep.mubr.msk.f32.mxu1 %vm394_vm0, %v6249_v16  ;;  %v571_v38 = vpop.permute.xlu0 %570  ;;  %v573_v7 = vpop.permute.xlu1 %572 }
 0x106   : > { %1495 = vmatpush1.msra.mxu0 %v6262_v27  ;;  %v6281_v30 = vsel %vm394_vm0, %v498_v61, %v571_v38  ;;  %v6285_v62 = vsel %vm394_vm0, %v5913_v37, %v573_v7  ;;  %2167 = vmatprep.subr.mxu1 %v6270_v0  ;;  %v6299_v37 = vld [vmem:[#allocation9 + $0x1b0] sm:$0xff] }
 0x107   : > { %1126 = vmatmul.mubr.f32.gmra.mxu0 %v6213_v9  ;;  %1339 = vmatmul.mubr.f32.gmra.mxu1 %v6213_v9 }
 0x108   : > { %1496 = vmatprep.subr.mxu0 %v6270_v0  ;;  %4841 = vmatprep.mubr.msk.f32.mxu0 %vm394_vm0, %v6275_v36 }
 0x109   : > { %1497 = vmatpush1.msra.mxu0 %v6278_v29  ;;  %4861 = vmatprep.mubr.msk.f32.mxu1 %vm394_vm0, %v6275_v36  ;;  %v575_v8 = vpop.permute.xlu0 %574  ;;  %v577_v11 = vpop.permute.xlu1 %576 }
 0x10a   : > { %1498 = vmatprep.subr.mxu0 %v6270_v0  ;;  %v6305_v34 = vsel %vm394_vm0, %v499_v41, %v575_v8  ;;  %v6309_v44 = vsel %vm394_vm0, %v5932_v55, %v577_v11  ;;  %2168 = vmatpush2.msra.mxu1 %v6103_v46  ;;  %v6325_v55 = vld [vmem:[#allocation2 + $0xc8] sm:$0xff]  ;;  %v8458_v41 = vrot.slane %v5742_v53, 6 }
 0x10b   : > { %1131 = vmatmul.mubr.f32.gmra.mxu0 %v6229_v23  ;;  %1344 = vmatmul.mubr.f32.gmra.mxu1 %v6229_v23 }
 0x10c   : > { %1499 = vmatpush1.msra.mxu0 %v6299_v37  ;;  %4842 = vmatprep.mubr.msk.f32.mxu0 %vm394_vm0, %v6301_v58  ;;  %v721_v8 = vsel %vm452_vm2, 0.0, %v8458_v41 }
 0x10d   : > { %1500 = vmatprep.subr.mxu0 %v6270_v0  ;;  %4862 = vmatprep.mubr.msk.f32.mxu1 %vm394_vm0, %v6301_v58  ;;  %v579_v46 = vpop.permute.xlu0 %578  ;;  %v581_v39 = vpop.permute.xlu1 %580 }
 0x10e   : > { %1501 = vmatpush1.msra.mxu0 %v6314_v12  ;;  %v6331_v43 = vsel %vm394_vm0, %v500_v20, %v579_v46  ;;  %v6335_v57 = vsel %vm394_vm0, %v5937_v56, %v581_v39  ;;  %2548 = vmatprep.subr.mxu1 %v6270_v0  ;;  %v6349_v56 = vld [vmem:[#allocation9 + $0x198] sm:$0xff]  ;;  %v6377_v20 = vld [vmem:[#allocation9 + $0x188] sm:$0xff]  ;;  %v8459_v39 = vrot.slane %v5768_v5, 6 }
 0x10f   : > { %1136 = vmatmul.mubr.f32.gmra.mxu0 %v6235_v54  ;;  %1349 = vmatmul.mubr.f32.gmra.mxu1 %v6235_v54 }
 0x110   : > { %1502 = vmatprep.subr.mxu0 %v6270_v0  ;;  %4843 = vmatprep.mubr.msk.f32.mxu0 %vm394_vm0, %v6325_v55  ;;  %v722_v31 = vsel %vm452_vm2, 0.0, %v8459_v39 }
 0x111   : > { %1503 = vmatpush1.msra.mxu0 %v6328_v24  ;;  %4863 = vmatprep.mubr.msk.f32.mxu1 %vm394_vm0, %v6325_v55  ;;  %v777_v61 = vpop.permute.xlu0 %776  ;;  %v779_v38 = vpop.permute.xlu1 %778 }
 0x112   : > { %1504 = vmatprep.subr.mxu0 %v6270_v0  ;;  %v6355_v47 = vsel %vm394_vm0, %v720_v50, %v777_v61  ;;  %v6359_v7 = vsel %vm394_vm0, %v5955_v14, %v779_v38  ;;  %v6374_v14 = vld [vmem:[#allocation2 + $0xe8] sm:$0xff]  ;;  %v6399_v50 = vld [vmem:[#allocation2 + $0xf8] sm:$0xff] }
 0x113   : > { %8456 = vst [vmem:[#allocation20_spill] sm:$0xff] %v6355_v47  ;;  %8457 = vst [vmem:[#allocation21_spill] sm:$0xff] %v6359_v7  ;;  %1141 = vmatmul.mubr.f32.gmra.mxu0 %v6253_v21  ;;  %1354 = vmatmul.mubr.f32.gmra.mxu1 %v6253_v21 }
 0x114   : > { %1505 = vmatpush1.msra.mxu0 %v6349_v56  ;;  %4844 = vmatprep.mubr.msk.f32.mxu0 %vm394_vm0, %v6351_v1 }
 0x115   : > { %1506 = vmatprep.subr.mxu0 %v6270_v0  ;;  %4864 = vmatprep.mubr.msk.f32.mxu1 %vm394_vm0, %v6351_v1  ;;  %v781_v11 = vpop.permute.xlu0 %780  ;;  %v783_v2 = vpop.permute.xlu1 %782 }
 0x116   : > { %1507 = vmatpush1.msra.mxu0 %v6363_v10  ;;  %v6380_v53 = vsel %vm394_vm0, %v721_v8, %v781_v11  ;;  %v6384_v46 = vsel %vm394_vm0, %v5987_v42, %v783_v2  ;;  %v6397_v42 = vld [vmem:[#allocation9 + $0x180] sm:$0xff]  ;;  %v6411_v8 = vld [vmem:[#allocation9 + $0x238] sm:$0xff]  ;;  %v8461_v11 = vrot.slane %v5787_v22, 6  ;;  %v6427_v22 = vld [vmem:[#allocation2 + $0x148] sm:$0xff] }
 0x117   : > { %1146 = vmatmul.mubr.f32.gmra.mxu0 %v6257_v25  ;;  %1359 = vmatmul.mubr.f32.gmra.mxu1 %v6257_v25  ;;  %8460 = vst [vmem:[#allocation22_spill] sm:$0xff] %v6411_v8  ;;  %8463 = vst [vmem:[#allocation24_spill] sm:$0xff] %v6427_v22 }
 0x118   : > { %1508 = vmatprep.subr.mxu0 %v6270_v0  ;;  %4845 = vmatprep.mubr.msk.f32.mxu0 %vm394_vm0, %v6374_v14  ;;  %v723_v2 = vsel %vm452_vm2, 0.0, %v8461_v11 }
 0x119   : > { %1509 = vmatpush1.msra.mxu0 %v6377_v20  ;;  %4865 = vmatprep.mubr.msk.f32.mxu1 %vm394_vm0, %v6374_v14  ;;  %v785_v61 = vpop.permute.xlu0 %784  ;;  %v787_v38 = vpop.permute.xlu1 %786 }
 0x11a   : > { %1510 = vmatprep.subr.mxu0 %v6270_v0  ;;  %v6403_v5 = vsel %vm394_vm0, %v722_v31, %v785_v61  ;;  %v6407_v41 = vsel %vm394_vm0, %v6017_v28, %v787_v38  ;;  %v6422_v28 = vld [vmem:[#allocation2 + $0x108] sm:$0xff]  ;;  %v6425_v61 = vld [vmem:[#allocation9 + $0x230] sm:$0xff] }
 0x11b   : > { %1151 = vmatmul.mubr.f32.gmra.mxu0 %v6281_v30  ;;  %1364 = vmatmul.mubr.f32.gmra.mxu1 %v6281_v30  ;;  %8462 = vst [vmem:[#allocation23_spill] sm:$0xff] %v6425_v61 }
 0x11c   : > { %1511 = vmatpush1.msra.mxu0 %v6397_v42  ;;  %4846 = vmatprep.mubr.msk.f32.mxu0 %vm394_vm0, %v6399_v50 }
 0x11d   : > { %1528 = vmatprep.subr.mxu0 %v6270_v0  ;;  %4866 = vmatprep.mubr.msk.f32.mxu1 %vm394_vm0, %v6399_v50  ;;  %v789_v39 = vpop.permute.xlu0 %788  ;;  %v791_v31 = vpop.permute.xlu1 %790 }
 0x11e   : > { %1529 = vmatpush2.msra.mxu0 %v6411_v8  ;;  %v6430_v38 = vsel %vm394_vm0, %v723_v2, %v789_v39  ;;  %v6434_v11 = vsel %vm394_vm0, %v6045_v13, %v791_v31  ;;  %v6447_v13 = vld [vmem:[#allocation9 + $0x228] sm:$0xff]  ;;  %v6449_v2 = vld [vmem:[#allocation2 + $0x118] sm:$0xff] }
 0x11f   : > { %1156 = vmatmul.mubr.f32.gmra.mxu0 %v6285_v62  ;;  %1369 = vmatmul.mubr.f32.gmra.mxu1 %v6285_v62 }
 0x120   : > { %1530 = vmatprep.subr.mxu0 %v6270_v0  ;;  %4847 = vmatprep.mubr.msk.f32.mxu0 %vm394_vm0, %v6422_v28 }
 0x121   : > { %1531 = vmatpush2.msra.mxu0 %v6425_v61  ;;  %4885 = vmatprep.mubr.msk.f32.mxu1 %vm394_vm0, %v6427_v22  ;;  %v793_v39 = vpop.permute.xlu0 %792  ;;  %v795_v31 = vpop.permute.xlu1 %794  ;;  %v6463_v22 = vld [vmem:[#allocation9 + $0x220] sm:$0xff]  ;;  %v8467_v61 = vrot.slane %v5827_v48, 6  ;;  %v6479_v48 = vld [vmem:[#allocation2 + $0x168] sm:$0xff] }
 0x122   : > { %1532 = vmatprep.subr.mxu0 %v6270_v0  ;;  %v6455_v45 = vsel %vm394_vm0, %v724_v26, %v793_v39  ;;  %v6459_v33 = vsel %vm394_vm0, %v6079_v15, %v795_v31  ;;  %8466 = vst [vmem:[#allocation26_spill] sm:$0xff] %v6463_v22  ;;  %v6474_v15 = vld [vmem:[#allocation2 + $0x128] sm:$0xff]  ;;  %v6477_v31 = vld [vmem:[#allocation9 + $0x218] sm:$0xff]  ;;  %8469 = vst [vmem:[#allocation28_spill] sm:$0xff] %v6479_v48 }
 0x123   : > { %1161 = vmatmul.mubr.f32.gmra.mxu0 %v6305_v34  ;;  %2170 = vmatmul.mubr.f32.vlgmr.msra.gmra.mxu1 %v6355_v47  ;;  %v725_v8 = vsel %vm452_vm2, 0.0, %v8467_v61  ;;  %8468 = vst [vmem:[#allocation27_spill] sm:$0xff] %v6477_v31 }
 0x124   : > { %1533 = vmatpush2.msra.mxu0 %v6447_v13  ;;  %4848 = vmatprep.mubr.msk.f32.mxu0 %vm394_vm0, %v6449_v2 }
 0x125   : > { %1534 = vmatprep.subr.mxu0 %v6270_v0  ;;  %4886 = vmatprep.mubr.msk.f32.mxu1 %vm394_vm0, %v6452_v32  ;;  %v797_v26 = vpop.permute.xlu0 %796  ;;  %v799_v39 = vpop.permute.xlu1 %798  ;;  %v8470_v32 = vrot.slane %v5850_v4, 6  ;;  %v6505_v4 = vld [vmem:[#allocation2 + $0x178] sm:$0xff] }
 0x126   : > { %1535 = vmatpush2.msra.mxu0 %v6463_v22  ;;  %2549 = vmatpush1.msra.mxu1 %v6178_v51  ;;  %v6483_v61 = vsel %vm394_vm0, %v725_v8, %v797_v26  ;;  %v6487_v47 = vsel %vm394_vm0, %v6115_v49, %v799_v39  ;;  %v6500_v49 = vld [vmem:[#allocation9 + $0x210] sm:$0xff]  ;;  %v6502_v51 = vld [vmem:[#allocation2 + $0x138] sm:$0xff]  ;;  %v6513_v39 = vld [vmem:[#allocation9 + $0x208] sm:$0xff] }
 0x127   : > { %1166 = vmatmul.mubr.f32.gmra.mxu0 %v6309_v44  ;;  %2175 = vmatmul.mubr.f32.gmra.mxu1 %v6359_v7  ;;  %v726_v22 = vsel %vm452_vm2, 0.0, %v8470_v32  ;;  %v8471_v7 = vrot.slane %v5903_v35, 6 }
 0x128   : > { %1536 = vmatprep.subr.mxu0 %v6270_v0  ;;  %4849 = vmatprep.mubr.msk.f32.mxu0 %vm394_vm0, %v6474_v15 }
 0x129   : > { %1537 = vmatpush2.msra.mxu0 %v6477_v31  ;;  %4887 = vmatprep.mubr.msk.f32.mxu1 %vm394_vm0, %v6479_v48  ;;  %v801_v8 = vpop.permute.xlu0 %800  ;;  %v727_v31 = vsel %vm452_vm2, 0.0, %v8471_v7 }
 0x12a   : > { %1538 = vmatprep.subr.mxu0 %v6270_v0  ;;  %2550 = vmatprep.subr.mxu1 %v6270_v0  ;;  %v6509_v32 = vsel %vm394_vm0, %v726_v22, %v801_v8  ;;  %v803_v26 = vpop.permute.xlu1 %802  ;;  %v6529_v8 = vld [vmem:[#allocation9 + $0x200] sm:$0xff] }
 0x12b   : > { %1171 = vmatmul.mubr.f32.gmra.mxu0 %v6331_v43  ;;  %2180 = vmatmul.mubr.f32.gmra.mxu1 %v6380_v53  ;;  %v6517_v48 = vsel %vm394_vm0, %v6135_v60, %v803_v26  ;;  %v6531_v60 = vld [vmem:[#allocation2 + $0x188] sm:$0xff] }
 0x12c   : > { %1539 = vmatpush2.msra.mxu0 %v6500_v49  ;;  %4850 = vmatprep.mubr.msk.f32.mxu0 %vm394_vm0, %v6502_v51 }
 0x12d   : > { %1540 = vmatprep.subr.mxu0 %v6270_v0  ;;  %4888 = vmatprep.mubr.msk.f32.mxu1 %vm394_vm0, %v6505_v4  ;;  %v805_v22 = vpop.permute.xlu0 %804 }
 0x12e   : > { %1541 = vmatpush2.msra.mxu0 %v6513_v39  ;;  %2551 = vmatpush1.msra.mxu1 %v6184_v3  ;;  %v6535_v35 = vsel %vm394_vm0, %v727_v31, %v805_v22  ;;  %v807_v7 = vpop.permute.xlu1 %806  ;;  %v1992_v3 = vld [vmem:[#allocation9 + $0x78] sm:$0xff]  ;;  %v1998_v22 = vld [vmem:[#allocation9 + $0xa8] sm:$0xff] }
 0x12f   : > { %1176 = vmatmul.mubr.f32.gmra.mxu0 %v6335_v57  ;;  %2185 = vmatmul.mubr.f32.gmra.mxu1 %v6384_v46  ;;  %v6541_v26 = vsel %vm394_vm0, %v6153_v18, %v807_v7  ;;  %v6550_v31 = vld [vmem:[#allocation2 + $0x198] sm:$0xff]  ;;  %v1991_v18 = vld [vmem:[#allocation9 + $0x70] sm:$0xff]  ;;  %v1997_v7 = vld [vmem:[#allocation9 + $0xa0] sm:$0xff] }
 0x130   : > { %1542 = vmatprep.subr.mxu0 %v6270_v0  ;;  %4867 = vmatprep.mubr.msk.f32.mxu0 %vm394_vm0, %v6225_v59  ;;  %v1990_v59 = vld [vmem:[#allocation9 + $0x68] sm:$0xff] }
 0x131   : > { %1543 = vmatpush2.msra.mxu0 %v6529_v8  ;;  %4889 = vmatprep.mubr.msk.f32.mxu1 %vm394_vm0, %v6531_v60 }
 0x132   : > { %2298 = vmatprep.subr.mxu0 %v6270_v0  ;;  %2552 = vmatprep.subr.mxu1 %v6270_v0 }
 0x133   : > { %1545 = vmatmul.mubr.f32.vlgmr.msra.gmra.mxu0 %v6208_v52  ;;  %2190 = vmatmul.mubr.f32.gmra.mxu1 %v6403_v5  ;;  %v6563_v52 = vld [vmem:[#allocation2 + $0x1a8] sm:$0xff] }
 0x134   : > { %2299 = vmatpush1.msra.mxu0 %v1992_v3  ;;  %4868 = vmatprep.mubr.msk.f32.mxu0 %vm394_vm0, %v6249_v16  ;;  %v1989_v16 = vld [vmem:[#allocation9 + $0x60] sm:$0xff]  ;;  %v1996_v3 = vld [vmem:[#allocation9 + $0x98] sm:$0xff] }
 0x135   : > { %2300 = vmatprep.subr.mxu0 %v6270_v0  ;;  %4890 = vmatprep.mubr.msk.f32.mxu1 %vm394_vm0, %v6550_v31 }
 0x136   : > { %2301 = vmatpush1.msra.mxu0 %v1991_v18  ;;  %2553 = vmatpush1.msra.mxu1 %v6195_v40  ;;  %v6575_v40 = vld [vmem:[#allocation2 + $0x1b8] sm:$0xff]  ;;  %v1995_v18 = vld [vmem:[#allocation9 + $0x90] sm:$0xff] }
 0x137   : > { %1550 = vmatmul.mubr.f32.gmra.mxu0 %v6213_v9  ;;  %2195 = vmatmul.mubr.f32.gmra.mxu1 %v6407_v41  ;;  %v1988_v9 = vld [vmem:[#allocation9 + $0x58] sm:$0xff] }
 0x138   : > { %2302 = vmatprep.subr.mxu0 %v6270_v0  ;;  %2554 = vmatprep.subr.mxu1 %v6270_v0 }
 0x139   : > { %2303 = vmatpush1.msra.mxu0 %v1990_v59  ;;  %4869 = vmatprep.mubr.msk.f32.mxu0 %vm394_vm0, %v6275_v36  ;;  %v1982_v36 = vld [vmem:[#allocation9 + $0x28] sm:$0xff]  ;;  %v8480_v59 = vld [vmem:[#allocation28_spill] sm:$0xff] }
 0x13a   : > { %4891 = vmatprep.mubr.msk.f32.mxu1 %vm394_vm0, %v6563_v52  ;;  %2304 = vmatprep.subr.mxu0 %v6270_v0 }
 0x13b   : > { %2555 = vmatpush1.msra.mxu1 %v6205_v19  ;;  %1555 = vmatmul.mubr.f32.gmra.mxu0 %v6229_v23  ;;  %v1987_v19 = vld [vmem:[#allocation9 + $0x50] sm:$0xff]  ;;  %v1986_v23 = vld [vmem:[#allocation9 + $0x48] sm:$0xff] }
 0x13c   : > { %2200 = vmatmul.mubr.f32.gmra.mxu1 %v6430_v38  ;;  %2305 = vmatpush1.msra.mxu0 %v1989_v16  ;;  %v1994_v16 = vld [vmem:[#allocation9 + $0x88] sm:$0xff] }
 0x13d   : > { %2556 = vmatprep.subr.mxu1 %v6270_v0  ;;  %2306 = vmatprep.subr.mxu0 %v6270_v0 }
 0x13e   : > { %2557 = vmatpush1.msra.mxu1 %v6216_v63  ;;  %4870 = vmatprep.mubr.msk.f32.mxu0 %vm394_vm0, %v6301_v58  ;;  %v6590_v63 = vld [vmem:[#allocation2 + $0x1c8] sm:$0xff]  ;;  %v1979_v58 = vld [vmem:[#allocation9 + $0x10] sm:$0xff] }
 0x13f   : > { %2558 = vmatprep.subr.mxu1 %v6270_v0  ;;  %4892 = vmatprep.mubr.msk.f32.mxu1 %vm394_vm0, %v6575_v40 }
 0x140   : > { %2307 = vmatpush1.msra.mxu0 %v1988_v9  ;;  %2559 = vmatpush1.msra.mxu1 %v6231_v17  ;;  %v6602_v17 = vld [vmem:[#allocation2 + $0x1d8] sm:$0xff] }
 0x141   : > { %1560 = vmatmul.mubr.f32.gmra.mxu0 %v6235_v54  ;;  %2205 = vmatmul.mubr.f32.gmra.mxu1 %v6434_v11  ;;  %v1985_v54 = vld [vmem:[#allocation9 + $0x40] sm:$0xff]  ;;  %v3048_v9 = vld [vmem:[#allocation10 + $0x78] sm:$0xff] }
 0x142   : > { %2560 = vmatprep.subr.mxu1 %v6270_v0  ;;  %2308 = vmatprep.subr.mxu0 %v6270_v0 }
 0x143   : > { %2561 = vmatpush1.msra.mxu1 %v6247_v6  ;;  %2309 = vmatpush1.msra.mxu0 %v1987_v19  ;;  %v1984_v6 = vld [vmem:[#allocation9 + $0x38] sm:$0xff]  ;;  %v1993_v19 = vld [vmem:[#allocation9 + $0x80] sm:$0xff] }
 0x144   : > { %2562 = vmatprep.subr.mxu1 %v6270_v0  ;;  %4871 = vmatprep.mubr.msk.f32.mxu0 %vm394_vm0, %v6325_v55  ;;  %v8473_v55 = vld [vmem:[#allocation23_spill] sm:$0xff] }
 0x145   : > { %4893 = vmatprep.mubr.msk.f32.mxu1 %vm394_vm0, %v6590_v63  ;;  %2310 = vmatprep.subr.mxu0 %v6270_v0 }
 0x146   : > { %2563 = vmatpush1.msra.mxu1 %v6262_v27  ;;  %1565 = vmatmul.mubr.f32.gmra.mxu0 %v6253_v21  ;;  %v6617_v21 = vld [vmem:[#allocation2 + $0x1e8] sm:$0xff]  ;;  %v1983_v27 = vld [vmem:[#allocation9 + $0x30] sm:$0xff] }
 0x147   : > { %2210 = vmatmul.mubr.f32.gmra.mxu1 %v6455_v45  ;;  %2311 = vmatpush1.msra.mxu0 %v1986_v23  ;;  %v3047_v23 = vld [vmem:[#allocation10 + $0x70] sm:$0xff] }
 0x148   : > { %2564 = vmatprep.subr.mxu1 %v6270_v0  ;;  %2312 = vmatprep.subr.mxu0 %v6270_v0 }
 0x149   : > { %2565 = vmatpush1.msra.mxu1 %v6278_v29  ;;  %4872 = vmatprep.mubr.msk.f32.mxu0 %vm394_vm0, %v6351_v1  ;;  %v1981_v29 = vld [vmem:[#allocation9 + $0x20] sm:$0xff] }
 0x14a   : > { %2566 = vmatprep.subr.mxu1 %v6270_v0  ;;  %4894 = vmatprep.mubr.msk.f32.mxu1 %vm394_vm0, %v6602_v17  ;;  %v1977_v1 = vld [vmem:[#allocation9] sm:$0xff] }
 0x14b   : > { %2313 = vmatpush1.msra.mxu0 %v1985_v54  ;;  %2567 = vmatpush1.msra.mxu1 %v6299_v37  ;;  %v1980_v37 = vld [vmem:[#allocation9 + $0x18] sm:$0xff] }
 0x14c   : > { %1570 = vmatmul.mubr.f32.gmra.mxu0 %v6257_v25  ;;  %2215 = vmatmul.mubr.f32.gmra.mxu1 %v6459_v33  ;;  %v6629_v25 = vld [vmem:[#allocation2 + $0x1f8] sm:$0xff] }
 0x14d   : > { %2568 = vmatprep.subr.mxu1 %v6270_v0  ;;  %2314 = vmatprep.subr.mxu0 %v6270_v0 }
 0x14e   : > { %2569 = vmatpush1.msra.mxu1 %v6314_v12  ;;  %2315 = vmatpush1.msra.mxu0 %v1984_v6  ;;  %v8472_v12 = vld [vmem:[#allocation22_spill] sm:$0xff]  ;;  %v3046_v6 = vld [vmem:[#allocation10 + $0x68] sm:$0xff] }
 0x14f   : > { %2570 = vmatprep.subr.mxu1 %v6270_v0  ;;  %4873 = vmatprep.mubr.msk.f32.mxu0 %vm394_vm0, %v6374_v14  ;;  %v6683_v14 = vld [vmem:[#allocation2 + $0x238] sm:$0xff] }
 0x150   : > { %4895 = vmatprep.mubr.msk.f32.mxu1 %vm394_vm0, %v6617_v21  ;;  %2316 = vmatprep.subr.mxu0 %v6270_v0 }
 0x151   : > { %2571 = vmatpush1.msra.mxu1 %v6328_v24  ;;  %1575 = vmatmul.mubr.f32.gmra.mxu0 %v6281_v30  ;;  %v6644_v30 = vld [vmem:[#allocation2 + $0x208] sm:$0xff] }
 0x152   : > { %2220 = vmatmul.mubr.f32.gmra.mxu1 %v6483_v61  ;;  %2317 = vmatpush1.msra.mxu0 %v1983_v27  ;;  %v1978_v24 = vld [vmem:[#allocation9 + $0x8] sm:$0xff] }
 0x153   : > { %2572 = vmatprep.subr.mxu1 %v6270_v0  ;;  %2318 = vmatprep.subr.mxu0 %v6270_v0 }
 0x154   : > { %2573 = vmatpush1.msra.mxu1 %v6349_v56  ;;  %4874 = vmatprep.mubr.msk.f32.mxu0 %vm394_vm0, %v6399_v50  ;;  %v6671_v56 = vld [vmem:[#allocation2 + $0x228] sm:$0xff]  ;;  %v1999_v50 = vld [vmem:[#allocation9 + $0xb0] sm:$0xff] }
 0x155   : > { %2574 = vmatprep.subr.mxu1 %v6270_v0  ;;  %4896 = vmatprep.mubr.msk.f32.mxu1 %vm394_vm0, %v6629_v25 }
 0x156   : > { %2319 = vmatpush1.msra.mxu0 %v1982_v36  ;;  %2575 = vmatpush1.msra.mxu1 %v6363_v10  ;;  %v8474_v10 = vld [vmem:[#allocation26_spill] sm:$0xff]  ;;  %v3045_v36 = vld [vmem:[#allocation10 + $0x60] sm:$0xff] }
 0x157   : > { %1580 = vmatmul.mubr.f32.gmra.mxu0 %v6285_v62  ;;  %2225 = vmatmul.mubr.f32.gmra.mxu1 %v6487_v47  ;;  %v6656_v62 = vld [vmem:[#allocation2 + $0x218] sm:$0xff] }
 0x158   : > { %2576 = vmatprep.subr.mxu1 %v6270_v0  ;;  %2320 = vmatprep.subr.mxu0 %v6270_v0 }
 0x159   : > { %2577 = vmatpush1.msra.mxu1 %v6377_v20  ;;  %2321 = vmatpush1.msra.mxu0 %v1981_v29  ;;  %v2000_v20 = vld [vmem:[#allocation9 + $0xb8] sm:$0xff] }
 0x15a   : > { %2578 = vmatprep.subr.mxu1 %v6270_v0  ;;  %4875 = vmatprep.mubr.msk.f32.mxu0 %vm394_vm0, %v6422_v28 }
 0x15b   : > { %4897 = vmatprep.mubr.msk.f32.mxu1 %vm394_vm0, %v6644_v30  ;;  %2322 = vmatprep.subr.mxu0 %v6270_v0 }
 0x15c   : > { %2579 = vmatpush1.msra.mxu1 %v6397_v42  ;;  %1585 = vmatmul.mubr.f32.gmra.mxu0 %v6305_v34  ;;  %v8475_v42 = vld [vmem:[#allocation27_spill] sm:$0xff] }
 0x15d   : > { %2230 = vmatmul.mubr.f32.gmra.mxu1 %v6509_v32  ;;  %2323 = vmatpush1.msra.mxu0 %v1980_v37 }
 0x15e   : > { %2596 = vmatprep.subr.mxu1 %v6270_v0  ;;  %2324 = vmatprep.subr.mxu0 %v6270_v0 }
 0x15f   : > { %2597 = vmatpush2.msra.mxu1 %v8472_v12  ;;  %4876 = vmatprep.mubr.msk.f32.mxu0 %vm394_vm0, %v6449_v2  ;;  %v3040_v12 = vld [vmem:[#allocation10 + $0x38] sm:$0xff] }
 0x160   : > { %2598 = vmatprep.subr.mxu1 %v6270_v0  ;;  %4898 = vmatprep.mubr.msk.f32.mxu1 %vm394_vm0, %v6656_v62 }
 0x161   : > { %2325 = vmatpush1.msra.mxu0 %v1979_v58  ;;  %2599 = vmatpush2.msra.mxu1 %v8473_v55  ;;  %v3042_v58 = vld [vmem:[#allocation10 + $0x48] sm:$0xff] }
 0x162   : > { %1590 = vmatmul.mubr.f32.gmra.mxu0 %v6309_v44  ;;  %2235 = vmatmul.mubr.f32.gmra.mxu1 %v6517_v48 }
 0x163   : > { %2600 = vmatprep.subr.mxu1 %v6270_v0  ;;  %2326 = vmatprep.subr.mxu0 %v6270_v0 }
 0x164   : > { %2601 = vmatpush2.msra.mxu1 %v6447_v13  ;;  %2327 = vmatpush1.msra.mxu0 %v1978_v24  ;;  %v8476_v13 = vld [vmem:[#allocation24_spill] sm:$0xff] }
 0x165   : > { %2602 = vmatprep.subr.mxu1 %v6270_v0  ;;  %4877 = vmatprep.mubr.msk.f32.mxu0 %vm394_vm0, %v6474_v15 }
 0x166   : > { %4899 = vmatprep.mubr.msk.f32.mxu1 %vm394_vm0, %v6671_v56  ;;  %2328 = vmatprep.subr.mxu0 %v6270_v0 }
 0x167   : > { %2603 = vmatpush2.msra.mxu1 %v8474_v10  ;;  %1595 = vmatmul.mubr.f32.gmra.mxu0 %v6331_v43  ;;  %v3050_v10 = vld [vmem:[#allocation10 + $0x88] sm:$0xff] }
 0x168   : > { %2240 = vmatmul.mubr.f32.gmra.mxu1 %v6535_v35  ;;  %2329 = vmatpush1.msra.mxu0 %v1977_v1  ;;  %v6837_v1 = vld [vmem:[#allocation2] sm:$0xff] }
 0x169   : > { %2604 = vmatprep.subr.mxu1 %v6270_v0  ;;  %2346 = vmatprep.subr.mxu0 %v6270_v0 }
 0x16a   : > { %2605 = vmatpush2.msra.mxu1 %v8475_v42  ;;  %4878 = vmatprep.mubr.msk.f32.mxu0 %vm394_vm0, %v6502_v51  ;;  %v3004_v42 = vld [vmem:[#allocation3 + $0x18] sm:$0xff] }
 0x16b   : > { %2606 = vmatprep.subr.mxu1 %v6270_v0  ;;  %4900 = vmatprep.mubr.msk.f32.mxu1 %vm394_vm0, %v6683_v14 }
 0x16c   : > { %2347 = vmatpush2.msra.mxu0 %v2000_v20  ;;  %2607 = vmatpush2.msra.mxu1 %v6500_v49  ;;  %v8477_v49 = vld [vmem:[#allocation20_spill] sm:$0xff] }
 0x16d   : > { %1600 = vmatmul.mubr.f32.gmra.mxu0 %v6335_v57  ;;  %2245 = vmatmul.mubr.f32.gmra.mxu1 %v6541_v26 }
 0x16e   : > { %2608 = vmatprep.subr.mxu1 %v6270_v0  ;;  %2348 = vmatprep.subr.mxu0 %v6270_v0 }
 0x16f   : > { %2609 = vmatpush2.msra.mxu1 %v6513_v39  ;;  %2349 = vmatpush2.msra.mxu0 %v1999_v50  ;;  %v8478_v39 = vld [vmem:[#allocation25_spill] sm:$0xff] }
 0x170   : > { %2610 = vmatprep.subr.mxu1 %v6270_v0  ;;  %4879 = vmatprep.mubr.msk.f32.mxu0 %vm394_vm0, %v8476_v13 }
 0x171   : > { %2350 = vmatprep.subr.mxu0 %v6270_v0  ;;  %2611 = vmatpush2.msra.mxu1 %v6529_v8  ;;  %v8479_v8 = vld [vmem:[#allocation21_spill] sm:$0xff] }
 0x172   : > { %4917 = vmatprep.mubr.msk.f32.mxu1 %vm394_vm0, %v6531_v60  ;;  %1605 = vmatmul.mubr.f32.gmra.mxu0 %v8477_v49 }
 0x173   : > { %2351 = vmatpush2.msra.mxu0 %v1998_v22  ;;  %2613 = vmatmul.mubr.f32.vlgmr.msra.gmra.mxu1 %v6403_v5 }
 0x174   : > { %2352 = vmatprep.subr.mxu0 %v6270_v0  ;;  %4880 = vmatprep.mubr.msk.f32.mxu0 %vm394_vm0, %v8478_v39 }
 0x175   : > { %2353 = vmatpush2.msra.mxu0 %v1997_v7  ;;  %4918 = vmatprep.mubr.msk.f32.mxu1 %vm394_vm0, %v6550_v31 }
 0x176   : > { %1610 = vmatmul.mubr.f32.gmra.mxu0 %v8479_v8  ;;  %2354 = vmatprep.subr.mxu0 %v6270_v0 }
 0x177   : > { %2618 = vmatmul.mubr.f32.gmra.mxu1 %v6407_v41  ;;  %2355 = vmatpush2.msra.mxu0 %v1996_v3 }
 0x178   : > { %4881 = vmatprep.mubr.msk.f32.mxu0 %vm394_vm0, %v8480_v59  ;;  %2356 = vmatprep.subr.mxu0 %v6270_v0 }
 0x179   : > { %4919 = vmatprep.mubr.msk.f32.mxu1 %vm394_vm0, %v6563_v52  ;;  %2357 = vmatpush2.msra.mxu0 %v1995_v18 }
 0x17a   : > { %1615 = vmatmul.mubr.f32.gmra.mxu0 %v6380_v53  ;;  %2358 = vmatprep.subr.mxu0 %v6270_v0 }
 0x17b   : > { %2623 = vmatmul.mubr.f32.gmra.mxu1 %v6430_v38  ;;  %4882 = vmatprep.mubr.msk.f32.mxu0 %vm394_vm0, %v6505_v4 }
 0x17c   : > { %2359 = vmatpush2.msra.mxu0 %v1994_v16  ;;  %4920 = vmatprep.mubr.msk.f32.mxu1 %vm394_vm0, %v6575_v40 }
 0x17d   : > { %2360 = vmatprep.subr.mxu0 %v6270_v0  ;;  %3355 = vmatprep.subr.mxu1 %v6270_v0 }
 0x17e   : > { %1620 = vmatmul.mubr.f32.gmra.mxu0 %v6384_v46  ;;  %3356 = vmatpush1.msra.mxu1 %v3048_v9 }
 0x17f   : > { %2628 = vmatmul.mubr.f32.gmra.mxu1 %v6434_v11  ;;  %2361 = vmatpush2.msra.mxu0 %v1993_v19 }
 0x180   : > { %4901 = vmatprep.mubr.msk.f32.mxu0 %vm394_vm0, %v6422_v28  ;;  %4921 = vmatprep.mubr.msk.f32.mxu1 %vm394_vm0, %v6590_v63 }
 0x181   : > { %v6736_v54 = vpop.f32.mrf.mxu1  ;;  %3357 = vmatprep.subr.mxu1 %v6270_v0  ;;  %3162 = vmatprep.subr.mxu0 %v6270_v0 }
 0x182   : > { %2363 = vmatmul.mubr.f32.vlgmr.msra.gmra.mxu0 %v6305_v34  ;;  %3358 = vmatpush1.msra.mxu1 %v3047_v23 }
 0x183   : > { %2633 = vmatmul.mubr.f32.gmra.mxu1 %v6455_v45  ;;  %4902 = vmatprep.mubr.msk.f32.mxu0 %vm394_vm0, %v6449_v2  ;;  %v1297_v27 = vpop.f32.mrf.mxu1  ;;  %v3044_v2 = vld [vmem:[#allocation10 + $0x58] sm:$0xff] }
 0x184   : > { %4922 = vmatprep.mubr.msk.f32.mxu1 %vm394_vm0, %v6602_v17  ;;  %3359 = vmatprep.subr.mxu1 %v6270_v0 }
 0x185   : > { %v6747_v28 = vpop.f32.mrf.mxu1  ;;  %3360 = vmatpush1.msra.mxu1 %v3046_v6 }
 0x186   : > { %2368 = vmatmul.mubr.f32.gmra.mxu0 %v6309_v44  ;;  %3361 = vmatprep.subr.mxu1 %v6270_v0  ;;  %v3043_v44 = vld [vmem:[#allocation10 + $0x50] sm:$0xff] }
 0x187   : > { %2638 = vmatmul.mubr.f32.gmra.mxu1 %v6459_v33  ;;  %4903 = vmatprep.mubr.msk.f32.mxu0 %vm394_vm0, %v6474_v15  ;;  %v1302_v34 = vpop.f32.mrf.mxu1 }
 0x188   : > { %4923 = vmatprep.mubr.msk.f32.mxu1 %vm394_vm0, %v6617_v21  ;;  %3362 = vmatpush1.msra.mxu1 %v3045_v36  ;;  %v3105_v36 = vld [vmem:[#allocation10 + $0x138] sm:$0xff] }
 0x189   : > { %v6756_v29 = vpop.f32.mrf.mxu1  ;;  %3363 = vmatprep.subr.mxu1 %v6270_v0  ;;  %3163 = vmatpush1.msra.mxu0 %v3105_v36 }
 0x18a   : > { %2373 = vmatmul.mubr.f32.gmra.mxu0 %v6331_v43  ;;  %3364 = vmatpush1.msra.mxu1 %v3044_v2 }
 0x18b   : > { %2643 = vmatmul.mubr.f32.gmra.mxu1 %v6483_v61  ;;  %4904 = vmatprep.mubr.msk.f32.mxu0 %vm394_vm0, %v6502_v51  ;;  %v1307_v15 = vpop.f32.mrf.mxu1  ;;  %v3041_v51 = vld [vmem:[#allocation10 + $0x40] sm:$0xff] }
 0x18c   : > { %4924 = vmatprep.mubr.msk.f32.mxu1 %vm394_vm0, %v6629_v25  ;;  %3365 = vmatprep.subr.mxu1 %v6270_v0 }
 0x18d   : > { %v6766_v37 = vpop.f32.mrf.mxu1  ;;  %3366 = vmatpush1.msra.mxu1 %v3043_v44  ;;  %3164 = vmatprep.subr.mxu0 %v6837_v1 }
 0x18e   : > { %2378 = vmatmul.mubr.f32.gmra.mxu0 %v6335_v57  ;;  %3367 = vmatprep.subr.mxu1 %v6270_v0  ;;  %v3039_v57 = vld [vmem:[#allocation10 + $0x30] sm:$0xff] }
 0x18f   : > { %2648 = vmatmul.mubr.f32.gmra.mxu1 %v6487_v47  ;;  %4905 = vmatprep.mubr.msk.f32.mxu0 %vm394_vm0, %v8476_v13  ;;  %v1312_v43 = vpop.f32.mrf.mxu1 }
 0x190   : > { %4925 = vmatprep.mubr.msk.f32.mxu1 %vm394_vm0, %v6644_v30  ;;  %3368 = vmatpush1.msra.mxu1 %v3042_v58  ;;  %v3037_v30 = vld [vmem:[#allocation10 + $0x20] sm:$0xff]  ;;  %v3104_v58 = vld [vmem:[#allocation10 + $0x130] sm:$0xff] }
 0x191   : > { %3369 = vmatprep.subr.mxu1 %v6270_v0  ;;  %3165 = vmatpush1.msra.mxu0 %v3104_v58 }
 0x192   : > { %2383 = vmatmul.mubr.f32.gmra.mxu0 %v8477_v49  ;;  %3370 = vmatpush1.msra.mxu1 %v3041_v51 }
 0x193   : > { %2653 = vmatmul.mubr.f32.gmra.mxu1 %v6509_v32  ;;  %4906 = vmatprep.mubr.msk.f32.mxu0 %vm394_vm0, %v8478_v39  ;;  %v3038_v32 = vld [vmem:[#allocation10 + $0x28] sm:$0xff] }
 0x194   : > { %4926 = vmatprep.mubr.msk.f32.mxu1 %vm394_vm0, %v6656_v62  ;;  %3371 = vmatprep.subr.mxu1 %v6270_v0  ;;  %v3036_v62 = vld [vmem:[#allocation10 + $0x18] sm:$0xff] }
 0x195   : > { %3372 = vmatpush1.msra.mxu1 %v3040_v12  ;;  %3166 = vmatprep.subr.mxu0 %v6837_v1 }
 0x196   : > { %2388 = vmatmul.mubr.f32.gmra.mxu0 %v8479_v8  ;;  %3373 = vmatprep.subr.mxu1 %v6270_v0 }
 0x197   : > { %2658 = vmatmul.mubr.f32.gmra.mxu1 %v6517_v48  ;;  %4907 = vmatprep.mubr.msk.f32.mxu0 %vm394_vm0, %v8480_v59  ;;  %v2469_v48 = vld [vmem:[#allocation2 + $0x248] sm:$0xff] }
 0x198   : > { %4927 = vmatprep.mubr.msk.f32.mxu1 %vm394_vm0, %v6671_v56  ;;  %3374 = vmatpush1.msra.mxu1 %v3039_v57 }
 0x199   : > { %3375 = vmatprep.subr.mxu1 %v6270_v0 }
 0x19a   : > { %2393 = vmatmul.mubr.f32.gmra.mxu0 %v6380_v53  ;;  %3376 = vmatpush1.msra.mxu1 %v3038_v32  ;;  %v3035_v53 = vld [vmem:[#allocation10 + $0x10] sm:$0xff] }
 0x19b   : > { %2663 = vmatmul.mubr.f32.gmra.mxu1 %v6535_v35  ;;  %4908 = vmatprep.mubr.msk.f32.mxu0 %vm394_vm0, %v6505_v4  ;;  %v2471_v4 = vld [vmem:[#allocation2 + $0x258] sm:$0xff]  ;;  %v3034_v35 = vld [vmem:[#allocation10 + $0x8] sm:$0xff] }
 0x19c   : > { %4928 = vmatprep.mubr.msk.f32.mxu1 %vm394_vm0, %v6683_v14  ;;  %3377 = vmatprep.subr.mxu1 %v6270_v0 }
 0x19d   : > { %3378 = vmatpush1.msra.mxu1 %v3037_v30  ;;  %v3103_v30 = vld [vmem:[#allocation10 + $0x128] sm:$0xff] }
 0x19e   : > { %2398 = vmatmul.mubr.f32.gmra.mxu0 %v6384_v46  ;;  %3379 = vmatprep.subr.mxu1 %v6270_v0  ;;  %v2473_v46 = vld [vmem:[#allocation2 + $0x268] sm:$0xff] }
 0x19f   : > { %2668 = vmatmul.mubr.f32.gmra.mxu1 %v6541_v26  ;;  %4909 = vmatprep.mubr.msk.f32.mxu0 %vm394_vm0, %v6531_v60  ;;  %v3033_v60 = vld [vmem:[#allocation10] sm:$0xff]  ;;  %v2475_v26 = vld [vmem:[#allocation2 + $0x278] sm:$0xff] }
 0x1a0   : > { %4929 = vmatprep.mubr.msk.f32.mxu1 %vm394_vm0, %v2469_v48  ;;  %3380 = vmatpush1.msra.mxu1 %v3036_v62  ;;  %v3102_v48 = vld [vmem:[#allocation10 + $0x120] sm:$0xff] }
 0x1a1   : > { %3381 = vmatprep.subr.mxu1 %v6270_v0  ;;  %3167 = vmatpush1.msra.mxu0 %v3103_v30 }
 0x1a2   : > { %2403 = vmatmul.mubr.f32.gmra.mxu0 %v6403_v5  ;;  %3382 = vmatpush1.msra.mxu1 %v3035_v53  ;;  %v3056_v5 = vld [vmem:[#allocation10 + $0xb8] sm:$0xff] }
 0x1a3   : > { %4910 = vmatprep.mubr.msk.f32.mxu0 %vm394_vm0, %v6550_v31  ;;  %2673 = vmatmul.mubr.f32.gmra.mxu1 %v6270_v0  ;;  %v3055_v31 = vld [vmem:[#allocation10 + $0xb0] sm:$0xff] }
 0x1a4   : > { %4930 = vmatprep.mubr.msk.f32.mxu1 %vm394_vm0, %v2471_v4  ;;  %3383 = vmatprep.subr.mxu1 %v6270_v0 }
 0x1a5   : > { %3384 = vmatpush1.msra.mxu1 %v3034_v35  ;;  %3168 = vmatprep.subr.mxu0 %v6837_v1 }
 0x1a6   : > { %2408 = vmatmul.mubr.f32.gmra.mxu0 %v6407_v41  ;;  %3385 = vmatprep.subr.mxu1 %v6270_v0  ;;  %v3054_v41 = vld [vmem:[#allocation10 + $0xa8] sm:$0xff] }
 0x1a7   : > { %4911 = vmatprep.mubr.msk.f32.mxu0 %vm394_vm0, %v6563_v52  ;;  %2678 = vmatmul.mubr.f32.gmra.mxu1 %v6270_v0  ;;  %v3002_v52 = vld [vmem:[#allocation3 + $0x8] sm:$0xff] }
 0x1a8   : > { %4931 = vmatprep.mubr.msk.f32.mxu1 %vm394_vm0, %v2473_v46  ;;  %3386 = vmatpush1.msra.mxu1 %v3033_v60  ;;  %v3101_v60 = vld [vmem:[#allocation10 + $0x118] sm:$0xff] }
 0x1a9   : > { %3403 = vmatprep.subr.mxu1 %v6270_v0  ;;  %3169 = vmatpush1.msra.mxu0 %v3102_v48 }
 0x1aa   : > { %2413 = vmatmul.mubr.f32.gmra.mxu0 %v6430_v38  ;;  %3404 = vmatpush2.msra.mxu1 %v3056_v5  ;;  %v3053_v38 = vld [vmem:[#allocation10 + $0xa0] sm:$0xff] }
 0x1ab   : > { %4912 = vmatprep.mubr.msk.f32.mxu0 %vm394_vm0, %v6575_v40  ;;  %2683 = vmatmul.mubr.f32.gmra.mxu1 %v6270_v0  ;;  %v3052_v40 = vld [vmem:[#allocation10 + $0x98] sm:$0xff] }
 0x1ac   : > { %4932 = vmatprep.mubr.msk.f32.mxu1 %vm394_vm0, %v2475_v26  ;;  %3405 = vmatprep.subr.mxu1 %v6270_v0 }
 0x1ad   : > { %3406 = vmatpush2.msra.mxu1 %v3055_v31  ;;  %3170 = vmatprep.subr.mxu0 %v6837_v1 }
 0x1ae   : > { %2418 = vmatmul.mubr.f32.gmra.mxu0 %v6434_v11  ;;  %3407 = vmatprep.subr.mxu1 %v6270_v0 }
 0x1af   : > { %4913 = vmatprep.mubr.msk.f32.mxu0 %vm394_vm0, %v6590_v63  ;;  %2688 = vmatmul.mubr.f32.gmra.mxu1 %v6270_v0  ;;  %v3051_v63 = vld [vmem:[#allocation10 + $0x90] sm:$0xff] }
 0x1b0   : > { %3408 = vmatpush2.msra.mxu1 %v3054_v41  ;;  %4965 = vmatprep.mubr.msk.f32.mxu1 %vm394_vm0, %v3002_v52 }
 0x1b1   : > { %3409 = vmatprep.subr.mxu1 %v6270_v0  ;;  %3171 = vmatpush1.msra.mxu0 %v3101_v60 }
 0x1b2   : > { %2423 = vmatmul.mubr.f32.gmra.mxu0 %v6455_v45  ;;  %3410 = vmatpush2.msra.mxu1 %v3053_v38  ;;  %v3100_v38 = vld [vmem:[#allocation10 + $0x110] sm:$0xff] }
 0x1b3   : > { %4914 = vmatprep.mubr.msk.f32.mxu0 %vm394_vm0, %v6602_v17  ;;  %v6834_v11 = vpop.f32.mrf.mxu0  ;;  %v1315_v55 = vpop.f32.mrf.mxu1  ;;  %3411 = vmatprep.subr.mxu1 %v6270_v0  ;;  %v3049_v0 = vld [vmem:[#allocation10 + $0x80] sm:$0xff] }
 0x1b4   : > { %3412 = vmatpush2.msra.mxu1 %v3052_v40  ;;  %3172 = vmatprep.subr.mxu0 %v6837_v1  ;;  %v3099_v40 = vld [vmem:[#allocation10 + $0x108] sm:$0xff] }
 0x1b5   : > { %v1104_v24 = vpop.f32.mrf.mxu0  ;;  %v1317_v56 = vpop.f32.mrf.mxu1  ;;  %3413 = vmatprep.subr.mxu1 %v6837_v1  ;;  %3173 = vmatpush1.msra.mxu0 %v3100_v38 }
 0x1b6   : > { %2428 = vmatmul.mubr.f32.gmra.mxu0 %v6459_v33  ;;  %3414 = vmatpush2.msra.mxu1 %v3051_v63 }
 0x1b7   : > { %4915 = vmatprep.mubr.msk.f32.mxu0 %vm394_vm0, %v6617_v21  ;;  %v6843_v45 = vpop.f32.mrf.mxu0  ;;  %v1320_v17 = vpop.f32.mrf.mxu1  ;;  %3415 = vmatprep.subr.mxu1 %v6837_v1 }
 0x1b8   : > { %3416 = vmatpush2.msra.mxu1 %v3050_v10  ;;  %3174 = vmatprep.subr.mxu0 %v6837_v1 }
 0x1b9   : > { %v1109_v14 = vpop.f32.mrf.mxu0  ;;  %v1322_v20 = vpop.f32.mrf.mxu1  ;;  %3417 = vmatprep.subr.mxu1 %v6837_v1  ;;  %3175 = vmatpush1.msra.mxu0 %v3099_v40 }
 0x1ba   : > { %2433 = vmatmul.mubr.f32.gmra.mxu0 %v6483_v61  ;;  %3418 = vmatpush2.msra.mxu1 %v3049_v0 }
 0x1bb   : > { %4916 = vmatprep.mubr.msk.f32.mxu0 %vm394_vm0, %v6629_v25  ;;  %v6850_v33 = vpop.f32.mrf.mxu0  ;;  %v1325_v21 = vpop.f32.mrf.mxu1  ;;  %3420 = vmatmul.mubr.f32.vlgmr.msra.gmra.mxu1 %v6837_v1 }
 0x1bc   : > { %4966 = vmatprep.mubr.msk.f32.mxu1 %vm394_vm0, %v3004_v42  ;;  %4004 = vmatprep.subr.mxu1 %v6837_v1  ;;  %v3097_v42 = vld [vmem:[#allocation10 + $0xf8] sm:$0xff] }
 0x1bd   : > { %v1114_v50 = vpop.f32.mrf.mxu0  ;;  %v1327_v13 = vpop.f32.mrf.mxu1  ;;  %4005 = vmatpush1.msra.mxu1 %v3105_v36  ;;  %3176 = vmatprep.subr.mxu0 %v6837_v1  ;;  %v3092_v36 = vld [vmem:[#allocation10 + $0xd0] sm:$0xff] }
 0x1be   : > { %2438 = vmatmul.mubr.f32.gmra.mxu0 %v6487_v47  ;;  %4006 = vmatprep.subr.mxu1 %v6837_v1  ;;  %v3096_v13 = vld [vmem:[#allocation10 + $0xf0] sm:$0xff] }
 0x1bf   : > { %v1117_v22 = vpop.f32.mrf.mxu0  ;;  %v1330_v49 = vpop.f32.mrf.mxu1  ;;  %3425 = vmatmul.mubr.f32.gmra.mxu1 %v6837_v1 }
 0x1c0   : > { %v6858_v61 = vadd.f32 %v6766_v37, %v1117_v22  ;;  %4007 = vmatpush1.msra.mxu1 %v3104_v58 }
 0x1c1   : > { %v1119_v25 = vpop.f32.mrf.mxu0  ;;  %v1332_v7 = vpop.f32.mrf.mxu1  ;;  %4008 = vmatprep.subr.mxu1 %v6837_v1 }
 0x1c2   : > { %4009 = vmatpush1.msra.mxu1 %v3103_v30  ;;  %v3095_v7 = vld [vmem:[#allocation10 + $0xe8] sm:$0xff]  ;;  %v1296_v30 = vadd.f32 %v6736_v54, %v6834_v11  ;;  %v3112_v54 = vld [vmem:[#allocation10 + $0x170] sm:$0xff]  ;;  %v6938_v11 = vld [vmem:[%s8365_s5] ss:$0 sm:$0xff] }
 0x1c3   : > { %v1122_v39 = vpop.f32.mrf.mxu0  ;;  %v1335_v3 = vpop.f32.mrf.mxu1  ;;  %4010 = vmatprep.subr.mxu1 %v6837_v1 }
 0x1c4   : > { %v6860_v8 = vadd.f32 %v1315_v55, %v1122_v39  ;;  %4011 = vmatpush1.msra.mxu1 %v3102_v48  ;;  %v3113_v48 = vld [vmem:[#allocation10 + $0x178] sm:$0xff] }
 0x1c5   : > { %v1124_v18 = vpop.f32.mrf.mxu0  ;;  %v1337_v59 = vpop.f32.mrf.mxu1  ;;  %4012 = vmatprep.subr.mxu1 %v6837_v1 }
 0x1c6   : > { %4013 = vmatpush1.msra.mxu1 %v3101_v60  ;;  %v3094_v59 = vld [vmem:[#allocation10 + $0xe0] sm:$0xff] }
 0x1c7   : > { %v1127_v16 = vpop.f32.mrf.mxu0  ;;  %v1340_v9 = vpop.f32.mrf.mxu1  ;;  %4014 = vmatprep.subr.mxu1 %v6837_v1 }
 0x1c8   : > { %v6862_v19 = vadd.f32 %v1320_v17, %v1127_v16  ;;  %4015 = vmatpush1.msra.mxu1 %v3100_v38  ;;  %v3098_v17 = vld [vmem:[#allocation10 + $0x100] sm:$0xff] }
 0x1c9   : > { %v1129_v47 = vpop.f32.mrf.mxu0  ;;  %v1342_v23 = vpop.f32.mrf.mxu1  ;;  %4016 = vmatprep.subr.mxu1 %v6837_v1  ;;  %3177 = vmatpush1.msra.mxu0 %v3098_v17 }
 0x1ca   : > { %4017 = vmatpush1.msra.mxu1 %v3099_v40  ;;  %3178 = vmatprep.subr.mxu0 %v6837_v1  ;;  %v3093_v47 = vld [vmem:[#allocation10 + $0xd8] sm:$0xff] }
 0x1cb   : > { %v1132_v6 = vpop.f32.mrf.mxu0  ;;  %v1345_v27 = vpop.f32.mrf.mxu1  ;;  %4018 = vmatprep.subr.mxu1 %v6837_v1  ;;  %3179 = vmatpush1.msra.mxu0 %v3097_v42 }
 0x1cc   : > { %v6864_v34 = vadd.f32 %v1325_v21, %v1132_v6  ;;  %4019 = vmatpush1.msra.mxu1 %v3098_v17  ;;  %3180 = vmatprep.subr.mxu0 %v6837_v1  ;;  %v1306_v17 = vadd.f32 %v6756_v29, %v6850_v33  ;;  %v3108_v29 = vld [vmem:[#allocation10 + $0x150] sm:$0xff] }
 0x1cd   : > { %v1134_v2 = vpop.f32.mrf.mxu0  ;;  %v1347_v44 = vpop.f32.mrf.mxu1  ;;  %4020 = vmatprep.subr.mxu1 %v6837_v1  ;;  %3181 = vmatpush1.msra.mxu0 %v3096_v13 }
 0x1ce   : > { %4021 = vmatpush1.msra.mxu1 %v3097_v42  ;;  %3182 = vmatprep.subr.mxu0 %v6837_v1  ;;  %v3109_v42 = vld [vmem:[#allocation10 + $0x158] sm:$0xff] }
 0x1cf   : > { %v1137_v15 = vpop.f32.mrf.mxu0  ;;  %v1350_v37 = vpop.f32.mrf.mxu1  ;;  %4022 = vmatprep.subr.mxu1 %v6837_v1  ;;  %3183 = vmatpush1.msra.mxu0 %v3095_v7 }
 0x1d0   : > { %v6868_v43 = vadd.f32 %v1330_v49, %v1137_v15  ;;  %4023 = vmatpush1.msra.mxu1 %v3096_v13  ;;  %3184 = vmatprep.subr.mxu0 %v6837_v1  ;;  %v3091_v15 = vld [vmem:[#allocation10 + $0xc8] sm:$0xff] }
 0x1d1   : > { %v1139_v51 = vpop.f32.mrf.mxu0  ;;  %v1352_v12 = vpop.f32.mrf.mxu1  ;;  %4024 = vmatprep.subr.mxu1 %v6837_v1  ;;  %3185 = vmatpush1.msra.mxu0 %v3094_v59  ;;  %v1686_v13 = vld [vmem:[%s5590_s24 + $0x8] sm:$0xff] }
 0x1d2   : > { %4025 = vmatpush1.msra.mxu1 %v3095_v7  ;;  %3186 = vmatprep.subr.mxu0 %v6837_v1  ;;  %v3090_v12 = vld [vmem:[#allocation10 + $0xc0] sm:$0xff] }
 0x1d3   : > { %v1142_v57 = vpop.f32.mrf.mxu0  ;;  %v1355_v32 = vpop.f32.mrf.mxu1  ;;  %4026 = vmatprep.subr.mxu1 %v6837_v1  ;;  %3187 = vmatpush1.msra.mxu0 %v3093_v47 }
 0x1d4   : > { %v6872_v62 = vadd.f32 %v1335_v3, %v1142_v57  ;;  %4027 = vmatpush1.msra.mxu1 %v3094_v59  ;;  %3188 = vmatprep.subr.mxu0 %v6837_v1 }
 0x1d5   : > { %v1144_v53 = vpop.f32.mrf.mxu0  ;;  %v1357_v4 = vpop.f32.mrf.mxu1  ;;  %4028 = vmatprep.subr.mxu1 %v6837_v1  ;;  %3189 = vmatpush1.msra.mxu0 %v3092_v36 }
 0x1d6   : > { %4029 = vmatpush1.msra.mxu1 %v3093_v47  ;;  %3190 = vmatprep.subr.mxu0 %v6837_v1  ;;  %v6929_v53 = vld [vmem:[%s8364_s4] ss:$0 sm:$0xff]  ;;  %v3107_v47 = vld [vmem:[#allocation10 + $0x148] sm:$0xff] }
 0x1d7   : > { %v1147_v35 = vpop.f32.mrf.mxu0  ;;  %v1360_v46 = vpop.f32.mrf.mxu1  ;;  %4030 = vmatprep.subr.mxu1 %v6837_v1  ;;  %3191 = vmatpush1.msra.mxu0 %v3091_v15 }
 0x1d8   : > { %v6878_v5 = vadd.f32 %v1340_v9, %v1147_v35  ;;  %4031 = vmatpush1.msra.mxu1 %v3092_v36  ;;  %3192 = vmatprep.subr.mxu0 %v6837_v1 }
 0x1d9   : > { %v1149_v26 = vpop.f32.mrf.mxu0  ;;  %v1362_v31 = vpop.f32.mrf.mxu1  ;;  %4032 = vmatprep.subr.mxu1 %v6837_v1  ;;  %3193 = vmatpush1.msra.mxu0 %v3090_v12 }
 0x1da   : > { %4033 = vmatpush1.msra.mxu1 %v3091_v15  ;;  %3210 = vmatprep.subr.mxu0 %v6837_v1  ;;  %v1301_v31 = vadd.f32 %v6747_v28, %v6843_v45  ;;  %v3110_v28 = vld [vmem:[#allocation10 + $0x160] sm:$0xff] }
 0x1db   : > { %v1152_v41 = vpop.f32.mrf.mxu0  ;;  %v1365_v52 = vpop.f32.mrf.mxu1  ;;  %4034 = vmatprep.subr.mxu1 %v6837_v1  ;;  %3211 = vmatpush2.msra.mxu0 %v3113_v48 }
 0x1dc   : > { %v6882_v55 = vadd.f32 %v1345_v27, %v1152_v41  ;;  %4035 = vmatpush1.msra.mxu1 %v3090_v12  ;;  %3212 = vmatprep.subr.mxu0 %v6837_v1 }
 0x1dd   : > { %v1154_v63 = vpop.f32.mrf.mxu0  ;;  %v1367_v24 = vpop.f32.mrf.mxu1  ;;  %4052 = vmatprep.subr.mxu1 %v6837_v1  ;;  %3213 = vmatpush2.msra.mxu0 %v3112_v54 }
 0x1de   : > { %4053 = vmatpush2.msra.mxu1 %v3113_v48  ;;  %3214 = vmatprep.subr.mxu0 %v6837_v1  ;;  %v1685_v63 = vld [vmem:[%s5590_s24] sm:$0xff] }
 0x1df   : > { %v1157_v56 = vpop.f32.mrf.mxu0  ;;  %v1370_v10 = vpop.f32.mrf.mxu1  ;;  %4054 = vmatprep.subr.mxu1 %v6837_v1 }
 0x1e0   : > { %v6888_v0 = vadd.f32 %v1350_v37, %v1157_v56  ;;  %4055 = vmatpush2.msra.mxu1 %v3112_v54 }
 0x1e1   : > { %v1159_v14 = vpop.f32.mrf.mxu0  ;;  %v1372_v20 = vpop.f32.mrf.mxu1  ;;  %4056 = vmatprep.subr.mxu1 %v6837_v1 }
 0x1e3   : > { %v1162_v21 = vpop.f32.mrf.mxu0  ;;  %v6892_v50 = vpop.f32.mrf.mxu1 }
 0x1e4   : > { %v6894_v22 = vadd.f32 %v1355_v32, %v1162_v21 }
 0x1e5   : > { %v1164_v49 = vpop.f32.mrf.mxu0  ;;  %v2173_v25 = vpop.f32.mrf.mxu1 }
 0x1e7   : > { %v1167_v39 = vpop.f32.mrf.mxu0  ;;  %v6900_v3 = vpop.f32.mrf.mxu1 }
 0x1e8   : > { %v6902_v18 = vadd.f32 %v1360_v46, %v1167_v39 }
 0x1e9   : > { %v1169_v16 = vpop.f32.mrf.mxu0  ;;  %v2178_v9 = vpop.f32.mrf.mxu1 }
 0x1eb   : > { %v1172_v23 = vpop.f32.mrf.mxu0  ;;  %v6908_v6 = vpop.f32.mrf.mxu1 }
 0x1ec   : > { %v6910_v27 = vadd.f32 %v1365_v52, %v1172_v23  ;;  %v3111_v52 = vld [vmem:[#allocation10 + $0x168] sm:$0xff]  ;;  %v1687_v23 = vld [vmem:[%s5590_s24 + $0x10] sm:$0xff] }
 0x1ed   : > { %v1174_v2 = vpop.f32.mrf.mxu0  ;;  %v2183_v44 = vpop.f32.mrf.mxu1  ;;  %3215 = vmatpush2.msra.mxu0 %v3111_v52  ;;  %4057 = vmatpush2.msra.mxu1 %v3111_v52 }
 0x1ee   : > { %3216 = vmatprep.subr.mxu0 %v6837_v1  ;;  %4058 = vmatprep.subr.mxu1 %v6837_v1  ;;  %v3106_v44 = vld [vmem:[#allocation10 + $0x140] sm:$0xff] }
 0x1ef   : > { %v1177_v37 = vpop.f32.mrf.mxu0  ;;  %v6916_v58 = vpop.f32.mrf.mxu1  ;;  %3217 = vmatpush2.msra.mxu0 %v3110_v28  ;;  %4059 = vmatpush2.msra.mxu1 %v3110_v28 }
 0x1f0   : > { %v6918_v51 = vadd.f32 %v1370_v10, %v1177_v37  ;;  %3218 = vmatprep.subr.mxu0 %v6837_v1  ;;  %4060 = vmatprep.subr.mxu1 %v6837_v1 }
 0x1f1   : > { %v1179_v57 = vpop.f32.mrf.mxu0  ;;  %v2188_v32 = vpop.f32.mrf.mxu1  ;;  %3219 = vmatpush2.msra.mxu0 %v3109_v42  ;;  %4061 = vmatpush2.msra.mxu1 %v3109_v42 }
 0x1f2   : > { %3220 = vmatprep.subr.mxu0 %v6837_v1  ;;  %4062 = vmatprep.subr.mxu1 %v6837_v1 }
 0x1f3   : > { %v1546_v4 = vpop.f32.mrf.mxu0  ;;  %v6931_v35 = vpop.f32.mrf.mxu1  ;;  %3221 = vmatpush2.msra.mxu0 %v3108_v29  ;;  %4063 = vmatpush2.msra.mxu1 %v3108_v29 }
 0x1f4   : > { %v1625_v46 = vadd.f32 %v1546_v4, %v1296_v30  ;;  %3222 = vmatprep.subr.mxu0 %v6837_v1  ;;  %4064 = vmatprep.subr.mxu1 %v6837_v1 }
 0x1f5   : > { %v1548_v60 = vpop.f32.mrf.mxu0  ;;  %v2193_v26 = vpop.f32.mrf.mxu1  ;;  %3223 = vmatpush2.msra.mxu0 %v3107_v47  ;;  %4065 = vmatpush2.msra.mxu1 %v3107_v47 }
 0x1f6   : > { %v1647_v41 = vmul.f32 %v6929_v53, %v1625_v46  ;;  %3224 = vmatprep.subr.mxu0 %v6837_v1  ;;  %4066 = vmatprep.subr.mxu1 %v6837_v1 }
 0x1f7   : > { %v1551_v38 = vpop.f32.mrf.mxu0  ;;  %v6945_v40 = vpop.f32.mrf.mxu1  ;;  %3225 = vmatpush2.msra.mxu0 %v3106_v44  ;;  %4067 = vmatpush2.msra.mxu1 %v3106_v44  ;;  %v1690_v44 = vld [vmem:[%s5590_s24 + $0x28] sm:$0xff] }
 0x1f8   : > { %v1669_v24 = vadd.f32 %v6938_v11, %v1647_v41  ;;  %v1626_v56 = vadd.f32 %v1551_v38, %v1301_v31  ;;  %3606 = vmatprep.subr.mxu0 %v6837_v1  ;;  %4447 = vmatprep.subr.mxu1 %v6837_v1  ;;  %v1688_v41 = vld [vmem:[%s5590_s24 + $0x18] sm:$0xff] }
 0x1f9   : > { %v1553_v45 = vpop.f32.mrf.mxu0  ;;  %v2198_v10 = vpop.f32.mrf.mxu1 }
 0x1fa   : > { %v1648_v14 = vmul.f32 %v6929_v53, %v1626_v56  ;;  %v1701_v20 = vadd.f32 %v1685_v63, %v1669_v24 }
 0x1fb   : > { %v1556_v21 = vpop.f32.mrf.mxu0 }
 0x1fc   : > { %v1670_v49 = vadd.f32 %v6938_v11, %v1648_v14  ;;  %v1627_v25 = vadd.f32 %v1556_v21, %v1306_v17  ;;  %v6958_v7 = vpop.f32.mrf.mxu1  ;;  %v6960_v39 = vmax.f32 %v1701_v20, 0.0  ;;  %v1689_v14 = vld [vmem:[%s5590_s24 + $0x20] sm:$0xff] }
 0x1fd   : > { %v1558_v33 = vpop.f32.mrf.mxu0 }
 0x1fe   : > { %v1649_v59 = vmul.f32 %v6929_v53, %v1627_v25  ;;  %v2203_v16 = vpop.f32.mrf.mxu1  ;;  %1847 = vrot.lane.b32.xlu0 %v6960_v39, %s5348_s11  ;;  %v1702_v9 = vadd.f32 %v1686_v13, %v1670_v49  ;;  %v1799_v15 = vrot.slane %v6960_v39, 1  ;;  %v1750_v54 = vrot.slane %v6960_v39, 7 }
 0x200   : > { %v1671_v36 = vadd.f32 %v6938_v11, %v1649_v59  ;;  %v1718_v2 = vmax.f32 %v1702_v9, 0.0 }
 0x201   : > { %v1561_v37 = vpop.f32.mrf.mxu0  ;;  %v6973_v12 = vpop.f32.mrf.mxu1 }
 0x202   : > { %v1628_v57 = vadd.f32 %v1561_v37, %v6858_v61  ;;  %1849 = vrot.lane.b32.xlu1 %v1718_v2, %s5348_s11  ;;  %v1800_v32 = vrot.slane %v1718_v2, 1  ;;  %v1703_v30 = vadd.f32 %v1687_v23, %v1671_v36  ;;  %v1751_v48 = vrot.slane %v1718_v2, 7 }
 0x203   : > { %v1563_v4 = vpop.f32.mrf.mxu0  ;;  %v2208_v46 = vpop.f32.mrf.mxu1 }
 0x204   : > { %v1650_v60 = vmul.f32 %v6929_v53, %v1628_v57  ;;  %v1801_v26 = vsel %vm1798_vm3, %v1799_v15, %v1800_v32  ;;  %v1839_v61 = vsel %vm1798_vm3, %v1800_v32, 0.0  ;;  %v6983_v31 = vmax.f32 %v1703_v30, 0.0 }
 0x205   : > { %1913 = vst.msk [vmem:[#allocation3 + $0x28] sm:$0xff] %vm394_vm0, %v1801_v26  ;;  %1915 = vst.msk [vmem:[#allocation3 + $0x38] sm:$0xff] %vm394_vm0, %v1839_v61  ;;  %v6992_v52 = vsel %vm1749_vm4, %v1750_v54, %v1751_v48  ;;  %v1691_v26 = vld [vmem:[%s5590_s24 + $0x30] sm:$0xff] }
 0x206   : > { %v1672_v38 = vadd.f32 %v6938_v11, %v1650_v60  ;;  %v1566_v63 = vpop.f32.mrf.mxu0  ;;  %1851 = vrot.lane.b32.xlu0 %v6983_v31, %s5348_s11  ;;  %v1802_v42 = vrot.slane %v6983_v31, 1  ;;  %v1753_v25 = vrot.slane %v6983_v31, 7 }
 0x207   : > { %v1629_v24 = vadd.f32 %v1566_v63, %v6860_v8  ;;  %v6998_v56 = vpop.f32.mrf.mxu1 }
 0x208   : > { %v1568_v1 = vpop.f32.mrf.mxu0  ;;  %v1704_v28 = vadd.f32 %v1688_v41, %v1672_v38 }
 0x209   : > { %v1651_v45 = vmul.f32 %v6929_v53, %v1629_v24  ;;  %v2213_v10 = vpop.f32.mrf.mxu1 }
 0x20a   : > { %v1720_v17 = vmax.f32 %v1704_v28, 0.0 }
 0x20b   : > { %v1673_v20 = vadd.f32 %v6938_v11, %v1651_v45 }
 0x20c   : > { %v1571_v21 = vpop.f32.mrf.mxu0  ;;  %v7004_v13 = vpop.f32.mrf.mxu1  ;;  %v1803_v49 = vrot.slane %v1720_v17, 1  ;;  %1853 = vrot.lane.b32.xlu1 %v1720_v17, %s5348_s11  ;;  %v3058_v8 = vld [vmem:[#allocation3 + $0x28] sm:$0xff]  ;;  %v1754_v29 = vrot.slane %v1720_v17, 7 }
 0x20d   : > { %v1630_v33 = vadd.f32 %v1571_v21, %v6862_v19  ;;  %4949 = vmatprep.mubr.msk.f32.mxu0 %vm394_vm0, %v3058_v8  ;;  %4967 = vmatprep.mubr.msk.f32.mxu1 %vm394_vm0, %v3058_v8  ;;  %v1705_v59 = vadd.f32 %v1689_v14, %v1673_v20 }
 0x20e   : > { %v1573_v16 = vpop.f32.mrf.mxu0  ;;  %v2218_v9 = vpop.f32.mrf.mxu1  ;;  %v1804_v47 = vsel %vm1798_vm3, %v1802_v42, %v1803_v49  ;;  %v1840_v23 = vsel %vm1798_vm3, %v1803_v49, 0.0  ;;  %v7016_v36 = vsel %vm1749_vm4, %v1753_v25, %v1754_v29  ;;  %v1692_v49 = vld [vmem:[%s5590_s24 + $0x38] sm:$0xff] }
 0x20f   : > { %v1652_v2 = vmul.f32 %v6929_v53, %v1630_v33  ;;  %1917 = vst.msk [vmem:[#allocation3 + $0x48] sm:$0xff] %vm394_vm0, %v1804_v47  ;;  %1919 = vst.msk [vmem:[#allocation3 + $0x58] sm:$0xff] %vm394_vm0, %v1840_v23  ;;  %v7021_v19 = vmax.f32 %v1705_v59, 0.0 }
 0x211   : > { %v1674_v15 = vadd.f32 %v6938_v11, %v1652_v2  ;;  %v1576_v37 = vpop.f32.mrf.mxu0  ;;  %1855 = vrot.lane.b32.xlu0 %v7021_v19, %s5348_s11  ;;  %v1805_v41 = vrot.slane %v7021_v19, 1 }
 0x212   : > { %v1631_v57 = vadd.f32 %v1576_v37, %v6864_v34  ;;  %v7028_v32 = vpop.f32.mrf.mxu1  ;;  %v1756_v34 = vrot.slane %v7021_v19, 7  ;;  %v4948_v19 = vld [vmem:[%s5590_s24 + $0xf8] sm:$0xff] }
 0x213   : > { %v1578_v30 = vpop.f32.mrf.mxu0  ;;  %v1706_v48 = vadd.f32 %v1690_v44, %v1674_v15  ;;  %v1693_v44 = vld [vmem:[%s5590_s24 + $0x40] sm:$0xff] }
 0x214   : > { %v1653_v4 = vmul.f32 %v6929_v53, %v1631_v57  ;;  %v2223_v46 = vpop.f32.mrf.mxu1 }
 0x215   : > { %v1722_v60 = vmax.f32 %v1706_v48, 0.0 }
 0x216   : > { %v1675_v61 = vadd.f32 %v6938_v11, %v1653_v4 }
 0x217   : > { %v1581_v38 = vpop.f32.mrf.mxu0  ;;  %v7034_v63 = vpop.f32.mrf.mxu1  ;;  %v1806_v24 = vrot.slane %v1722_v60, 1  ;;  %1857 = vrot.lane.b32.xlu1 %v1722_v60, %s5348_s11  ;;  %v1757_v1 = vrot.slane %v1722_v60, 7 }
 0x218   : > { %v1632_v28 = vadd.f32 %v1581_v38, %v6868_v43  ;;  %v1707_v45 = vadd.f32 %v1691_v26, %v1675_v61 }
 0x219   : > { %v1583_v10 = vpop.f32.mrf.mxu0  ;;  %v2228_v17 = vpop.f32.mrf.mxu1  ;;  %v1807_v14 = vsel %vm1798_vm3, %v1805_v41, %v1806_v24  ;;  %v1841_v20 = vsel %vm1798_vm3, %v1806_v24, 0.0  ;;  %v7044_v42 = vsel %vm1749_vm4, %v1756_v34, %v1757_v1 }
 0x21a   : > { %v1654_v21 = vmul.f32 %v6929_v53, %v1632_v28  ;;  %1921 = vst.msk [vmem:[#allocation3 + $0x68] sm:$0xff] %vm394_vm0, %v1807_v14  ;;  %1923 = vst.msk [vmem:[#allocation3 + $0x78] sm:$0xff] %vm394_vm0, %v1841_v20  ;;  %v7049_v43 = vmax.f32 %v1707_v45, 0.0  ;;  %v1694_v28 = vld [vmem:[%s5590_s24 + $0x48] sm:$0xff] }
 0x21c   : > { %v1676_v8 = vadd.f32 %v6938_v11, %v1654_v21  ;;  %v1586_v29 = vpop.f32.mrf.mxu0  ;;  %1859 = vrot.lane.b32.xlu0 %v7049_v43, %s5348_s11  ;;  %v1808_v37 = vrot.slane %v7049_v43, 1 }
 0x21d   : > { %v1633_v33 = vadd.f32 %v1586_v29, %v6872_v62  ;;  %v7056_v59 = vpop.f32.mrf.mxu1  ;;  %v1759_v62 = vrot.slane %v7049_v43, 7  ;;  %v7535_v43 = vld [vmem:[#allocation10 + $0x1a0] sm:$0xff] }
 0x21e   : > { %v1588_v16 = vpop.f32.mrf.mxu0  ;;  %v1708_v9 = vadd.f32 %v1692_v49, %v1676_v8 }
 0x21f   : > { %v1655_v47 = vmul.f32 %v6929_v53, %v1633_v33  ;;  %v2233_v23 = vpop.f32.mrf.mxu1  ;;  %v1695_v33 = vld [vmem:[%s5590_s24 + $0x50] sm:$0xff] }
 0x220   : > { %v1724_v2 = vmax.f32 %v1708_v9, 0.0 }
 0x221   : > { %v1677_v15 = vadd.f32 %v6938_v11, %v1655_v47 }
 0x222   : > { %v1591_v57 = vpop.f32.mrf.mxu0  ;;  %v7062_v30 = vpop.f32.mrf.mxu1  ;;  %v1809_v48 = vrot.slane %v1724_v2, 1  ;;  %1861 = vrot.lane.b32.xlu1 %v1724_v2, %s5348_s11  ;;  %v1760_v4 = vrot.slane %v1724_v2, 7 }
 0x223   : > { %v1634_v46 = vadd.f32 %v1591_v57, %v6878_v5  ;;  %v1709_v60 = vadd.f32 %v1693_v44, %v1677_v15 }
 0x224   : > { %v1593_v26 = vpop.f32.mrf.mxu0  ;;  %v2238_v61 = vpop.f32.mrf.mxu1  ;;  %v1810_v41 = vsel %vm1798_vm3, %v1808_v37, %v1809_v48  ;;  %v1842_v38 = vsel %vm1798_vm3, %v1809_v48, 0.0  ;;  %v7072_v24 = vsel %vm1749_vm4, %v1759_v62, %v1760_v4 }
 0x225   : > { %v1656_v1 = vmul.f32 %v6929_v53, %v1634_v46  ;;  %1925 = vst.msk [vmem:[#allocation3 + $0x88] sm:$0xff] %vm394_vm0, %v1810_v41  ;;  %1927 = vst.msk [vmem:[#allocation3 + $0x98] sm:$0xff] %vm394_vm0, %v1842_v38  ;;  %v7077_v5 = vmax.f32 %v1709_v60, 0.0  ;;  %v1696_v61 = vld [vmem:[%s5590_s24 + $0x58] sm:$0xff] }
 0x227   : > { %v1678_v45 = vadd.f32 %v6938_v11, %v1656_v1  ;;  %v1596_v10 = vpop.f32.mrf.mxu0  ;;  %1863 = vrot.lane.b32.xlu0 %v7077_v5, %s5348_s11  ;;  %v1811_v9 = vrot.slane %v7077_v5, 1 }
 0x228   : > { %v1635_v17 = vadd.f32 %v1596_v10, %v6882_v55  ;;  %v7084_v14 = vpop.f32.mrf.mxu1  ;;  %v1762_v55 = vrot.slane %v7077_v5, 7  ;;  %v7573_v5 = vld [vmem:[#allocation10 + $0x188] sm:$0xff] }
 0x229   : > { %v1598_v20 = vpop.f32.mrf.mxu0  ;;  %v1710_v21 = vadd.f32 %v1694_v28, %v1678_v45 }
 0x22a   : > { %v1657_v49 = vmul.f32 %v6929_v53, %v1635_v17  ;;  %v2243_v8 = vpop.f32.mrf.mxu1 }
 0x22b   : > { %v1726_v29 = vmax.f32 %v1710_v21, 0.0  ;;  %v1697_v8 = vld [vmem:[%s5590_s24 + $0x60] sm:$0xff] }
 0x22c   : > { %v1679_v16 = vadd.f32 %v6938_v11, %v1657_v49 }
 0x22d   : > { %v1601_v47 = vpop.f32.mrf.mxu0  ;;  %v7090_v23 = vpop.f32.mrf.mxu1  ;;  %v1812_v2 = vrot.slane %v1726_v29, 1  ;;  %1865 = vrot.lane.b32.xlu1 %v1726_v29, %s5348_s11  ;;  %v1763_v44 = vrot.slane %v1726_v29, 7 }
 0x22e   : > { %v1636_v15 = vadd.f32 %v1601_v47, %v6888_v0  ;;  %v1711_v37 = vadd.f32 %v1695_v33, %v1679_v16 }
 0x22f   : > { %v1603_v57 = vpop.f32.mrf.mxu0  ;;  %v2248_v48 = vpop.f32.mrf.mxu1  ;;  %v1813_v4 = vsel %vm1798_vm3, %v1811_v9, %v1812_v2  ;;  %v1843_v46 = vsel %vm1798_vm3, %v1812_v2, 0.0  ;;  %v7100_v60 = vsel %vm1749_vm4, %v1762_v55, %v1763_v44 }
 0x230   : > { %v1658_v26 = vmul.f32 %v6929_v53, %v1636_v15  ;;  %1929 = vst.msk [vmem:[#allocation3 + $0xa8] sm:$0xff] %vm394_vm0, %v1813_v4  ;;  %1931 = vst.msk [vmem:[#allocation3 + $0xb8] sm:$0xff] %vm394_vm0, %v1843_v46  ;;  %v7105_v0 = vmax.f32 %v1711_v37, 0.0  ;;  %v1698_v46 = vld [vmem:[%s5590_s24 + $0x68] sm:$0xff] }
 0x232   : > { %v1680_v41 = vadd.f32 %v6938_v11, %v1658_v26  ;;  %v1606_v38 = vpop.f32.mrf.mxu0  ;;  %1867 = vrot.lane.b32.xlu0 %v7105_v0, %s5348_s11  ;;  %v1814_v9 = vrot.slane %v7105_v0, 1  ;;  %v1765_v2 = vrot.slane %v7105_v0, 7  ;;  %v7615_v0 = vld [vmem:[#allocation10 + $0x228] sm:$0xff] }
 0x233   : > { %v1637_v1 = vadd.f32 %v1606_v38, %v6894_v22  ;;  %v7112_v28 = vpop.f32.mrf.mxu1  ;;  %8486 = vst [vmem:[#allocation20_spill] sm:$0xff] %v7615_v0 }
 0x234   : > { %v1608_v45 = vpop.f32.mrf.mxu0  ;;  %v1712_v10 = vadd.f32 %v1696_v61, %v1680_v41 }
 0x235   : > { %v1659_v17 = vmul.f32 %v6929_v53, %v1637_v1  ;;  %v2616_v20 = vpop.f32.mrf.mxu1 }
 0x236   : > { %v1611_v21 = vpop.f32.mrf.mxu0  ;;  %v1728_v49 = vmax.f32 %v1712_v10, 0.0 }
 0x237   : > { %v1681_v29 = vadd.f32 %v6938_v11, %v1659_v17  ;;  %v1638_v33 = vadd.f32 %v1611_v21, %v6902_v18  ;;  %v7118_v16 = vpop.f32.mrf.mxu1 }
 0x238   : > { %v1613_v22 = vpop.f32.mrf.mxu0  ;;  %v1815_v47 = vrot.slane %v1728_v49, 1  ;;  %1869 = vrot.lane.b32.xlu1 %v1728_v49, %s5348_s11  ;;  %v1766_v44 = vrot.slane %v1728_v49, 7  ;;  %v1699_v49 = vld [vmem:[%s5590_s24 + $0x70] sm:$0xff] }
 0x239   : > { %v1660_v15 = vmul.f32 %v6929_v53, %v1638_v33  ;;  %v2621_v37 = vpop.f32.mrf.mxu1  ;;  %v1713_v57 = vadd.f32 %v1697_v8, %v1681_v29 }
 0x23a   : > { %v1816_v48 = vsel %vm1798_vm3, %v1814_v9, %v1815_v47  ;;  %v1844_v4 = vsel %vm1798_vm3, %v1815_v47, 0.0  ;;  %v1616_v18 = vpop.f32.mrf.mxu0  ;;  %v7130_v26 = vsel %vm1749_vm4, %v1765_v2, %v1766_v44 }
 0x23b   : > { %v1682_v61 = vadd.f32 %v6938_v11, %v1660_v15  ;;  %1933 = vst.msk [vmem:[#allocation3 + $0xc8] sm:$0xff] %vm394_vm0, %v1816_v48  ;;  %1935 = vst.msk [vmem:[#allocation3 + $0xd8] sm:$0xff] %vm394_vm0, %v1844_v4  ;;  %v1639_v41 = vadd.f32 %v1616_v18, %v6910_v27  ;;  %v7136_v38 = vpop.f32.mrf.mxu1  ;;  %v7138_v1 = vmax.f32 %v1713_v57, 0.0  ;;  %v1700_v4 = vld [vmem:[%s5590_s24 + $0x78] sm:$0xff] }
 0x23c   : > { %v1618_v45 = vpop.f32.mrf.mxu0 }
 0x23d   : > { %v1661_v10 = vmul.f32 %v6929_v53, %v1639_v41  ;;  %v2626_v17 = vpop.f32.mrf.mxu1  ;;  %1871 = vrot.lane.b32.xlu0 %v7138_v1, %s5348_s11  ;;  %v1714_v20 = vadd.f32 %v1698_v46, %v1682_v61  ;;  %v1817_v9 = vrot.slane %v7138_v1, 1  ;;  %v8414_v18 = vrot.slane %v7138_v1, 7 }
 0x23e   : > { %v1621_v21 = vpop.f32.mrf.mxu0 }
 0x23f   : > { %v1683_v8 = vadd.f32 %v6938_v11, %v1661_v10  ;;  %v1640_v29 = vadd.f32 %v1621_v21, %v6918_v51  ;;  %v7146_v27 = vpop.f32.mrf.mxu1  ;;  %v1730_v33 = vmax.f32 %v1714_v20, 0.0 }
 0x240   : > { %v1623_v22 = vpop.f32.mrf.mxu0 }
 0x241   : > { %v1662_v47 = vmul.f32 %v6929_v53, %v1640_v29  ;;  %v2631_v44 = vpop.f32.mrf.mxu1  ;;  %v1818_v15 = vrot.slane %v1730_v33, 1  ;;  %1873 = vrot.lane.b32.xlu1 %v1730_v33, %s5348_s11  ;;  %v1715_v37 = vadd.f32 %v1699_v49, %v1683_v8  ;;  %v1769_v57 = vrot.slane %v1730_v33, 7 }
 0x242   : > { %v2364_v48 = vpop.f32.mrf.mxu0 }
 0x243   : > { %v1684_v51 = vadd.f32 %v6938_v11, %v1662_v47  ;;  %v1819_v46 = vsel %vm1798_vm3, %v1817_v9, %v1818_v15  ;;  %v1845_v61 = vsel %vm1798_vm3, %v1818_v15, 0.0  ;;  %v2365_v41 = vadd.f32 %v2364_v48, %v6892_v50  ;;  %v7157_v45 = vpop.f32.mrf.mxu1  ;;  %v4933_v48 = vld [vmem:[%s5590_s24 + $0x80] sm:$0xff] }
 0x244   : > { %1937 = vst.msk [vmem:[#allocation3 + $0xe8] sm:$0xff] %vm394_vm0, %v1819_v46  ;;  %1939 = vst.msk [vmem:[#allocation3 + $0xf8] sm:$0xff] %vm394_vm0, %v1845_v61  ;;  %v2366_v10 = vpop.f32.mrf.mxu0  ;;  %v7161_v17 = vmax.f32 %v1715_v37, 0.0  ;;  %v7166_v20 = vsel %vm1749_vm4, %v8414_v18, %v1769_v57  ;;  %v7628_v18 = vld [vmem:[#allocation10 + $0x220] sm:$0xff] }
 0x245   : > { %v2693_v21 = vadd.f32 %v7112_v28, %v2365_v41  ;;  %v2636_v49 = vpop.f32.mrf.mxu1  ;;  %v1716_v8 = vadd.f32 %v1700_v4, %v1684_v51  ;;  %8487 = vst [vmem:[#allocation25_spill] sm:$0xff] %v7628_v18 }
 0x246   : > { %1875 = vrot.lane.b32.xlu0 %v7161_v17, %s5348_s11  ;;  %v2369_v50 = vpop.f32.mrf.mxu0  ;;  %v1820_v47 = vrot.slane %v7161_v17, 1 }
 0x247   : > { %v2709_v29 = vmul.f32 %v6929_v53, %v2693_v21  ;;  %v2370_v33 = vadd.f32 %v2369_v50, %v6900_v3  ;;  %v7173_v9 = vpop.f32.mrf.mxu1  ;;  %v1732_v22 = vmax.f32 %v1716_v8, 0.0  ;;  %v8413_v3 = vrot.slane %v7161_v17, 7  ;;  %v4934_v8 = vld [vmem:[%s5590_s24 + $0x88] sm:$0xff] }
 0x248   : > { %v2371_v44 = vpop.f32.mrf.mxu0 }
 0x249   : > { %v2694_v15 = vadd.f32 %v7118_v16, %v2370_v33  ;;  %v2641_v28 = vpop.f32.mrf.mxu1  ;;  %v1821_v37 = vrot.slane %v1732_v22, 1  ;;  %1877 = vrot.lane.b32.xlu1 %v1732_v22, %s5348_s11  ;;  %v2725_v57 = vadd.f32 %v6938_v11, %v2709_v29  ;;  %v1772_v4 = vrot.slane %v1732_v22, 7 }
 0x24a   : > { %v2374_v51 = vpop.f32.mrf.mxu0 }
 0x24b   : > { %v2710_v46 = vmul.f32 %v6929_v53, %v2694_v15  ;;  %v1822_v61 = vsel %vm1798_vm3, %v1820_v47, %v1821_v37  ;;  %v1846_v41 = vsel %vm1798_vm3, %v1821_v37, 0.0  ;;  %v2375_v16 = vadd.f32 %v2374_v51, %v6908_v6  ;;  %v7185_v10 = vpop.f32.mrf.mxu1 }
 0x24c   : > { %1941 = vst.msk [vmem:[#allocation3 + $0x108] sm:$0xff] %vm394_vm0, %v1822_v61  ;;  %1943 = vst.msk [vmem:[#allocation3 + $0x118] sm:$0xff] %vm394_vm0, %v1846_v41  ;;  %v2376_v21 = vpop.f32.mrf.mxu0  ;;  %v2758_v49 = vadd.f32 %v4933_v48, %v2725_v57  ;;  %v7193_v50 = vsel %vm1749_vm4, %v8413_v3, %v1772_v4  ;;  %v4935_v48 = vld [vmem:[%s5590_s24 + $0x90] sm:$0xff] }
 0x24d   : > { %v2695_v29 = vadd.f32 %v7136_v38, %v2375_v16  ;;  %v2646_v33 = vpop.f32.mrf.mxu1  ;;  %v2726_v6 = vadd.f32 %v6938_v11, %v2710_v46  ;;  %v7608_v3 = vld [vmem:[#allocation10 + $0x230] sm:$0xff] }
 0x24e   : > { %v2379_v22 = vpop.f32.mrf.mxu0  ;;  %v7197_v47 = vmax.f32 %v2758_v49, 0.0  ;;  %8485 = vst [vmem:[#allocation24_spill] sm:$0xff] %v7608_v3 }
 0x24f   : > { %v2711_v44 = vmul.f32 %v6929_v53, %v2695_v29  ;;  %v2380_v15 = vadd.f32 %v2379_v22, %v6916_v58  ;;  %v7201_v28 = vpop.f32.mrf.mxu1  ;;  %v2759_v37 = vadd.f32 %v4934_v8, %v2726_v6 }
 0x250   : > { %2902 = vrot.lane.b32.xlu0 %v7197_v47, %s5348_s11  ;;  %v2381_v57 = vpop.f32.mrf.mxu0  ;;  %v2854_v61 = vrot.slane %v7197_v47, 1 }
 0x251   : > { %v2696_v38 = vadd.f32 %v7146_v27, %v2380_v15  ;;  %v2651_v4 = vpop.f32.mrf.mxu1  ;;  %v2775_v51 = vmax.f32 %v2759_v37, 0.0  ;;  %v2727_v46 = vadd.f32 %v6938_v11, %v2711_v44  ;;  %v8412_v27 = vrot.slane %v7197_v47, 7 }
 0x252   : > { %v2384_v41 = vpop.f32.mrf.mxu0 }
 0x253   : > { %v2712_v58 = vmul.f32 %v6929_v53, %v2696_v38  ;;  %v2385_v16 = vadd.f32 %v2384_v41, %v6931_v35  ;;  %v7211_v21 = vpop.f32.mrf.mxu1  ;;  %v2855_v49 = vrot.slane %v2775_v51, 1  ;;  %2904 = vrot.lane.b32.xlu1 %v2775_v51, %s5348_s11  ;;  %v2760_v8 = vadd.f32 %v4935_v48, %v2727_v46  ;;  %v4936_v35 = vld [vmem:[%s5590_s24 + $0x98] sm:$0xff]  ;;  %v4937_v41 = vld [vmem:[%s5590_s24 + $0xa0] sm:$0xff] }
 0x254   : > { %v2386_v29 = vpop.f32.mrf.mxu0  ;;  %v2807_v33 = vrot.slane %v2775_v51, 7 }
 0x255   : > { %v2697_v6 = vadd.f32 %v7157_v45, %v2385_v16  ;;  %v2856_v22 = vsel %vm1798_vm3, %v2854_v61, %v2855_v49  ;;  %v2894_v44 = vsel %vm1798_vm3, %v2855_v49, 0.0  ;;  %v2656_v15 = vpop.f32.mrf.mxu1  ;;  %v7218_v37 = vmax.f32 %v2760_v8, 0.0 }
 0x256   : > { %2968 = vst.msk [vmem:[#allocation3 + $0x128] sm:$0xff] %vm394_vm0, %v2856_v22  ;;  %2970 = vst.msk [vmem:[#allocation3 + $0x138] sm:$0xff] %vm394_vm0, %v2894_v44  ;;  %v2389_v57 = vpop.f32.mrf.mxu0  ;;  %v2728_v48 = vadd.f32 %v6938_v11, %v2712_v58  ;;  %v7227_v45 = vsel %vm1749_vm4, %v8412_v27, %v2807_v33  ;;  %v7606_v27 = vld [vmem:[#allocation3 + $0xd8] sm:$0xff] }
 0x257   : > { %v2713_v38 = vmul.f32 %v6929_v53, %v2697_v6  ;;  %v2390_v4 = vadd.f32 %v2389_v57, %v6945_v40  ;;  %v7231_v51 = vpop.f32.mrf.mxu1  ;;  %2906 = vrot.lane.b32.xlu0 %v7218_v37, %s5348_s11  ;;  %v2857_v44 = vrot.slane %v7218_v37, 1  ;;  %v4938_v57 = vld [vmem:[%s5590_s24 + $0xa8] sm:$0xff] }
 0x258   : > { %v2391_v46 = vpop.f32.mrf.mxu0  ;;  %v2761_v61 = vadd.f32 %v4936_v35, %v2728_v48 }
 0x259   : > { %v2698_v58 = vadd.f32 %v7173_v9, %v2390_v4  ;;  %v2661_v16 = vpop.f32.mrf.mxu1  ;;  %v2729_v49 = vadd.f32 %v6938_v11, %v2713_v38  ;;  %v8411_v9 = vrot.slane %v7218_v37, 7 }
 0x25a   : > { %v2394_v8 = vpop.f32.mrf.mxu0  ;;  %v2777_v29 = vmax.f32 %v2761_v61, 0.0 }
 0x25b   : > { %v2714_v33 = vmul.f32 %v6929_v53, %v2698_v58  ;;  %v2395_v40 = vadd.f32 %v2394_v8, %v6958_v7  ;;  %v7240_v6 = vpop.f32.mrf.mxu1  ;;  %v2762_v22 = vadd.f32 %v4937_v41, %v2729_v49 }
 0x25c   : > { %v2858_v15 = vrot.slane %v2777_v29, 1  ;;  %2908 = vrot.lane.b32.xlu1 %v2777_v29, %s5348_s11  ;;  %v2396_v35 = vpop.f32.mrf.mxu0  ;;  %v2810_v48 = vrot.slane %v2777_v29, 7 }
 0x25d   : > { %v2699_v38 = vadd.f32 %v7185_v10, %v2395_v40  ;;  %v2666_v4 = vpop.f32.mrf.mxu1  ;;  %v7247_v46 = vmax.f32 %v2762_v22, 0.0  ;;  %v2730_v7 = vadd.f32 %v6938_v11, %v2714_v33  ;;  %v4939_v40 = vld [vmem:[%s5590_s24 + $0xb0] sm:$0xff] }
 0x25e   : > { %v2859_v61 = vsel %vm1798_vm3, %v2857_v44, %v2858_v15  ;;  %v2895_v41 = vsel %vm1798_vm3, %v2858_v15, 0.0  ;;  %v2399_v58 = vpop.f32.mrf.mxu0  ;;  %v7255_v16 = vsel %vm1749_vm4, %v8411_v9, %v2810_v48 }
 0x25f   : > { %v2715_v49 = vmul.f32 %v6929_v53, %v2699_v38  ;;  %2972 = vst.msk [vmem:[#allocation3 + $0x148] sm:$0xff] %vm394_vm0, %v2859_v61  ;;  %2974 = vst.msk [vmem:[#allocation3 + $0x158] sm:$0xff] %vm394_vm0, %v2895_v41  ;;  %v2400_v10 = vadd.f32 %v2399_v58, %v6973_v12  ;;  %v7261_v8 = vpop.f32.mrf.mxu1  ;;  %2910 = vrot.lane.b32.xlu0 %v7247_v46, %s5348_s11  ;;  %v2763_v29 = vadd.f32 %v4938_v57, %v2730_v7 }
 0x260   : > { %v2401_v33 = vpop.f32.mrf.mxu0  ;;  %v2860_v48 = vrot.slane %v7247_v46, 1 }
 0x261   : > { %v2700_v22 = vadd.f32 %v7201_v28, %v2400_v10  ;;  %v2671_v44 = vpop.f32.mrf.mxu1  ;;  %v2779_v15 = vmax.f32 %v2763_v29, 0.0  ;;  %v2731_v35 = vadd.f32 %v6938_v11, %v2715_v49  ;;  %v8410_v28 = vrot.slane %v7247_v46, 7 }
 0x262   : > { %v2404_v38 = vpop.f32.mrf.mxu0 }
 0x263   : > { %v2716_v12 = vmul.f32 %v6929_v53, %v2700_v22  ;;  %v2405_v4 = vadd.f32 %v2404_v38, %v6998_v56  ;;  %v2861_v61 = vrot.slane %v2779_v15, 1  ;;  %2912 = vrot.lane.b32.xlu1 %v2779_v15, %s5348_s11  ;;  %v2764_v57 = vadd.f32 %v4939_v40, %v2731_v35  ;;  %v7272_v7 = vpop.f32.mrf.mxu1  ;;  %v4940_v56 = vld [vmem:[%s5590_s24 + $0xb8] sm:$0xff] }
 0x264   : > { %v2406_v41 = vpop.f32.mrf.mxu0  ;;  %v2813_v58 = vrot.slane %v2779_v15, 7 }
 0x265   : > { %v2701_v49 = vadd.f32 %v7211_v21, %v2405_v4  ;;  %v2862_v10 = vsel %vm1798_vm3, %v2860_v48, %v2861_v61  ;;  %v2896_v29 = vsel %vm1798_vm3, %v2861_v61, 0.0  ;;  %v7278_v33 = vmax.f32 %v2764_v57, 0.0  ;;  %v2676_v22 = vpop.f32.mrf.mxu1  ;;  %v4941_v61 = vld [vmem:[%s5590_s24 + $0xc0] sm:$0xff] }
 0x266   : > { %2976 = vst.msk [vmem:[#allocation3 + $0x168] sm:$0xff] %vm394_vm0, %v2862_v10  ;;  %2978 = vst.msk [vmem:[#allocation3 + $0x178] sm:$0xff] %vm394_vm0, %v2896_v29  ;;  %v2409_v40 = vpop.f32.mrf.mxu0  ;;  %v2732_v44 = vadd.f32 %v6938_v11, %v2716_v12  ;;  %v7287_v21 = vsel %vm1749_vm4, %v8410_v28, %v2813_v58  ;;  %v7593_v28 = vld [vmem:[#allocation10 + $0x238] sm:$0xff] }
 0x267   : > { %v2717_v15 = vmul.f32 %v6929_v53, %v2701_v49  ;;  %v2410_v35 = vadd.f32 %v2409_v40, %v7004_v13  ;;  %2914 = vrot.lane.b32.xlu0 %v7278_v33, %s5348_s11  ;;  %v7293_v48 = vpop.f32.mrf.mxu1  ;;  %v2863_v40 = vrot.slane %v7278_v33, 1  ;;  %8484 = vst [vmem:[#allocation27_spill] sm:$0xff] %v7593_v28 }
 0x268   : > { %v2411_v38 = vpop.f32.mrf.mxu0  ;;  %v2765_v4 = vadd.f32 %v4940_v56, %v2732_v44  ;;  %v4942_v44 = vld [vmem:[%s5590_s24 + $0xc8] sm:$0xff] }
 0x269   : > { %v2702_v12 = vadd.f32 %v7231_v51, %v2410_v35  ;;  %v2733_v57 = vadd.f32 %v6938_v11, %v2717_v15  ;;  %v2681_v41 = vpop.f32.mrf.mxu1  ;;  %v8409_v51 = vrot.slane %v7278_v33, 7 }
 0x26a   : > { %v2414_v58 = vpop.f32.mrf.mxu0  ;;  %v2781_v10 = vmax.f32 %v2765_v4, 0.0 }
 0x26b   : > { %v2718_v49 = vmul.f32 %v6929_v53, %v2702_v12  ;;  %v2415_v13 = vadd.f32 %v2414_v58, %v7028_v32  ;;  %v2766_v29 = vadd.f32 %v4941_v61, %v2733_v57  ;;  %v7300_v22 = vpop.f32.mrf.mxu1 }
 0x26c   : > { %v2864_v38 = vrot.slane %v2781_v10, 1  ;;  %2916 = vrot.lane.b32.xlu1 %v2781_v10, %s5348_s11  ;;  %v2416_v56 = vpop.f32.mrf.mxu0  ;;  %v2816_v15 = vrot.slane %v2781_v10, 7 }
 0x26d   : > { %v2703_v35 = vadd.f32 %v7240_v6, %v2415_v13  ;;  %v7307_v4 = vmax.f32 %v2766_v29, 0.0  ;;  %v2734_v32 = vadd.f32 %v6938_v11, %v2718_v49  ;;  %v2686_v61 = vpop.f32.mrf.mxu1  ;;  %v1790_v56 = vsel %vm1749_vm4, 0.0, %v1750_v54 }
 0x26e   : > { %v2865_v12 = vsel %vm1798_vm3, %v2863_v40, %v2864_v38  ;;  %v2897_v57 = vsel %vm1798_vm3, %v2864_v38, 0.0  ;;  %v2419_v41 = vpop.f32.mrf.mxu0  ;;  %v7315_v58 = vsel %vm1749_vm4, %v8409_v51, %v2816_v15  ;;  %v4943_v40 = vld [vmem:[%s5590_s24 + $0xd0] sm:$0xff]  ;;  %v7329_v15 = vld [vmem:[#allocation10 + $0x1f8] sm:$0xff]  ;;  %v7587_v51 = vld [vmem:[#allocation3 + $0xc8] sm:$0xff] }
 0x26f   : > { %v2719_v10 = vmul.f32 %v6929_v53, %v2703_v35  ;;  %2980 = vst.msk [vmem:[#allocation3 + $0x188] sm:$0xff] %vm394_vm0, %v2865_v12  ;;  %2982 = vst.msk [vmem:[#allocation3 + $0x198] sm:$0xff] %vm394_vm0, %v2897_v57  ;;  %v2420_v6 = vadd.f32 %v2419_v41, %v7034_v63  ;;  %2918 = vrot.lane.b32.xlu0 %v7307_v4, %s5348_s11  ;;  %v2767_v49 = vadd.f32 %v4942_v44, %v2734_v32  ;;  %v7323_v13 = vpop.f32.mrf.mxu1 }
 0x270   : > { %v2421_v29 = vpop.f32.mrf.mxu0  ;;  %v1848_v38 = vpop.permute.xlu0 %1847  ;;  %v2866_v44 = vrot.slane %v7307_v4, 1 }
 0x271   : > { %v2704_v35 = vadd.f32 %v7261_v8, %v2420_v6  ;;  %v2783_v61 = vmax.f32 %v2767_v49, 0.0  ;;  %v2735_v63 = vadd.f32 %v6938_v11, %v2719_v10  ;;  %v1895_v12 = vsel %vm394_vm0, %v1790_v56, %v1848_v38  ;;  %v2691_v57 = vpop.f32.mrf.mxu1  ;;  %v3060_v10 = vld [vmem:[#allocation3 + $0x38] sm:$0xff]  ;;  %v7339_v6 = vld [vmem:[#allocation10 + $0x1f0] sm:$0xff] }
 0x272   : > { %v2424_v32 = vpop.f32.mrf.mxu0  ;;  %3227 = vmatmul.mubr.f32.vlgmr.msra.gmra.mxu0 %v1895_v12  ;;  %3430 = vmatmul.mubr.f32.gmra.mxu1 %v1895_v12  ;;  %v8405_v38 = vrot.slane %v7307_v4, 7  ;;  %v4944_v12 = vld [vmem:[%s5590_s24 + $0xd8] sm:$0xff]  ;;  %v7350_v57 = vld [vmem:[#allocation2] sm:$0xff] }
 0x273   : > { %v2720_v41 = vmul.f32 %v6929_v53, %v2704_v35  ;;  %v2425_v39 = vadd.f32 %v2424_v32, %v7056_v59  ;;  %v2867_v54 = vrot.slane %v2783_v61, 1  ;;  %2920 = vrot.lane.b32.xlu1 %v2783_v61, %s5348_s11  ;;  %v2768_v8 = vadd.f32 %v4943_v40, %v2735_v63  ;;  %3607 = vmatpush1.msra.mxu0 %v7329_v15 }
 0x274   : > { %v2426_v49 = vpop.f32.mrf.mxu0  ;;  %v1850_v29 = vpop.permute.xlu1 %1849  ;;  %4950 = vmatprep.mubr.msk.f32.mxu0 %vm394_vm0, %v3060_v10  ;;  %4968 = vmatprep.mubr.msk.f32.mxu1 %vm394_vm0, %v3060_v10  ;;  %v2819_v56 = vrot.slane %v2783_v61, 7 }
 0x275   : > { %v2705_v59 = vadd.f32 %v7272_v7, %v2425_v39  ;;  %v2868_v35 = vsel %vm1798_vm3, %v2866_v44, %v2867_v54  ;;  %v2898_v40 = vsel %vm1798_vm3, %v2867_v54, 0.0  ;;  %v7347_v63 = vmax.f32 %v2768_v8, 0.0  ;;  %3608 = vmatprep.subr.mxu0 %v7350_v57  ;;  %v7368_v8 = vld [vmem:[#allocation3 + $0x48] sm:$0xff]  ;;  %v4945_v49 = vld [vmem:[%s5590_s24 + $0xe0] sm:$0xff] }
 0x276   : > { %2984 = vst.msk [vmem:[#allocation3 + $0x1a8] sm:$0xff] %vm394_vm0, %v2868_v35  ;;  %2986 = vst.msk [vmem:[#allocation3 + $0x1b8] sm:$0xff] %vm394_vm0, %v2898_v40  ;;  %v2429_v32 = vpop.f32.mrf.mxu0  ;;  %v2736_v61 = vadd.f32 %v6938_v11, %v2720_v41  ;;  %v1896_v7 = vsel %vm394_vm0, %v6992_v52, %v1850_v29  ;;  %3609 = vmatpush1.msra.mxu0 %v7339_v6  ;;  %v7362_v44 = vsel %vm1749_vm4, %v8405_v38, %v2819_v56  ;;  %v7370_v41 = vld [vmem:[#allocation10 + $0x1e8] sm:$0xff]  ;;  %v7387_v35 = vld [vmem:[#allocation10 + $0x1e0] sm:$0xff] }
 0x277   : > { %v2721_v39 = vmul.f32 %v6929_v53, %v2705_v59  ;;  %v2430_v54 = vadd.f32 %v2429_v32, %v7062_v30  ;;  %2922 = vrot.lane.b32.xlu0 %v7347_v63, %s5348_s11  ;;  %3232 = vmatmul.mubr.f32.gmra.mxu0 %v1896_v7  ;;  %v1791_v29 = vsel %vm1749_vm4, 0.0, %v1753_v25  ;;  %v4946_v32 = vld [vmem:[%s5590_s24 + $0xe8] sm:$0xff] }
 0x278   : > { %v2431_v52 = vpop.f32.mrf.mxu0  ;;  %v2769_v10 = vadd.f32 %v4944_v12, %v2736_v61  ;;  %v1852_v56 = vpop.permute.xlu0 %1851  ;;  %3435 = vmatmul.mubr.f32.gmra.mxu1 %v1896_v7  ;;  %4951 = vmatprep.mubr.msk.f32.mxu0 %vm394_vm0, %v7368_v8  ;;  %v2869_v61 = vrot.slane %v7347_v63, 1 }
 0x279   : > { %v2737_v53 = vadd.f32 %v6938_v11, %v2721_v39  ;;  %v2706_v30 = vadd.f32 %v7293_v48, %v2430_v54  ;;  %v7381_v59 = vsel %vm394_vm0, %v1791_v29, %v1852_v56  ;;  %4969 = vmatprep.mubr.msk.f32.mxu1 %vm394_vm0, %v7368_v8  ;;  %3610 = vmatprep.subr.mxu0 %v7350_v57  ;;  %v5152_v11 = vld [vmem:[%s8364_s4] ss:$0 sm:$0xff]  ;;  %v7399_v54 = vld [vmem:[#allocation3 + $0x58] sm:$0xff] }
 0x27a   : > { %v2434_v31 = vpop.f32.mrf.mxu0  ;;  %v2785_v25 = vmax.f32 %v2769_v10, 0.0  ;;  %3611 = vmatpush1.msra.mxu0 %v7370_v41  ;;  %v7401_v52 = vld [vmem:[#allocation10 + $0x1d8] sm:$0xff] }
 0x27b   : > { %v2722_v40 = vmul.f32 %v5152_v11, %v2706_v30  ;;  %v2435_v48 = vadd.f32 %v2434_v31, %v7084_v14  ;;  %v2770_v12 = vadd.f32 %v4945_v49, %v2737_v53  ;;  %3612 = vmatprep.subr.mxu0 %v7350_v57  ;;  %3237 = vmatmul.mubr.f32.gmra.mxu0 %v7381_v59  ;;  %v8408_v14 = vrot.slane %v7347_v63, 7  ;;  %v5153_v49 = vld [vmem:[%s8365_s5] ss:$0 sm:$0xff] }
 0x27c   : > { %v2870_v7 = vrot.slane %v2785_v25, 1  ;;  %2924 = vrot.lane.b32.xlu1 %v2785_v25, %s5348_s11  ;;  %v2436_v39 = vpop.f32.mrf.mxu0  ;;  %3440 = vmatmul.mubr.f32.gmra.mxu1 %v7381_v59  ;;  %v2822_v10 = vrot.slane %v2785_v25, 7 }
 0x27d   : > { %v2738_v29 = vadd.f32 %v5153_v49, %v2722_v40  ;;  %v2707_v56 = vadd.f32 %v7300_v22, %v2435_v48  ;;  %v7408_v53 = vmax.f32 %v2770_v12, 0.0  ;;  %3613 = vmatpush1.msra.mxu0 %v7387_v35  ;;  %4952 = vmatprep.mubr.msk.f32.mxu0 %vm394_vm0, %v7399_v54 }
 0x27e   : > { %v2871_v30 = vsel %vm1798_vm3, %v2869_v61, %v2870_v7  ;;  %v2899_v31 = vsel %vm1798_vm3, %v2870_v7, 0.0  ;;  %v2439_v25 = vpop.f32.mrf.mxu0  ;;  %v1854_v39 = vpop.permute.xlu1 %1853  ;;  %4970 = vmatprep.mubr.msk.f32.mxu1 %vm394_vm0, %v7399_v54  ;;  %3614 = vmatprep.subr.mxu0 %v7350_v57  ;;  %v7421_v22 = vsel %vm1749_vm4, %v8408_v14, %v2822_v10  ;;  %v4947_v7 = vld [vmem:[%s5590_s24 + $0xf0] sm:$0xff]  ;;  %v7567_v14 = vld [vmem:[#allocation3 + $0xb8] sm:$0xff] }
 0x27f   : > { %v2723_v40 = vmul.f32 %v5152_v11, %v2707_v56  ;;  %2988 = vst.msk [vmem:[#allocation3 + $0x1c8] sm:$0xff] %vm394_vm0, %v2871_v30  ;;  %2990 = vst.msk [vmem:[#allocation3 + $0x1d8] sm:$0xff] %vm394_vm0, %v2899_v31  ;;  %v2440_v48 = vadd.f32 %v2439_v25, %v7090_v23  ;;  %2926 = vrot.lane.b32.xlu0 %v7408_v53, %s5348_s11  ;;  %v2771_v12 = vadd.f32 %v4946_v32, %v2738_v29  ;;  %v7435_v10 = vld [vmem:[#allocation10 + $0x1d0] sm:$0xff]  ;;  %v7440_v32 = vld [vmem:[#allocation3 + $0x68] sm:$0xff] }
 0x280   : > { %3615 = vmatpush1.msra.mxu0 %v7401_v52  ;;  %v2441_v61 = vpop.f32.mrf.mxu0  ;;  %v7432_v38 = vsel %vm394_vm0, %v7016_v36, %v1854_v39  ;;  %v2872_v29 = vrot.slane %v7408_v53, 1  ;;  %v1792_v36 = vsel %vm1749_vm4, 0.0, %v1756_v34 }
 0x281   : > { %3616 = vmatprep.subr.mxu0 %v7350_v57  ;;  %v2739_v56 = vadd.f32 %v5153_v49, %v2723_v40  ;;  %v2708_v30 = vadd.f32 %v7323_v13, %v2440_v48  ;;  %v2787_v23 = vmax.f32 %v2771_v12, 0.0  ;;  %3242 = vmatmul.mubr.f32.gmra.mxu0 %v7432_v38  ;;  %v7452_v40 = vld [vmem:[#allocation10 + $0x1c8] sm:$0xff]  ;;  %v8407_v12 = vrot.slane %v7408_v53, 7 }
 0x282   : > { %3445 = vmatmul.mubr.f32.gmra.mxu1 %v7432_v38  ;;  %4953 = vmatprep.mubr.msk.f32.mxu0 %vm394_vm0, %v7440_v32 }
 0x283   : > { %4971 = vmatprep.mubr.msk.f32.mxu1 %vm394_vm0, %v7440_v32  ;;  %v2724_v13 = vmul.f32 %v5152_v11, %v2708_v30  ;;  %v2873_v31 = vrot.slane %v2787_v23, 1  ;;  %2928 = vrot.lane.b32.xlu1 %v2787_v23, %s5348_s11  ;;  %v2772_v25 = vadd.f32 %v4947_v7, %v2739_v56  ;;  %v1856_v39 = vpop.permute.xlu0 %1855  ;;  %v2825_v48 = vrot.slane %v2787_v23, 7  ;;  %v7466_v56 = vld [vmem:[#allocation3 + $0x78] sm:$0xff] }
 0x284   : > { %3617 = vmatpush1.msra.mxu0 %v7435_v10  ;;  %v7456_v34 = vsel %vm394_vm0, %v1792_v36, %v1856_v39 }
 0x285   : > { %3618 = vmatprep.subr.mxu0 %v7350_v57  ;;  %v2740_v61 = vadd.f32 %v5153_v49, %v2724_v13  ;;  %v2874_v11 = vsel %vm1798_vm3, %v2872_v29, %v2873_v31  ;;  %v2900_v30 = vsel %vm1798_vm3, %v2873_v31, 0.0  ;;  %v7462_v7 = vmax.f32 %v2772_v25, 0.0  ;;  %3247 = vmatmul.mubr.f32.gmra.mxu0 %v7456_v34  ;;  %v7473_v49 = vld [vmem:[#allocation10 + $0x1c0] sm:$0xff]  ;;  %v7491_v25 = vld [vmem:[#allocation10 + $0x1b8] sm:$0xff] }
 0x286   : > { %3450 = vmatmul.mubr.f32.gmra.mxu1 %v7456_v34  ;;  %2992 = vst.msk [vmem:[#allocation3 + $0x1e8] sm:$0xff] %vm394_vm0, %v2874_v11  ;;  %2994 = vst.msk [vmem:[#allocation3 + $0x1f8] sm:$0xff] %vm394_vm0, %v2900_v30  ;;  %3619 = vmatpush1.msra.mxu0 %v7452_v40  ;;  %v7478_v23 = vsel %vm1749_vm4, %v8407_v12, %v2825_v48  ;;  %v7563_v12 = vld [vmem:[#allocation10 + $0x190] sm:$0xff] }
 0x287   : > { %8481 = vst [vmem:[#allocation22_spill] sm:$0xff] %v7462_v7  ;;  %4954 = vmatprep.mubr.msk.f32.mxu0 %vm394_vm0, %v7466_v56  ;;  %2930 = vrot.lane.b32.xlu0 %v7462_v7, %s5348_s11  ;;  %v2773_v29 = vadd.f32 %v4948_v19, %v2740_v61  ;;  %v2875_v39 = vrot.slane %v7462_v7, 1  ;;  %v7496_v19 = vld [vmem:[#allocation3 + $0x88] sm:$0xff]  ;;  %v8406_v61 = vrot.slane %v7462_v7, 7 }
 0x288   : > { %4972 = vmatprep.mubr.msk.f32.mxu1 %vm394_vm0, %v7466_v56  ;;  %3620 = vmatprep.subr.mxu0 %v7350_v57 }
 0x289   : > { %v2789_v36 = vmax.f32 %v2773_v29, 0.0  ;;  %v1858_v13 = vpop.permute.xlu1 %1857  ;;  %3621 = vmatpush1.msra.mxu0 %v7473_v49 }
 0x28a   : > { %v7488_v31 = vsel %vm394_vm0, %v7044_v42, %v1858_v13  ;;  %3622 = vmatprep.subr.mxu0 %v7350_v57  ;;  %v7502_v42 = vld [vmem:[#allocation10 + $0x1b0] sm:$0xff]  ;;  %v1793_v13 = vsel %vm1749_vm4, 0.0, %v1759_v62 }
 0x28b   : > { %v2876_v48 = vrot.slane %v2789_v36, 1  ;;  %2932 = vrot.lane.b32.xlu1 %v2789_v36, %s5348_s11  ;;  %3252 = vmatmul.mubr.f32.gmra.mxu0 %v7488_v31  ;;  %v2828_v11 = vrot.slane %v2789_v36, 7 }
 0x28c   : > { %3455 = vmatmul.mubr.f32.gmra.mxu1 %v7488_v31  ;;  %4955 = vmatprep.mubr.msk.f32.mxu0 %vm394_vm0, %v7496_v19 }
 0x28d   : > { %v2877_v30 = vsel %vm1798_vm3, %v2875_v39, %v2876_v48  ;;  %v2901_v29 = vsel %vm1798_vm3, %v2876_v48, 0.0  ;;  %4973 = vmatprep.mubr.msk.f32.mxu1 %vm394_vm0, %v7496_v19  ;;  %3623 = vmatpush1.msra.mxu0 %v7491_v25  ;;  %v7512_v36 = vsel %vm1749_vm4, %v8406_v61, %v2828_v11  ;;  %v7526_v11 = vld [vmem:[#allocation3 + $0x98] sm:$0xff] }
 0x28e   : > { %8482 = vst [vmem:[#allocation23_spill] sm:$0xff] %v7512_v36  ;;  %2996 = vst.msk [vmem:[#allocation3 + $0x208] sm:$0xff] %vm394_vm0, %v2877_v30  ;;  %v1860_v39 = vpop.permute.xlu0 %1859  ;;  %3624 = vmatprep.subr.mxu0 %v7350_v57  ;;  %v7528_v30 = vld [vmem:[#allocation10 + $0x1a8] sm:$0xff] }
 0x28f   : > { %2998 = vst.msk [vmem:[#allocation3 + $0x218] sm:$0xff] %vm394_vm0, %v2901_v29  ;;  %v7521_v48 = vsel %vm394_vm0, %v1793_v13, %v1860_v39  ;;  %3625 = vmatpush1.msra.mxu0 %v7502_v42  ;;  %v7546_v13 = vld [vmem:[#allocation3 + $0xa8] sm:$0xff]  ;;  %v7548_v39 = vld [vmem:[#allocation10 + $0x198] sm:$0xff] }
 0x290   : > { %3257 = vmatmul.mubr.f32.gmra.mxu0 %v7521_v48  ;;  %3460 = vmatmul.mubr.f32.gmra.mxu1 %v7521_v48 }
 0x291   : > { %4956 = vmatprep.mubr.msk.f32.mxu0 %vm394_vm0, %v7526_v11  ;;  %4974 = vmatprep.mubr.msk.f32.mxu1 %vm394_vm0, %v7526_v11 }
 0x292   : > { %3626 = vmatprep.subr.mxu0 %v7350_v57 }
 0x293   : > { %3627 = vmatpush1.msra.mxu0 %v7528_v30 }
 0x294   : > { %v1862_v62 = vpop.permute.xlu1 %1861  ;;  %3628 = vmatprep.subr.mxu0 %v7350_v57 }
 0x295   : > { %v7541_v29 = vsel %vm394_vm0, %v7072_v24, %v1862_v62  ;;  %3629 = vmatpush1.msra.mxu0 %v7535_v43  ;;  %v1794_v24 = vsel %vm1749_vm4, 0.0, %v1762_v55 }
 0x296   : > { %3262 = vmatmul.mubr.f32.gmra.mxu0 %v7541_v29  ;;  %3465 = vmatmul.mubr.f32.gmra.mxu1 %v7541_v29 }
 0x297   : > { %4957 = vmatprep.mubr.msk.f32.mxu0 %vm394_vm0, %v7546_v13  ;;  %4975 = vmatprep.mubr.msk.f32.mxu1 %vm394_vm0, %v7546_v13 }
 0x298   : > { %3630 = vmatprep.subr.mxu0 %v7350_v57 }
 0x299   : > { %v1864_v62 = vpop.permute.xlu0 %1863  ;;  %3631 = vmatpush1.msra.mxu0 %v7548_v39 }
 0x29a   : > { %v7560_v61 = vsel %vm394_vm0, %v1794_v24, %v1864_v62  ;;  %3632 = vmatprep.subr.mxu0 %v7350_v57  ;;  %v7583_v62 = vld [vmem:[#allocation10 + $0x180] sm:$0xff] }
 0x29b   : > { %3267 = vmatmul.mubr.f32.gmra.mxu0 %v7560_v61  ;;  %3470 = vmatmul.mubr.f32.gmra.mxu1 %v7560_v61  ;;  %8483 = vst [vmem:[#allocation26_spill] sm:$0xff] %v7583_v62 }
 0x29c   : > { %4958 = vmatprep.mubr.msk.f32.mxu0 %vm394_vm0, %v7567_v14  ;;  %4976 = vmatprep.mubr.msk.f32.mxu1 %vm394_vm0, %v7567_v14 }
 0x29d   : > { %3633 = vmatpush1.msra.mxu0 %v7563_v12 }
 0x29e   : > { %3634 = vmatprep.subr.mxu0 %v7350_v57 }
 0x29f   : > { %v1866_v55 = vpop.permute.xlu1 %1865  ;;  %3635 = vmatpush1.msra.mxu0 %v7573_v5 }
 0x2a0   : > { %v7580_v24 = vsel %vm394_vm0, %v7100_v60, %v1866_v55  ;;  %3636 = vmatprep.subr.mxu0 %v7350_v57  ;;  %v1795_v60 = vsel %vm1749_vm4, 0.0, %v1765_v2 }
 0x2a1   : > { %3272 = vmatmul.mubr.f32.gmra.mxu0 %v7580_v24  ;;  %3475 = vmatmul.mubr.f32.gmra.mxu1 %v7580_v24 }
 0x2a2   : > { %4959 = vmatprep.mubr.msk.f32.mxu0 %vm394_vm0, %v7587_v51  ;;  %4977 = vmatprep.mubr.msk.f32.mxu1 %vm394_vm0, %v7587_v51 }
 0x2a3   : > { %3637 = vmatpush1.msra.mxu0 %v7583_v62 }
 0x2a4   : > { %v1868_v55 = vpop.permute.xlu0 %1867  ;;  %3654 = vmatprep.subr.mxu0 %v7350_v57 }
 0x2a5   : > { %v7601_v9 = vsel %vm394_vm0, %v1795_v60, %v1868_v55  ;;  %3655 = vmatpush2.msra.mxu0 %v7593_v28  ;;  %v7626_v55 = vld [vmem:[#allocation3 + $0xe8] sm:$0xff]  ;;  %v7647_v28 = vld [vmem:[#allocation3 + $0xf8] sm:$0xff] }
 0x2a6   : > { %3277 = vmatmul.mubr.f32.gmra.mxu0 %v7601_v9  ;;  %3480 = vmatmul.mubr.f32.gmra.mxu1 %v7601_v9 }
 0x2a7   : > { %4960 = vmatprep.mubr.msk.f32.mxu0 %vm394_vm0, %v7606_v27  ;;  %4978 = vmatprep.mubr.msk.f32.mxu1 %vm394_vm0, %v7606_v27 }
 0x2a8   : > { %3656 = vmatprep.subr.mxu0 %v7350_v57 }
 0x2a9   : > { %3657 = vmatpush2.msra.mxu0 %v7608_v3  ;;  %v7643_v3 = vld [vmem:[#allocation10 + $0x218] sm:$0xff] }
 0x2aa   : > { %v1870_v2 = vpop.permute.xlu1 %1869  ;;  %3658 = vmatprep.subr.mxu0 %v7350_v57  ;;  %8489 = vst [vmem:[#allocation21_spill] sm:$0xff] %v7643_v3 }
 0x2ab   : > { %v7621_v60 = vsel %vm394_vm0, %v7130_v26, %v1870_v2  ;;  %3659 = vmatpush2.msra.mxu0 %v7615_v0  ;;  %v8488_v26 = vrot.slane %v7138_v1, 7 }
 0x2ac   : > { %3282 = vmatmul.mubr.f32.gmra.mxu0 %v7621_v60  ;;  %3485 = vmatmul.mubr.f32.gmra.mxu1 %v7621_v60 }
 0x2ad   : > { %4961 = vmatprep.mubr.msk.f32.mxu0 %vm394_vm0, %v7626_v55  ;;  %4979 = vmatprep.mubr.msk.f32.mxu1 %vm394_vm0, %v7626_v55  ;;  %v1796_v2 = vsel %vm1749_vm4, 0.0, %v8488_v26  ;;  %v7659_v26 = vld [vmem:[#allocation10 + $0x210] sm:$0xff] }
 0x2ae   : > { %3660 = vmatprep.subr.mxu0 %v7350_v57  ;;  %8491 = vst [vmem:[#allocation29_spill] sm:$0xff] %v7659_v26 }
 0x2af   : > { %v1872_v0 = vpop.permute.xlu0 %1871  ;;  %3661 = vmatpush2.msra.mxu0 %v7628_v18  ;;  %v7665_v18 = vld [vmem:[#allocation3 + $0x128] sm:$0xff] }
 0x2b0   : > { %v7640_v36 = vsel %vm394_vm0, %v1796_v2, %v1872_v0  ;;  %3662 = vmatprep.subr.mxu0 %v7350_v57  ;;  %v7663_v2 = vld [vmem:[#allocation3 + $0x108] sm:$0xff]  ;;  %8492 = vst [vmem:[#allocation30_spill] sm:$0xff] %v7665_v18 }
 0x2b1   : > { %3287 = vmatmul.mubr.f32.gmra.mxu0 %v7640_v36  ;;  %3490 = vmatmul.mubr.f32.gmra.mxu1 %v7640_v36 }
 0x2b2   : > { %4962 = vmatprep.mubr.msk.f32.mxu0 %vm394_vm0, %v7647_v28  ;;  %4980 = vmatprep.mubr.msk.f32.mxu1 %vm394_vm0, %v7647_v28 }
 0x2b3   : > { %v1874_v1 = vpop.permute.xlu1 %1873  ;;  %3663 = vmatpush2.msra.mxu0 %v7643_v3 }
 0x2b4   : > { %v7656_v0 = vsel %vm394_vm0, %v7166_v20, %v1874_v1  ;;  %3664 = vmatprep.subr.mxu0 %v7350_v57  ;;  %v7671_v20 = vld [vmem:[#allocation10 + $0x208] sm:$0xff]  ;;  %v8494_v1 = vrot.slane %v7161_v17, 7 }
 0x2b5   : > { %8490 = vst [vmem:[#allocation28_spill] sm:$0xff] %v7656_v0  ;;  %3292 = vmatmul.mubr.f32.gmra.mxu0 %v7656_v0  ;;  %3495 = vmatmul.mubr.f32.gmra.mxu1 %v7656_v0  ;;  %8493 = vst [vmem:[#allocation31_spill] sm:$0xff] %v7671_v20  ;;  %v7678_v0 = vld [vmem:[#allocation10 + $0x200] sm:$0xff] }
 0x2b6   : > { %4963 = vmatprep.mubr.msk.f32.mxu0 %vm394_vm0, %v7663_v2  ;;  %4999 = vmatprep.mubr.msk.f32.mxu1 %vm394_vm0, %v7665_v18  ;;  %v1797_v3 = vsel %vm1749_vm4, 0.0, %v8494_v1  ;;  %8495 = vst [vmem:[#allocation32_spill] sm:$0xff] %v7678_v0  ;;  %v7685_v18 = vld [vmem:[#allocation3 + $0x118] sm:$0xff] }
 0x2b7   : > { %3665 = vmatpush2.msra.mxu0 %v7659_v26 }
 0x2b8   : > { %v1876_v7 = vpop.permute.xlu0 %1875  ;;  %3666 = vmatprep.subr.mxu0 %v7350_v57 }
 0x2b9   : > { %v7681_v62 = vsel %vm394_vm0, %v1797_v3, %v1876_v7  ;;  %3667 = vmatpush2.msra.mxu0 %v7671_v20  ;;  %v3891_v3 = vld [vmem:[#allocation10 + $0x78] sm:$0xff]  ;;  %v8496_v7 = vrot.slane %v7197_v47, 7 }
 0x2ba   : > { %3297 = vmatmul.mubr.f32.gmra.mxu0 %v7681_v62  ;;  %3668 = vmatprep.subr.mxu0 %v7350_v57 }
 0x2bb   : > { %v1878_v26 = vpop.permute.xlu1 %1877  ;;  %4964 = vmatprep.mubr.msk.f32.mxu0 %vm394_vm0, %v7685_v18  ;;  %3669 = vmatpush2.msra.mxu0 %v7678_v0  ;;  %v2846_v1 = vsel %vm1749_vm4, 0.0, %v8496_v7 }
 0x2bc   : > { %v7693_v17 = vsel %vm394_vm0, %v7193_v50, %v1878_v26  ;;  %4197 = vmatprep.subr.mxu0 %v7350_v57  ;;  %v3890_v50 = vld [vmem:[#allocation10 + $0x70] sm:$0xff]  ;;  %v7722_v26 = vpop.f32.mrf.mxu1 }
 0x2be   : > { %3302 = vmatmul.mubr.f32.gmra.mxu0 %v7693_v17  ;;  %v3423_v7 = vpop.f32.mrf.mxu1 }
 0x2bf   : > { %4981 = vmatprep.mubr.msk.f32.mxu0 %vm394_vm0, %v7368_v8  ;;  %v7710_v8 = vld [vmem:[#allocation3 + $0x138] sm:$0xff] }
 0x2c2   : > { %v2903_v20 = vpop.permute.xlu0 %2902  ;;  %3671 = vmatmul.mubr.f32.vlgmr.msra.gmra.mxu0 %v7381_v59 }
 0x2c3   : > { %v7704_v0 = vsel %vm394_vm0, %v2846_v1, %v2903_v20  ;;  %4198 = vmatpush1.msra.mxu0 %v3891_v3  ;;  %4982 = vmatprep.mubr.msk.f32.mxu0 %vm394_vm0, %v7399_v54  ;;  %v3889_v54 = vld [vmem:[#allocation10 + $0x68] sm:$0xff] }
 0x2c4   : > { %4069 = vmatmul.mubr.f32.vlgmr.msra.gmra.mxu1 %v7704_v0  ;;  %4199 = vmatprep.subr.mxu0 %v7350_v57  ;;  %v7731_v3 = vld [vmem:[#allocation3 + $0x148] sm:$0xff] }
 0x2c5   : > { %v2905_v47 = vpop.permute.xlu1 %2904  ;;  %4448 = vmatpush1.msra.mxu1 %v7329_v15  ;;  %5000 = vmatprep.mubr.msk.f32.mxu1 %vm394_vm0, %v7710_v8  ;;  %v8497_v15 = vrot.slane %v7218_v37, 7  ;;  %v7741_v37 = vpop.f32.mrf.mxu1 }
 0x2c6   : > { %v7717_v59 = vsel %vm394_vm0, %v7227_v45, %v2905_v47  ;;  %4200 = vmatpush1.msra.mxu0 %v3890_v50  ;;  %4449 = vmatprep.subr.mxu1 %v7350_v57  ;;  %v7749_v47 = vld [vmem:[#allocation3 + $0x158] sm:$0xff] }
 0x2c7   : > { %3676 = vmatmul.mubr.f32.gmra.mxu0 %v7432_v38  ;;  %4201 = vmatprep.subr.mxu0 %v7350_v57  ;;  %v2847_v45 = vsel %vm1749_vm4, 0.0, %v8497_v15  ;;  %v3888_v38 = vld [vmem:[#allocation10 + $0x60] sm:$0xff] }
 0x2c8   : > { %4983 = vmatprep.mubr.msk.f32.mxu0 %vm394_vm0, %v7440_v32  ;;  %4450 = vmatpush1.msra.mxu1 %v7339_v6  ;;  %v3887_v6 = vld [vmem:[#allocation10 + $0x58] sm:$0xff]  ;;  %v3428_v32 = vpop.f32.mrf.mxu1 }
 0x2c9   : > { %v2907_v20 = vpop.permute.xlu0 %2906  ;;  %4074 = vmatmul.mubr.f32.gmra.mxu1 %v7717_v59  ;;  %4202 = vmatpush1.msra.mxu0 %v3889_v54  ;;  %v3879_v32 = vld [vmem:[#allocation10 + $0x18] sm:$0xff] }
 0x2ca   : > { %v7734_v1 = vsel %vm394_vm0, %v2847_v45, %v2907_v20  ;;  %5001 = vmatprep.mubr.msk.f32.mxu1 %vm394_vm0, %v7731_v3  ;;  %4203 = vmatprep.subr.mxu0 %v7350_v57  ;;  %v7788_v45 = vld [vmem:[#allocation3 + $0x178] sm:$0xff] }
 0x2cb   : > { %4451 = vmatprep.subr.mxu1 %v7350_v57  ;;  %3681 = vmatmul.mubr.f32.gmra.mxu0 %v7456_v34 }
 0x2cc   : > { %4204 = vmatpush1.msra.mxu0 %v3888_v38  ;;  %4452 = vmatpush1.msra.mxu1 %v7370_v41  ;;  %v3886_v41 = vld [vmem:[#allocation10 + $0x50] sm:$0xff] }
 0x2cd   : > { %4984 = vmatprep.mubr.msk.f32.mxu0 %vm394_vm0, %v7466_v56  ;;  %4453 = vmatprep.subr.mxu1 %v7350_v57  ;;  %v8498_v56 = vrot.slane %v7247_v46, 7  ;;  %v3885_v46 = vld [vmem:[#allocation10 + $0x48] sm:$0xff] }
 0x2ce   : > { %v2909_v50 = vpop.permute.xlu1 %2908  ;;  %4079 = vmatmul.mubr.f32.gmra.mxu1 %v7734_v1  ;;  %4205 = vmatprep.subr.mxu0 %v7350_v57 }
 0x2cf   : > { %v7753_v34 = vsel %vm394_vm0, %v7255_v16, %v2909_v50  ;;  %4454 = vmatpush1.msra.mxu1 %v7387_v35  ;;  %5002 = vmatprep.mubr.msk.f32.mxu1 %vm394_vm0, %v7749_v47  ;;  %v2848_v54 = vsel %vm1749_vm4, 0.0, %v8498_v56  ;;  %v7771_v35 = vld [vmem:[#allocation3 + $0x168] sm:$0xff]  ;;  %v3878_v50 = vld [vmem:[#allocation10 + $0x10] sm:$0xff] }
 0x2d0   : > { %4206 = vmatpush1.msra.mxu0 %v3887_v6  ;;  %4455 = vmatprep.subr.mxu1 %v7350_v57  ;;  %v3881_v6 = vld [vmem:[#allocation10 + $0x28] sm:$0xff] }
 0x2d1   : > { %v2911_v15 = vpop.permute.xlu0 %2910  ;;  %3686 = vmatmul.mubr.f32.gmra.mxu0 %v7488_v31  ;;  %4207 = vmatprep.subr.mxu0 %v7350_v57 }
 0x2d2   : > { %v7765_v16 = vsel %vm394_vm0, %v2848_v54, %v2911_v15  ;;  %4985 = vmatprep.mubr.msk.f32.mxu0 %vm394_vm0, %v7496_v19  ;;  %4456 = vmatpush1.msra.mxu1 %v7401_v52  ;;  %v3884_v52 = vld [vmem:[#allocation10 + $0x40] sm:$0xff] }
 0x2d3   : > { %4084 = vmatmul.mubr.f32.gmra.mxu1 %v7753_v34  ;;  %4208 = vmatpush1.msra.mxu0 %v3886_v41  ;;  %v8502_v41 = vrot.slane %v7408_v53, 7  ;;  %v3876_v54 = vld [vmem:[#allocation10] sm:$0xff]  ;;  %v3899_v53 = vld [vmem:[#allocation10 + $0xb8] sm:$0xff] }
 0x2d4   : > { %5003 = vmatprep.mubr.msk.f32.mxu1 %vm394_vm0, %v7771_v35  ;;  %4209 = vmatprep.subr.mxu0 %v7350_v57 }
 0x2d5   : > { %v2913_v31 = vpop.permute.xlu1 %2912  ;;  %4457 = vmatprep.subr.mxu1 %v7350_v57  ;;  %3691 = vmatmul.mubr.f32.gmra.mxu0 %v7521_v48  ;;  %v8499_v48 = vrot.slane %v7278_v33, 7  ;;  %v7806_v33 = vld [vmem:[#allocation3 + $0x188] sm:$0xff]  ;;  %v2852_v56 = vsel %vm1749_vm4, 0.0, %v8502_v41 }
 0x2d6   : > { %v7780_v19 = vsel %vm394_vm0, %v7287_v21, %v2913_v31  ;;  %4210 = vmatpush1.msra.mxu0 %v3885_v46  ;;  %4458 = vmatpush1.msra.mxu1 %v7435_v10  ;;  %v8505_v46 = vld [vmem:[#allocation22_spill] sm:$0xff]  ;;  %v8514_v41 = vld [vmem:[#allocation29_spill] sm:$0xff] }
 0x2d7   : > { %4986 = vmatprep.mubr.msk.f32.mxu0 %vm394_vm0, %v7526_v11  ;;  %4459 = vmatprep.subr.mxu1 %v7350_v57  ;;  %v2849_v21 = vsel %vm1749_vm4, 0.0, %v8499_v48  ;;  %v3883_v11 = vld [vmem:[#allocation10 + $0x38] sm:$0xff]  ;;  %v8506_v31 = vrot.slane %v8505_v46, 7 }
 0x2d8   : > { %4089 = vmatmul.mubr.f32.gmra.mxu1 %v7765_v16  ;;  %4211 = vmatprep.subr.mxu0 %v7350_v57 }
 0x2d9   : > { %v2915_v20 = vpop.permute.xlu0 %2914  ;;  %4460 = vmatpush1.msra.mxu1 %v7452_v40  ;;  %5004 = vmatprep.mubr.msk.f32.mxu1 %vm394_vm0, %v7788_v45  ;;  %v3882_v40 = vld [vmem:[#allocation10 + $0x30] sm:$0xff] }
 0x2da   : > { %v7797_v10 = vsel %vm394_vm0, %v2849_v21, %v2915_v20  ;;  %4212 = vmatpush1.msra.mxu0 %v3884_v52  ;;  %4461 = vmatprep.subr.mxu1 %v7350_v57  ;;  %v2853_v52 = vsel %vm1749_vm4, 0.0, %v8506_v31  ;;  %v7921_v20 = vld [vmem:[#allocation3 + $0x1e8] sm:$0xff] }
 0x2db   : > { %3696 = vmatmul.mubr.f32.gmra.mxu0 %v7541_v29  ;;  %4213 = vmatprep.subr.mxu0 %v7350_v57 }
 0x2dc   : > { %4987 = vmatprep.mubr.msk.f32.mxu0 %vm394_vm0, %v7546_v13  ;;  %4462 = vmatpush1.msra.mxu1 %v7473_v49  ;;  %v8500_v49 = vrot.slane %v7307_v4, 7  ;;  %v3880_v4 = vld [vmem:[#allocation10 + $0x20] sm:$0xff] }
 0x2dd   : > { %4094 = vmatmul.mubr.f32.gmra.mxu1 %v7780_v19  ;;  %4214 = vmatpush1.msra.mxu0 %v3883_v11  ;;  %v3897_v11 = vld [vmem:[#allocation10 + $0xa8] sm:$0xff] }
 0x2de   : > { %v2917_v38 = vpop.permute.xlu1 %2916  ;;  %5005 = vmatprep.mubr.msk.f32.mxu1 %vm394_vm0, %v7806_v33  ;;  %4215 = vmatprep.subr.mxu0 %v7350_v57  ;;  %v2850_v13 = vsel %vm1749_vm4, 0.0, %v8500_v49  ;;  %v8509_v49 = vld [vmem:[#allocation23_spill] sm:$0xff] }
 0x2df   : > { %v7813_v29 = vsel %vm394_vm0, %v7315_v58, %v2917_v38  ;;  %4463 = vmatprep.subr.mxu1 %v7350_v57  ;;  %3701 = vmatmul.mubr.f32.gmra.mxu0 %v7560_v61  ;;  %v7829_v61 = vld [vmem:[#allocation3 + $0x198] sm:$0xff]  ;;  %v8508_v38 = vld [vmem:[#allocation24_spill] sm:$0xff] }
 0x2e0   : > { %4216 = vmatpush1.msra.mxu0 %v3882_v40  ;;  %4464 = vmatpush1.msra.mxu1 %v7491_v25 }
 0x2e1   : > { %v2919_v7 = vpop.permute.xlu0 %2918  ;;  %4988 = vmatprep.mubr.msk.f32.mxu0 %vm394_vm0, %v7567_v14  ;;  %4465 = vmatprep.subr.mxu1 %v7350_v57 }
 0x2e2   : > { %v7825_v58 = vsel %vm394_vm0, %v2850_v13, %v2919_v7  ;;  %4099 = vmatmul.mubr.f32.gmra.mxu1 %v7797_v10  ;;  %4217 = vmatprep.subr.mxu0 %v7350_v57  ;;  %v3896_v7 = vld [vmem:[#allocation10 + $0xa0] sm:$0xff] }
 0x2e3   : > { %4466 = vmatpush1.msra.mxu1 %v7502_v42  ;;  %5006 = vmatprep.mubr.msk.f32.mxu1 %vm394_vm0, %v7829_v61  ;;  %v7845_v42 = vld [vmem:[#allocation3 + $0x1a8] sm:$0xff] }
 0x2e4   : > { %4218 = vmatpush1.msra.mxu0 %v3881_v6  ;;  %4467 = vmatprep.subr.mxu1 %v7350_v57  ;;  %v7938_v6 = vld [vmem:[#allocation3 + $0x1f8] sm:$0xff] }
 0x2e5   : > { %v2921_v14 = vpop.permute.xlu1 %2920  ;;  %3706 = vmatmul.mubr.f32.gmra.mxu0 %v7580_v24  ;;  %4219 = vmatprep.subr.mxu0 %v7350_v57 }
 0x2e6   : > { %v7839_v25 = vsel %vm394_vm0, %v7362_v44, %v2921_v14  ;;  %4989 = vmatprep.mubr.msk.f32.mxu0 %vm394_vm0, %v7587_v51  ;;  %4468 = vmatpush1.msra.mxu1 %v7528_v30  ;;  %v8501_v44 = vrot.slane %v7347_v63, 7  ;;  %v7864_v63 = vld [vmem:[#allocation3 + $0x1b8] sm:$0xff] }
 0x2e7   : > { %4104 = vmatmul.mubr.f32.gmra.mxu1 %v7813_v29  ;;  %4220 = vmatpush1.msra.mxu0 %v3880_v4  ;;  %v8510_v4 = vld [vmem:[#allocation20_spill] sm:$0xff]  ;;  %v3895_v14 = vld [vmem:[#allocation10 + $0x98] sm:$0xff] }
 0x2e8   : > { %5007 = vmatprep.mubr.msk.f32.mxu1 %vm394_vm0, %v7845_v42  ;;  %4221 = vmatprep.subr.mxu0 %v7350_v57  ;;  %v2851_v24 = vsel %vm1749_vm4, 0.0, %v8501_v44  ;;  %v8512_v44 = vld [vmem:[#allocation25_spill] sm:$0xff] }
 0x2e9   : > { %4469 = vmatprep.subr.mxu1 %v7350_v57  ;;  %v2923_v51 = vpop.permute.xlu0 %2922  ;;  %3711 = vmatmul.mubr.f32.gmra.mxu0 %v7601_v9 }
 0x2ea   : > { %v7856_v30 = vsel %vm394_vm0, %v2851_v24, %v2923_v51  ;;  %4222 = vmatpush1.msra.mxu0 %v3879_v32  ;;  %4470 = vmatpush1.msra.mxu1 %v7535_v43  ;;  %v3877_v43 = vld [vmem:[#allocation10 + $0x8] sm:$0xff]  ;;  %v8511_v32 = vld [vmem:[#allocation30_spill] sm:$0xff] }
 0x2eb   : > { %4990 = vmatprep.mubr.msk.f32.mxu0 %vm394_vm0, %v7606_v27  ;;  %4471 = vmatprep.subr.mxu1 %v7350_v57  ;;  %v7950_v24 = vld [vmem:[#allocation3 + $0x208] sm:$0xff]  ;;  %v3894_v51 = vld [vmem:[#allocation10 + $0x90] sm:$0xff] }
 0x2ec   : > { %4109 = vmatmul.mubr.f32.gmra.mxu1 %v7825_v58  ;;  %4223 = vmatprep.subr.mxu0 %v7350_v57 }
 0x2ed   : > { %4472 = vmatpush1.msra.mxu1 %v7548_v39  ;;  %5008 = vmatprep.mubr.msk.f32.mxu1 %vm394_vm0, %v7864_v63  ;;  %v7880_v39 = vld [vmem:[#allocation3 + $0x1c8] sm:$0xff] }
 0x2ee   : > { %4224 = vmatpush1.msra.mxu0 %v3878_v50  ;;  %v2925_v9 = vpop.permute.xlu1 %2924  ;;  %4473 = vmatprep.subr.mxu1 %v7350_v57  ;;  %v8513_v50 = vld [vmem:[#allocation21_spill] sm:$0xff] }
 0x2ef   : > { %v7872_v27 = vsel %vm394_vm0, %v7421_v22, %v2925_v9  ;;  %3716 = vmatmul.mubr.f32.gmra.mxu0 %v7621_v60  ;;  %4225 = vmatprep.subr.mxu0 %v7350_v57  ;;  %v3893_v9 = vld [vmem:[#allocation10 + $0x88] sm:$0xff] }
 0x2f0   : > { %4991 = vmatprep.mubr.msk.f32.mxu0 %vm394_vm0, %v7626_v55  ;;  %4474 = vmatpush1.msra.mxu1 %v7563_v12  ;;  %v7899_v55 = vld [vmem:[#allocation3 + $0x1d8] sm:$0xff] }
 0x2f1   : > { %4114 = vmatmul.mubr.f32.gmra.mxu1 %v7839_v25  ;;  %4226 = vmatpush1.msra.mxu0 %v3877_v43  ;;  %v2927_v22 = vpop.permute.xlu0 %2926  ;;  %v7963_v43 = vld [vmem:[#allocation3 + $0x218] sm:$0xff] }
 0x2f2   : > { %5009 = vmatprep.mubr.msk.f32.mxu1 %vm394_vm0, %v7880_v39  ;;  %4227 = vmatprep.subr.mxu0 %v7350_v57  ;;  %v7889_v60 = vsel %vm394_vm0, %v2852_v56, %v2927_v22  ;;  %v3892_v56 = vld [vmem:[#allocation10 + $0x80] sm:$0xff]  ;;  %v8515_v22 = vld [vmem:[#allocation31_spill] sm:$0xff] }
 0x2f3   : > { %4475 = vmatprep.subr.mxu1 %v7350_v57  ;;  %3721 = vmatmul.mubr.f32.gmra.mxu0 %v7640_v36  ;;  %v8503_v36 = vld [vmem:[#allocation26_spill] sm:$0xff] }
 0x2f4   : > { %4228 = vmatpush1.msra.mxu0 %v3876_v54  ;;  %4476 = vmatpush1.msra.mxu1 %v7573_v5  ;;  %v8504_v5 = vld [vmem:[#allocation28_spill] sm:$0xff] }
 0x2f5   : > { %4992 = vmatprep.mubr.msk.f32.mxu0 %vm394_vm0, %v7647_v28  ;;  %4477 = vmatprep.subr.mxu1 %v7350_v57  ;;  %v2929_v12 = vpop.permute.xlu1 %2928  ;;  %v3898_v28 = vld [vmem:[#allocation10 + $0xb0] sm:$0xff]  ;;  %v7975_v54 = vld [vmem:[#allocation2] sm:$0xff] }
 0x2f6   : > { %4119 = vmatmul.mubr.f32.gmra.mxu1 %v7856_v30  ;;  %4245 = vmatprep.subr.mxu0 %v7350_v57  ;;  %v7903_v15 = vsel %vm394_vm0, %v7478_v23, %v2929_v12  ;;  %v8507_v23 = vld [vmem:[#allocation27_spill] sm:$0xff] }
 0x2f7   : > { %4478 = vmatpush1.msra.mxu1 %v8503_v36  ;;  %5010 = vmatprep.mubr.msk.f32.mxu1 %vm394_vm0, %v7899_v55 }
 0x2f8   : > { %4246 = vmatpush2.msra.mxu0 %v3899_v53  ;;  %4495 = vmatprep.subr.mxu1 %v7350_v57  ;;  %v8516_v53 = vld [vmem:[#allocation32_spill] sm:$0xff] }
 0x2f9   : > { %3726 = vmatmul.mubr.f32.gmra.mxu0 %v8504_v5  ;;  %4247 = vmatprep.subr.mxu0 %v7350_v57  ;;  %v2931_v48 = vpop.permute.xlu0 %2930 }
 0x2fa   : > { %4993 = vmatprep.mubr.msk.f32.mxu0 %vm394_vm0, %v7663_v2  ;;  %4496 = vmatpush2.msra.mxu1 %v8507_v23  ;;  %v7918_v21 = vsel %vm394_vm0, %v2853_v52, %v2931_v48 }
 0x2fb   : > { %4124 = vmatmul.mubr.f32.gmra.mxu1 %v7872_v27  ;;  %4248 = vmatpush2.msra.mxu0 %v3898_v28 }
 0x2fc   : > { %5011 = vmatprep.mubr.msk.f32.mxu1 %vm394_vm0, %v7921_v20  ;;  %4249 = vmatprep.subr.mxu0 %v7350_v57 }
 0x2fd   : > { %4497 = vmatprep.subr.mxu1 %v7350_v57  ;;  %3731 = vmatmul.mubr.f32.gmra.mxu0 %v7681_v62  ;;  %v2933_v40 = vpop.permute.xlu1 %2932 }
 0x2fe   : > { %4250 = vmatpush2.msra.mxu0 %v3897_v11  ;;  %4498 = vmatpush2.msra.mxu1 %v8508_v38  ;;  %v7931_v13 = vsel %vm394_vm0, %v8509_v49, %v2933_v40 }
 0x2ff   : > { %4994 = vmatprep.mubr.msk.f32.mxu0 %vm394_vm0, %v7685_v18  ;;  %4499 = vmatprep.subr.mxu1 %v7350_v57 }
 0x300   : > { %4129 = vmatmul.mubr.f32.gmra.mxu1 %v7889_v60  ;;  %4251 = vmatprep.subr.mxu0 %v7350_v57 }
 0x301   : > { %4500 = vmatpush2.msra.mxu1 %v8510_v4  ;;  %5012 = vmatprep.mubr.msk.f32.mxu1 %vm394_vm0, %v7938_v6 }
 0x302   : > { %4252 = vmatpush2.msra.mxu0 %v3896_v7  ;;  %4501 = vmatprep.subr.mxu1 %v7350_v57 }
 0x303   : > { %3736 = vmatmul.mubr.f32.gmra.mxu0 %v7693_v17  ;;  %4253 = vmatprep.subr.mxu0 %v7350_v57 }
 0x304   : > { %4995 = vmatprep.mubr.msk.f32.mxu0 %vm394_vm0, %v8511_v32  ;;  %4502 = vmatpush2.msra.mxu1 %v8512_v44 }
 0x305   : > { %4134 = vmatmul.mubr.f32.gmra.mxu1 %v7903_v15  ;;  %4254 = vmatpush2.msra.mxu0 %v3895_v14 }
 0x306   : > { %5013 = vmatprep.mubr.msk.f32.mxu1 %vm394_vm0, %v7950_v24  ;;  %4255 = vmatprep.subr.mxu0 %v7350_v57 }
 0x307   : > { %4503 = vmatprep.subr.mxu1 %v7350_v57  ;;  %3741 = vmatmul.mubr.f32.gmra.mxu0 %v7704_v0 }
 0x308   : > { %4256 = vmatpush2.msra.mxu0 %v3894_v51  ;;  %4504 = vmatpush2.msra.mxu1 %v8513_v50 }
 0x309   : > { %4996 = vmatprep.mubr.msk.f32.mxu0 %vm394_vm0, %v7710_v8  ;;  %4505 = vmatprep.subr.mxu1 %v7350_v57 }
 0x30a   : > { %4139 = vmatmul.mubr.f32.gmra.mxu1 %v7918_v21  ;;  %4257 = vmatprep.subr.mxu0 %v7350_v57 }
 0x30b   : > { %4506 = vmatpush2.msra.mxu1 %v8514_v41  ;;  %5014 = vmatprep.mubr.msk.f32.mxu1 %vm394_vm0, %v7963_v43 }
 0x30c   : > { %4258 = vmatpush2.msra.mxu0 %v3893_v9  ;;  %4507 = vmatprep.subr.mxu1 %v7350_v57 }
 0x30d   : > { %3746 = vmatmul.mubr.f32.gmra.mxu0 %v7717_v59  ;;  %4259 = vmatprep.subr.mxu0 %v7350_v57 }
 0x30e   : > { %5015 = vmatprep.mubr.msk.f32.mxu0 %vm394_vm0, %v7663_v2  ;;  %4508 = vmatpush2.msra.mxu1 %v8515_v22 }
 0x30f   : > { %4144 = vmatmul.mubr.f32.gmra.mxu1 %v7931_v13  ;;  %4260 = vmatpush2.msra.mxu0 %v3892_v56 }
 0x310   : > { %4509 = vmatprep.subr.mxu1 %v7975_v54  ;;  %5031 = vmatprep.mubr.msk.f32.mxu1 %vm394_vm0, %v7731_v3 }
 0x311   : > { %4262 = vmatmul.mubr.f32.vlgmr.msra.gmra.mxu0 %v7681_v62  ;;  %4510 = vmatpush2.msra.mxu1 %v8516_v53 }
 0x312   : > { %5016 = vmatprep.mubr.msk.f32.mxu0 %vm394_vm0, %v7685_v18 }
 0x313   : > { %4512 = vmatmul.mubr.f32.vlgmr.msra.gmra.mxu1 %v7734_v1 }
 0x314   : > { %5032 = vmatprep.mubr.msk.f32.mxu1 %vm394_vm0, %v7749_v47 }
 0x315   : > { %4267 = vmatmul.mubr.f32.gmra.mxu0 %v7693_v17 }
 0x316   : > { %5017 = vmatprep.mubr.msk.f32.mxu0 %vm394_vm0, %v8511_v32 }
 0x317   : > { %4517 = vmatmul.mubr.f32.gmra.mxu1 %v7753_v34 }
 0x318   : > { %5033 = vmatprep.mubr.msk.f32.mxu1 %vm394_vm0, %v7771_v35 }
 0x319   : > { %4272 = vmatmul.mubr.f32.gmra.mxu0 %v7704_v0 }
 0x31a   : > { %5018 = vmatprep.mubr.msk.f32.mxu0 %vm394_vm0, %v7710_v8 }
 0x31b   : > { %4522 = vmatmul.mubr.f32.gmra.mxu1 %v7765_v16 }
 0x31c   : > { %5034 = vmatprep.mubr.msk.f32.mxu1 %vm394_vm0, %v7788_v45 }
 0x31d   : > { %4277 = vmatmul.mubr.f32.gmra.mxu0 %v7717_v59 }
 0x31e   : > { %5019 = vmatprep.mubr.msk.f32.mxu0 %vm394_vm0, %v7731_v3 }
 0x31f   : > { %4527 = vmatmul.mubr.f32.gmra.mxu1 %v7780_v19 }
 0x320   : > { %5035 = vmatprep.mubr.msk.f32.mxu1 %vm394_vm0, %v7806_v33 }
 0x321   : > { %4282 = vmatmul.mubr.f32.gmra.mxu0 %v7734_v1 }
 0x322   : > { %5020 = vmatprep.mubr.msk.f32.mxu0 %vm394_vm0, %v7749_v47 }
 0x323   : > { %4532 = vmatmul.mubr.f32.gmra.mxu1 %v7797_v10 }
 0x324   : > { %5036 = vmatprep.mubr.msk.f32.mxu1 %vm394_vm0, %v7829_v61 }
 0x325   : > { %4287 = vmatmul.mubr.f32.gmra.mxu0 %v7753_v34 }
 0x326   : > { %5021 = vmatprep.mubr.msk.f32.mxu0 %vm394_vm0, %v7771_v35 }
 0x327   : > { %4537 = vmatmul.mubr.f32.gmra.mxu1 %v7813_v29 }
 0x328   : > { %5037 = vmatprep.mubr.msk.f32.mxu1 %vm394_vm0, %v7845_v42 }
 0x329   : > { %4292 = vmatmul.mubr.f32.gmra.mxu0 %v7765_v16 }
 0x32a   : > { %5022 = vmatprep.mubr.msk.f32.mxu0 %vm394_vm0, %v7788_v45 }
 0x32b   : > { %4542 = vmatmul.mubr.f32.gmra.mxu1 %v7825_v58 }
 0x32c   : > { %5038 = vmatprep.mubr.msk.f32.mxu1 %vm394_vm0, %v7864_v63 }
 0x32d   : > { %4297 = vmatmul.mubr.f32.gmra.mxu0 %v7780_v19 }
 0x32e   : > { %5023 = vmatprep.mubr.msk.f32.mxu0 %vm394_vm0, %v7806_v33 }
 0x32f   : > { %4547 = vmatmul.mubr.f32.gmra.mxu1 %v7839_v25 }
 0x330   : > { %5039 = vmatprep.mubr.msk.f32.mxu1 %vm394_vm0, %v7880_v39 }
 0x331   : > { %4302 = vmatmul.mubr.f32.gmra.mxu0 %v7797_v10 }
 0x332   : > { %5024 = vmatprep.mubr.msk.f32.mxu0 %vm394_vm0, %v7829_v61  ;;  %v8032_v18 = vpop.f32.mrf.mxu0  ;;  %v3431_v57 = vpop.f32.mrf.mxu1 }
 0x333   : > { %4552 = vmatmul.mubr.f32.gmra.mxu1 %v7856_v30 }
 0x334   : > { %5040 = vmatprep.mubr.msk.f32.mxu1 %vm394_vm0, %v7899_v55  ;;  %v3230_v62 = vpop.f32.mrf.mxu0  ;;  %v3433_v0 = vpop.f32.mrf.mxu1 }
 0x335   : > { %4307 = vmatmul.mubr.f32.gmra.mxu0 %v7813_v29  ;;  %v4372_v29 = vld [vmem:[#allocation3 + $0x228] sm:$0xff] }
 0x336   : > { %5025 = vmatprep.mubr.msk.f32.mxu0 %vm394_vm0, %v7845_v42 }
 0x337   : > { %4557 = vmatmul.mubr.f32.gmra.mxu1 %v7872_v27  ;;  %v8041_v2 = vpop.f32.mrf.mxu0 }
 0x338   : > { %5041 = vmatprep.mubr.msk.f32.mxu1 %vm394_vm0, %v7921_v20  ;;  %v3436_v17 = vpop.f32.mrf.mxu1 }
 0x339   : > { %4312 = vmatmul.mubr.f32.gmra.mxu0 %v7825_v58  ;;  %v3235_v8 = vpop.f32.mrf.mxu0 }
 0x33a   : > { %5026 = vmatprep.mubr.msk.f32.mxu0 %vm394_vm0, %v7864_v63  ;;  %v3438_v59 = vpop.f32.mrf.mxu1  ;;  %v4374_v63 = vld [vmem:[#allocation3 + $0x238] sm:$0xff] }
 0x33b   : > { %4562 = vmatmul.mubr.f32.gmra.mxu1 %v7889_v60  ;;  %v3238_v3 = vpop.f32.mrf.mxu0 }
 0x33c   : > { %5042 = vmatprep.mubr.msk.f32.mxu1 %vm394_vm0, %v7938_v6  ;;  %v8051_v1 = vadd.f32 %v3431_v57, %v3238_v3  ;;  %v3441_v47 = vpop.f32.mrf.mxu1 }
 0x33d   : > { %4317 = vmatmul.mubr.f32.gmra.mxu0 %v7839_v25  ;;  %v3240_v34 = vpop.f32.mrf.mxu0 }
 0x33e   : > { %5027 = vmatprep.mubr.msk.f32.mxu0 %vm394_vm0, %v7880_v39  ;;  %v3443_v16 = vpop.f32.mrf.mxu1 }
 0x33f   : > { %4567 = vmatmul.mubr.f32.gmra.mxu1 %v7903_v15 }
 0x340   : > { %5043 = vmatprep.mubr.msk.f32.mxu1 %vm394_vm0, %v7950_v24 }
 0x341   : > { %4322 = vmatmul.mubr.f32.gmra.mxu0 %v7856_v30  ;;  %v3243_v35 = vpop.f32.mrf.mxu0 }
 0x342   : > { %v3446_v19 = vpop.f32.mrf.mxu1  ;;  %5028 = vmatprep.mubr.msk.f32.mxu0 %vm394_vm0, %v7899_v55  ;;  %v8062_v45 = vadd.f32 %v3436_v17, %v3243_v35 }
 0x343   : > { %4572 = vmatmul.mubr.f32.gmra.mxu1 %v7918_v21  ;;  %v3245_v10 = vpop.f32.mrf.mxu0 }
 0x344   : > { %v3448_v33 = vpop.f32.mrf.mxu1  ;;  %5044 = vmatprep.mubr.msk.f32.mxu1 %vm394_vm0, %v7963_v43 }
 0x345   : > { %4327 = vmatmul.mubr.f32.gmra.mxu0 %v7872_v27  ;;  %v3248_v58 = vpop.f32.mrf.mxu0 }
 0x346   : > { %v3451_v61 = vpop.f32.mrf.mxu1  ;;  %5029 = vmatprep.mubr.msk.f32.mxu0 %vm394_vm0, %v7921_v20  ;;  %v8070_v25 = vadd.f32 %v3441_v47, %v3248_v58  ;;  %v8108_v58 = vld [vmem:[%s8366_s6] ss:$0 sm:$0xff] }
 0x347   : > { %4577 = vmatmul.mubr.f32.gmra.mxu1 %v7931_v13  ;;  %v3250_v42 = vpop.f32.mrf.mxu0 }
 0x348   : > { %v3453_v30 = vpop.f32.mrf.mxu1  ;;  %5045 = vmatprep.mubr.msk.f32.mxu1 %vm394_vm0, %v4372_v29  ;;  %v3422_v29 = vadd.f32 %v7722_v26, %v8032_v18  ;;  %v3427_v26 = vadd.f32 %v7741_v37, %v8041_v2 }
 0x349   : > { %4332 = vmatmul.mubr.f32.gmra.mxu0 %v7889_v60  ;;  %v8113_v30 = vld [vmem:[%s8367_s7] ss:$0 sm:$0xff] }
 0x34a   : > { %5030 = vmatprep.mubr.msk.f32.mxu0 %vm394_vm0, %v7938_v6 }
 0x34b   : > { %4582 = vmatmul.mubr.f32.gmra.mxu1 %v7975_v54  ;;  %v3253_v27 = vpop.f32.mrf.mxu0 }
 0x34c   : > { %5046 = vmatprep.mubr.msk.f32.mxu1 %vm394_vm0, %v4374_v63  ;;  %v8079_v39 = vadd.f32 %v3446_v19, %v3253_v27  ;;  %v3456_v12 = vpop.f32.mrf.mxu1 }
 0x34d   : > { %4337 = vmatmul.mubr.f32.gmra.mxu0 %v7903_v15  ;;  %v3255_v55 = vpop.f32.mrf.mxu0 }
 0x34e   : > { %v3458_v36 = vpop.f32.mrf.mxu1 }
 0x34f   : > { %4587 = vmatmul.mubr.f32.gmra.mxu1 %v7975_v54 }
 0x350   : > { %v3258_v28 = vpop.f32.mrf.mxu0  ;;  %v3461_v60 = vpop.f32.mrf.mxu1 }
 0x351   : > { %v8083_v5 = vadd.f32 %v3451_v61, %v3258_v28 }
 0x352   : > { %v3260_v46 = vpop.f32.mrf.mxu0  ;;  %v3463_v31 = vpop.f32.mrf.mxu1 }
 0x356   : > { %v3263_v52 = vpop.f32.mrf.mxu0  ;;  %v3466_v48 = vpop.f32.mrf.mxu1 }
 0x357   : > { %v8085_v23 = vadd.f32 %v3456_v12, %v3263_v52 }
 0x358   : > { %v3265_v21 = vpop.f32.mrf.mxu0  ;;  %v3468_v20 = vpop.f32.mrf.mxu1 }
 0x35b   : > { %v3268_v11 = vpop.f32.mrf.mxu0  ;;  %v3471_v40 = vpop.f32.mrf.mxu1 }
 0x35c   : > { %v8087_v38 = vadd.f32 %v3461_v60, %v3268_v11 }
 0x35d   : > { %v3270_v15 = vpop.f32.mrf.mxu0  ;;  %v3473_v49 = vpop.f32.mrf.mxu1 }
 0x361   : > { %v3273_v13 = vpop.f32.mrf.mxu0  ;;  %v3476_v7 = vpop.f32.mrf.mxu1 }
 0x362   : > { %v8089_v6 = vadd.f32 %v3466_v48, %v3273_v13 }
 0x363   : > { %v3275_v4 = vpop.f32.mrf.mxu0  ;;  %v3478_v14 = vpop.f32.mrf.mxu1 }
 0x366   : > { %v3278_v32 = vpop.f32.mrf.mxu0  ;;  %v3481_v44 = vpop.f32.mrf.mxu1 }
 0x367   : > { %v8091_v24 = vadd.f32 %v3471_v40, %v3278_v32 }
 0x368   : > { %v3280_v51 = vpop.f32.mrf.mxu0  ;;  %v3483_v50 = vpop.f32.mrf.mxu1 }
 0x36c   : > { %v3283_v9 = vpop.f32.mrf.mxu0  ;;  %v3486_v43 = vpop.f32.mrf.mxu1 }
 0x36d   : > { %v8093_v41 = vadd.f32 %v3476_v7, %v3283_v9 }
 0x36e   : > { %v3285_v56 = vpop.f32.mrf.mxu0  ;;  %v3488_v22 = vpop.f32.mrf.mxu1 }
 0x371   : > { %v3288_v54 = vpop.f32.mrf.mxu0  ;;  %v3491_v53 = vpop.f32.mrf.mxu1 }
 0x372   : > { %v8095_v57 = vadd.f32 %v3481_v44, %v3288_v54 }
 0x373   : > { %v3290_v62 = vpop.f32.mrf.mxu0  ;;  %v3493_v0 = vpop.f32.mrf.mxu1 }
 0x375   : > { %v3293_v17 = vpop.f32.mrf.mxu0  ;;  %v3496_v8 = vpop.f32.mrf.mxu1 }
 0x376   : > { %v8097_v59 = vadd.f32 %v3486_v43, %v3293_v17 }
 0x377   : > { %v3295_v3 = vpop.f32.mrf.mxu0  ;;  %v3498_v47 = vpop.f32.mrf.mxu1 }
 0x37a   : > { %v3298_v34 = vpop.f32.mrf.mxu0 }
 0x37b   : > { %v8099_v16 = vadd.f32 %v3491_v53, %v3298_v34 }
 0x37c   : > { %v3300_v35 = vpop.f32.mrf.mxu0 }
 0x37e   : > { %v3303_v19 = vpop.f32.mrf.mxu0 }
 0x37f   : > { %v8101_v10 = vadd.f32 %v3496_v8, %v3303_v19 }
 0x380   : > { %v3305_v33 = vpop.f32.mrf.mxu0 }
 0x382   : > { %v3672_v61 = vpop.f32.mrf.mxu0 }
 0x383   : > { %v3751_v42 = vadd.f32 %v3672_v61, %v3422_v29 }
 0x384   : > { %v3674_v63 = vpop.f32.mrf.mxu0  ;;  %v8115_v27 = vpop.f32.mrf.mxu1 }
 0x385   : > { %v3773_v12 = vmul.f32 %v8108_v58, %v3751_v42 }
 0x386   : > { %v4072_v18 = vpop.f32.mrf.mxu1 }
 0x387   : > { %v3795_v55 = vadd.f32 %v8113_v30, %v3773_v12  ;;  %v3677_v36 = vpop.f32.mrf.mxu0 }
 0x388   : > { %v3752_v28 = vadd.f32 %v3677_v36, %v3427_v26 }
 0x389   : > { %v3811_v60 = vmax.f32 %v3795_v55, 0.0  ;;  %v3679_v46 = vpop.f32.mrf.mxu0  ;;  %v8121_v31 = vpop.f32.mrf.mxu1 }
 0x38a   : > { %v3774_v52 = vmul.f32 %v8108_v58, %v3752_v28 }
 0x38b   : > { %3827 = vst.msk [vmem:[%s8125_s2] sm:$0xff] %vm394_vm0, %v3811_v60  ;;  %v3682_v48 = vpop.f32.mrf.mxu0  ;;  %v4077_v37 = vpop.f32.mrf.mxu1 }
 0x38c   : > { %v3796_v2 = vadd.f32 %v8113_v30, %v3774_v52  ;;  %v3753_v21 = vadd.f32 %v3682_v48, %v8051_v1 }
 0x38d   : > { %v3684_v20 = vpop.f32.mrf.mxu0 }
 0x38e   : > { %v3812_v11 = vmax.f32 %v3796_v2, 0.0  ;;  %v3775_v40 = vmul.f32 %v8108_v58, %v3753_v21  ;;  %v8132_v15 = vpop.f32.mrf.mxu1 }
 0x390   : > { %3828 = vst.msk [vmem:[%s8125_s2 + $0x8] sm:$0xff] %vm394_vm0, %v3812_v11  ;;  %v3797_v49 = vadd.f32 %v8113_v30, %v3775_v40  ;;  %v4082_v13 = vpop.f32.mrf.mxu1 }
 0x391   : > { %v3687_v7 = vpop.f32.mrf.mxu0 }
 0x392   : > { %v3813_v4 = vmax.f32 %v3797_v49, 0.0  ;;  %v3754_v14 = vadd.f32 %v3687_v7, %v8062_v45 }
 0x393   : > { %v3689_v32 = vpop.f32.mrf.mxu0  ;;  %v8138_v44 = vpop.f32.mrf.mxu1 }
 0x394   : > { %3829 = vst.msk [vmem:[%s8125_s2 + $0x10] sm:$0xff] %vm394_vm0, %v3813_v4  ;;  %v3776_v1 = vmul.f32 %v8108_v58, %v3754_v14 }
 0x395   : > { %v3692_v51 = vpop.f32.mrf.mxu0  ;;  %v4087_v50 = vpop.f32.mrf.mxu1 }
 0x396   : > { %v3798_v9 = vadd.f32 %v8113_v30, %v3776_v1  ;;  %v3755_v43 = vadd.f32 %v3692_v51, %v8070_v25 }
 0x397   : > { %v3694_v56 = vpop.f32.mrf.mxu0 }
 0x398   : > { %v3814_v22 = vmax.f32 %v3798_v9, 0.0  ;;  %v3777_v54 = vmul.f32 %v8108_v58, %v3755_v43  ;;  %v8146_v53 = vpop.f32.mrf.mxu1 }
 0x39a   : > { %3830 = vst.msk [vmem:[%s8125_s2 + $0x18] sm:$0xff] %vm394_vm0, %v3814_v22  ;;  %v3799_v45 = vadd.f32 %v8113_v30, %v3777_v54  ;;  %v4092_v62 = vpop.f32.mrf.mxu1 }
 0x39b   : > { %v3697_v0 = vpop.f32.mrf.mxu0 }
 0x39c   : > { %v3815_v17 = vmax.f32 %v3799_v45, 0.0  ;;  %v3756_v8 = vadd.f32 %v3697_v0, %v8079_v39 }
 0x39d   : > { %v3699_v3 = vpop.f32.mrf.mxu0  ;;  %v8152_v47 = vpop.f32.mrf.mxu1 }
 0x39e   : > { %3831 = vst.msk [vmem:[%s8125_s2 + $0x20] sm:$0xff] %vm394_vm0, %v3815_v17  ;;  %v3778_v25 = vmul.f32 %v8108_v58, %v3756_v8 }
 0x39f   : > { %v3702_v34 = vpop.f32.mrf.mxu0  ;;  %v4097_v35 = vpop.f32.mrf.mxu1 }
 0x3a0   : > { %v3800_v19 = vadd.f32 %v8113_v30, %v3778_v25  ;;  %v3757_v33 = vadd.f32 %v3702_v34, %v8083_v5 }
 0x3a1   : > { %v3704_v29 = vpop.f32.mrf.mxu0 }
 0x3a2   : > { %v3816_v61 = vmax.f32 %v3800_v19, 0.0  ;;  %v3779_v42 = vmul.f32 %v8108_v58, %v3757_v33  ;;  %v8160_v63 = vpop.f32.mrf.mxu1 }
 0x3a4   : > { %3832 = vst.msk [vmem:[%s8125_s2 + $0x28] sm:$0xff] %vm394_vm0, %v3816_v61  ;;  %v3801_v39 = vadd.f32 %v8113_v30, %v3779_v42  ;;  %v4102_v12 = vpop.f32.mrf.mxu1 }
 0x3a5   : > { %v3707_v26 = vpop.f32.mrf.mxu0 }
 0x3a6   : > { %v3817_v18 = vmax.f32 %v3801_v39, 0.0  ;;  %v3758_v55 = vadd.f32 %v3707_v26, %v8085_v23 }
 0x3a7   : > { %v3709_v36 = vpop.f32.mrf.mxu0  ;;  %v8166_v28 = vpop.f32.mrf.mxu1 }
 0x3a8   : > { %3833 = vst.msk [vmem:[%s8125_s2 + $0x30] sm:$0xff] %vm394_vm0, %v3817_v18  ;;  %v3780_v5 = vmul.f32 %v8108_v58, %v3758_v55 }
 0x3a9   : > { %v3712_v60 = vpop.f32.mrf.mxu0  ;;  %v4107_v46 = vpop.f32.mrf.mxu1 }
 0x3aa   : > { %v3802_v52 = vadd.f32 %v8113_v30, %v3780_v5  ;;  %v3759_v48 = vadd.f32 %v3712_v60, %v8087_v38 }
 0x3ab   : > { %v3714_v37 = vpop.f32.mrf.mxu0 }
 0x3ac   : > { %v3818_v2 = vmax.f32 %v3802_v52, 0.0  ;;  %v3781_v21 = vmul.f32 %v8108_v58, %v3759_v48  ;;  %v8174_v20 = vpop.f32.mrf.mxu1 }
 0x3ae   : > { %3834 = vst.msk [vmem:[%s8125_s2 + $0x38] sm:$0xff] %vm394_vm0, %v3818_v2  ;;  %v3803_v23 = vadd.f32 %v8113_v30, %v3781_v21  ;;  %v4112_v11 = vpop.f32.mrf.mxu1 }
 0x3af   : > { %v3717_v40 = vpop.f32.mrf.mxu0 }
 0x3b0   : > { %v3819_v49 = vmax.f32 %v3803_v23, 0.0  ;;  %v3760_v13 = vadd.f32 %v3717_v40, %v8089_v6 }
 0x3b1   : > { %v3719_v7 = vpop.f32.mrf.mxu0  ;;  %v8180_v4 = vpop.f32.mrf.mxu1 }
 0x3b2   : > { %3835 = vst.msk [vmem:[%s8125_s2 + $0x40] sm:$0xff] %vm394_vm0, %v3819_v49  ;;  %v3782_v38 = vmul.f32 %v8108_v58, %v3760_v13 }
 0x3b3   : > { %v3722_v14 = vpop.f32.mrf.mxu0  ;;  %v4117_v32 = vpop.f32.mrf.mxu1 }
 0x3b4   : > { %v3804_v1 = vadd.f32 %v8113_v30, %v3782_v38  ;;  %v3761_v51 = vadd.f32 %v3722_v14, %v8091_v24 }
 0x3b5   : > { %v3724_v50 = vpop.f32.mrf.mxu0 }
 0x3b6   : > { %v3820_v9 = vmax.f32 %v3804_v1, 0.0  ;;  %v3783_v43 = vmul.f32 %v8108_v58, %v3761_v51  ;;  %v8188_v56 = vpop.f32.mrf.mxu1 }
 0x3b8   : > { %3836 = vst.msk [vmem:[%s8125_s2 + $0x48] sm:$0xff] %vm394_vm0, %v3820_v9  ;;  %v3805_v6 = vadd.f32 %v8113_v30, %v3783_v43  ;;  %v4122_v22 = vpop.f32.mrf.mxu1 }
 0x3b9   : > { %v3727_v54 = vpop.f32.mrf.mxu0 }
 0x3ba   : > { %v3821_v45 = vmax.f32 %v3805_v6, 0.0  ;;  %v3762_v62 = vadd.f32 %v3727_v54, %v8093_v41 }
 0x3bb   : > { %v3729_v0 = vpop.f32.mrf.mxu0  ;;  %v8194_v17 = vpop.f32.mrf.mxu1 }
 0x3bc   : > { %3837 = vst.msk [vmem:[%s8125_s2 + $0x50] sm:$0xff] %vm394_vm0, %v3821_v45  ;;  %v3784_v24 = vmul.f32 %v8108_v58, %v3762_v62 }
 0x3bd   : > { %v3732_v8 = vpop.f32.mrf.mxu0  ;;  %v4127_v3 = vpop.f32.mrf.mxu1 }
 0x3be   : > { %v3806_v25 = vadd.f32 %v8113_v30, %v3784_v24  ;;  %v3763_v34 = vadd.f32 %v3732_v8, %v8095_v57 }
 0x3bf   : > { %v3734_v35 = vpop.f32.mrf.mxu0 }
 0x3c0   : > { %v3822_v19 = vmax.f32 %v3806_v25, 0.0  ;;  %v3785_v33 = vmul.f32 %v8108_v58, %v3763_v34  ;;  %v8202_v29 = vpop.f32.mrf.mxu1 }
 0x3c2   : > { %3838 = vst.msk [vmem:[%s8125_s2 + $0x58] sm:$0xff] %vm394_vm0, %v3822_v19  ;;  %v3807_v41 = vadd.f32 %v8113_v30, %v3785_v33  ;;  %v4132_v61 = vpop.f32.mrf.mxu1 }
 0x3c3   : > { %v3737_v42 = vpop.f32.mrf.mxu0 }
 0x3c4   : > { %v3823_v39 = vmax.f32 %v3807_v41, 0.0  ;;  %v3764_v12 = vadd.f32 %v3737_v42, %v8097_v59 }
 0x3c5   : > { %v3739_v26 = vpop.f32.mrf.mxu0  ;;  %v8208_v18 = vpop.f32.mrf.mxu1 }
 0x3c6   : > { %3839 = vst.msk [vmem:[%s8125_s2 + $0x60] sm:$0xff] %vm394_vm0, %v3823_v39  ;;  %v3786_v57 = vmul.f32 %v8108_v58, %v3764_v12 }
 0x3c7   : > { %v3742_v55 = vpop.f32.mrf.mxu0  ;;  %v4137_v36 = vpop.f32.mrf.mxu1 }
 0x3c8   : > { %v3808_v5 = vadd.f32 %v8113_v30, %v3786_v57  ;;  %v3765_v60 = vadd.f32 %v3742_v55, %v8099_v16 }
 0x3c9   : > { %v3744_v46 = vpop.f32.mrf.mxu0 }
 0x3ca   : > { %v3824_v52 = vmax.f32 %v3808_v5, 0.0  ;;  %v3787_v48 = vmul.f32 %v8108_v58, %v3765_v60  ;;  %v8216_v37 = vpop.f32.mrf.mxu1 }
 0x3cc   : > { %3840 = vst.msk [vmem:[%s8125_s2 + $0x68] sm:$0xff] %vm394_vm0, %v3824_v52  ;;  %v3809_v59 = vadd.f32 %v8113_v30, %v3787_v48  ;;  %v4142_v2 = vpop.f32.mrf.mxu1 }
 0x3cd   : > { %v3747_v21 = vpop.f32.mrf.mxu0 }
 0x3ce   : > { %v3825_v23 = vmax.f32 %v3809_v59, 0.0  ;;  %v3766_v11 = vadd.f32 %v3747_v21, %v8101_v10 }
 0x3cf   : > { %v3749_v40 = vpop.f32.mrf.mxu0  ;;  %v8222_v49 = vpop.f32.mrf.mxu1 }
 0x3d0   : > { %3841 = vst.msk [vmem:[%s8125_s2 + $0x70] sm:$0xff] %vm394_vm0, %v3825_v23  ;;  %v3788_v16 = vmul.f32 %v8108_v58, %v3766_v11 }
 0x3d1   : > { %v4147_v13 = vpop.f32.mrf.mxu1  ;;  %v4263_v7 = vpop.f32.mrf.mxu0 }
 0x3d2   : > { %v3810_v38 = vadd.f32 %v8113_v30, %v3788_v16  ;;  %v4264_v14 = vadd.f32 %v4263_v7, %v8115_v27 }
 0x3d3   : > { %v4265_v32 = vpop.f32.mrf.mxu0  ;;  %v4513_v1 = vpop.f32.mrf.mxu1 }
 0x3d4   : > { %v3826_v51 = vmax.f32 %v3810_v38, 0.0  ;;  %v4592_v50 = vadd.f32 %v4513_v1, %v4264_v14 }
 0x3d5   : > { %v4268_v9 = vpop.f32.mrf.mxu0  ;;  %v4515_v10 = vpop.f32.mrf.mxu1 }
 0x3d6   : > { %3842 = vst.msk [vmem:[%s8125_s2 + $0x78] sm:$0xff] %vm394_vm0, %v3826_v51  ;;  %v4608_v43 = vmul.f32 %v8108_v58, %v4592_v50  ;;  %v4269_v6 = vadd.f32 %v4268_v9, %v8121_v31 }
 0x3d7   : > { %v4270_v22 = vpop.f32.mrf.mxu0  ;;  %v4518_v54 = vpop.f32.mrf.mxu1 }
 0x3d8   : > { %v4624_v45 = vadd.f32 %v8113_v30, %v4608_v43  ;;  %v4593_v62 = vadd.f32 %v4518_v54, %v4269_v6 }
 0x3d9   : > { %v4273_v0 = vpop.f32.mrf.mxu0  ;;  %v4520_v27 = vpop.f32.mrf.mxu1 }
 0x3da   : > { %v4640_v24 = vmax.f32 %v4624_v45, 0.0  ;;  %v4609_v8 = vmul.f32 %v8108_v58, %v4593_v62  ;;  %v4274_v3 = vadd.f32 %v4273_v0, %v8132_v15 }
 0x3db   : > { %v4275_v25 = vpop.f32.mrf.mxu0  ;;  %v4523_v34 = vpop.f32.mrf.mxu1 }
 0x3dc   : > { %5047 = vst.msk [vmem:[%s8125_s2 + $0x80] sm:$0xff] %vm394_vm0, %v4640_v24  ;;  %v4625_v35 = vadd.f32 %v8113_v30, %v4609_v8  ;;  %v4594_v31 = vadd.f32 %v4523_v34, %v4274_v3 }
 0x3dd   : > { %v4278_v19 = vpop.f32.mrf.mxu0  ;;  %v4525_v33 = vpop.f32.mrf.mxu1 }
 0x3de   : > { %v4641_v41 = vmax.f32 %v4625_v35, 0.0  ;;  %v4610_v61 = vmul.f32 %v8108_v58, %v4594_v31  ;;  %v4279_v42 = vadd.f32 %v4278_v19, %v8138_v44 }
 0x3df   : > { %v4280_v39 = vpop.f32.mrf.mxu0  ;;  %v4528_v12 = vpop.f32.mrf.mxu1 }
 0x3e0   : > { %5048 = vst.msk [vmem:[%s8125_s2 + $0x88] sm:$0xff] %vm394_vm0, %v4641_v41  ;;  %v4626_v15 = vadd.f32 %v8113_v30, %v4610_v61  ;;  %v4595_v26 = vadd.f32 %v4528_v12, %v4279_v42 }
 0x3e1   : > { %v4283_v57 = vpop.f32.mrf.mxu0  ;;  %v4530_v55 = vpop.f32.mrf.mxu1 }
 0x3e2   : > { %v4642_v36 = vmax.f32 %v4626_v15, 0.0  ;;  %v4611_v5 = vmul.f32 %v8108_v58, %v4595_v26  ;;  %v4284_v60 = vadd.f32 %v4283_v57, %v8146_v53 }
 0x3e3   : > { %v4285_v46 = vpop.f32.mrf.mxu0  ;;  %v4533_v52 = vpop.f32.mrf.mxu1 }
 0x3e4   : > { %5049 = vst.msk [vmem:[%s8125_s2 + $0x90] sm:$0xff] %vm394_vm0, %v4642_v36  ;;  %v4627_v44 = vadd.f32 %v8113_v30, %v4611_v5  ;;  %v4596_v48 = vadd.f32 %v4533_v52, %v4284_v60 }
 0x3e5   : > { %v4288_v59 = vpop.f32.mrf.mxu0  ;;  %v4535_v2 = vpop.f32.mrf.mxu1 }
 0x3e6   : > { %v4643_v21 = vmax.f32 %v4627_v44, 0.0  ;;  %v4612_v23 = vmul.f32 %v8108_v58, %v4596_v48  ;;  %v4289_v11 = vadd.f32 %v4288_v59, %v8152_v47 }
 0x3e7   : > { %v4290_v40 = vpop.f32.mrf.mxu0  ;;  %v4538_v16 = vpop.f32.mrf.mxu1 }
 0x3e8   : > { %5050 = vst.msk [vmem:[%s8125_s2 + $0x98] sm:$0xff] %vm394_vm0, %v4643_v21  ;;  %v4628_v53 = vadd.f32 %v8113_v30, %v4612_v23  ;;  %v4597_v13 = vadd.f32 %v4538_v16, %v4289_v11 }
 0x3e9   : > { %v4293_v7 = vpop.f32.mrf.mxu0  ;;  %v4540_v38 = vpop.f32.mrf.mxu1 }
 0x3ea   : > { %v4644_v14 = vmax.f32 %v4628_v53, 0.0  ;;  %v4613_v32 = vmul.f32 %v8108_v58, %v4597_v13  ;;  %v4294_v1 = vadd.f32 %v4293_v7, %v8160_v63 }
 0x3eb   : > { %v4295_v51 = vpop.f32.mrf.mxu0  ;;  %v4543_v50 = vpop.f32.mrf.mxu1 }
 0x3ec   : > { %5051 = vst.msk [vmem:[%s8125_s2 + $0xa0] sm:$0xff] %vm394_vm0, %v4644_v14  ;;  %v4629_v47 = vadd.f32 %v8113_v30, %v4613_v32  ;;  %v4598_v9 = vadd.f32 %v4543_v50, %v4294_v1 }
 0x3ed   : > { %v4298_v10 = vpop.f32.mrf.mxu0  ;;  %v4545_v43 = vpop.f32.mrf.mxu1 }
 0x3ee   : > { %v4645_v6 = vmax.f32 %v4629_v47, 0.0  ;;  %v4614_v22 = vmul.f32 %v8108_v58, %v4598_v9  ;;  %v4299_v54 = vadd.f32 %v4298_v10, %v8166_v28 }
 0x3ef   : > { %v4300_v45 = vpop.f32.mrf.mxu0  ;;  %v4548_v62 = vpop.f32.mrf.mxu1 }
 0x3f0   : > { %5052 = vst.msk [vmem:[%s8125_s2 + $0xa8] sm:$0xff] %vm394_vm0, %v4645_v6  ;;  %v4630_v63 = vadd.f32 %v8113_v30, %v4614_v22  ;;  %v4599_v0 = vadd.f32 %v4548_v62, %v4299_v54 }
 0x3f1   : > { %v4303_v27 = vpop.f32.mrf.mxu0  ;;  %v4550_v24 = vpop.f32.mrf.mxu1 }
 0x3f2   : > { %v4646_v8 = vmax.f32 %v4630_v63, 0.0  ;;  %v4615_v3 = vmul.f32 %v8108_v58, %v4599_v0  ;;  %v4304_v25 = vadd.f32 %v4303_v27, %v8174_v20 }
 0x3f3   : > { %v4305_v34 = vpop.f32.mrf.mxu0  ;;  %v4553_v35 = vpop.f32.mrf.mxu1 }
 0x3f4   : > { %5053 = vst.msk [vmem:[%s8125_s2 + $0xb0] sm:$0xff] %vm394_vm0, %v4646_v8  ;;  %v4631_v28 = vadd.f32 %v8113_v30, %v4615_v3  ;;  %v4600_v31 = vadd.f32 %v4553_v35, %v4304_v25 }
 0x3f5   : > { %v4308_v19 = vpop.f32.mrf.mxu0  ;;  %v4555_v33 = vpop.f32.mrf.mxu1 }
 0x3f6   : > { %v4647_v41 = vmax.f32 %v4631_v28, 0.0  ;;  %v4616_v61 = vmul.f32 %v8108_v58, %v4600_v31  ;;  %v4309_v42 = vadd.f32 %v4308_v19, %v8180_v4 }
 0x3f7   : > { %v4310_v39 = vpop.f32.mrf.mxu0  ;;  %v4558_v12 = vpop.f32.mrf.mxu1 }
 0x3f8   : > { %5054 = vst.msk [vmem:[%s8125_s2 + $0xb8] sm:$0xff] %vm394_vm0, %v4647_v41  ;;  %v4632_v20 = vadd.f32 %v8113_v30, %v4616_v61  ;;  %v4601_v15 = vadd.f32 %v4558_v12, %v4309_v42 }
 0x3f9   : > { %v4313_v26 = vpop.f32.mrf.mxu0  ;;  %v4560_v57 = vpop.f32.mrf.mxu1 }
 0x3fa   : > { %v4648_v55 = vmax.f32 %v4632_v20, 0.0  ;;  %v4617_v36 = vmul.f32 %v8108_v58, %v4601_v15  ;;  %v4314_v5 = vadd.f32 %v4313_v26, %v8188_v56 }
 0x3fb   : > { %v4315_v60 = vpop.f32.mrf.mxu0  ;;  %v4563_v46 = vpop.f32.mrf.mxu1 }
 0x3fc   : > { %5055 = vst.msk [vmem:[%s8125_s2 + $0xc0] sm:$0xff] %vm394_vm0, %v4648_v55  ;;  %v4633_v4 = vadd.f32 %v8113_v30, %v4617_v36  ;;  %v4602_v52 = vadd.f32 %v4563_v46, %v4314_v5 }
 0x3fd   : > { %v4318_v44 = vpop.f32.mrf.mxu0  ;;  %v4565_v48 = vpop.f32.mrf.mxu1 }
 0x3fe   : > { %v4649_v59 = vmax.f32 %v4633_v4, 0.0  ;;  %v4618_v2 = vmul.f32 %v8108_v58, %v4602_v52  ;;  %v4319_v21 = vadd.f32 %v4318_v44, %v8194_v17 }
 0x3ff   : > { %v4320_v23 = vpop.f32.mrf.mxu0  ;;  %v4568_v11 = vpop.f32.mrf.mxu1 }
 0x400   : > { %5056 = vst.msk [vmem:[%s8125_s2 + $0xc8] sm:$0xff] %vm394_vm0, %v4649_v59  ;;  %v4634_v56 = vadd.f32 %v8113_v30, %v4618_v2  ;;  %v4603_v40 = vadd.f32 %v4568_v11, %v4319_v21 }
 0x401   : > { %v4323_v16 = vpop.f32.mrf.mxu0  ;;  %v4570_v53 = vpop.f32.mrf.mxu1 }
 0x402   : > { %v4650_v13 = vmax.f32 %v4634_v56, 0.0  ;;  %v4619_v7 = vmul.f32 %v8108_v58, %v4603_v40  ;;  %v4324_v38 = vadd.f32 %v4323_v16, %v8202_v29 }
 0x403   : > { %v4325_v14 = vpop.f32.mrf.mxu0  ;;  %v4573_v32 = vpop.f32.mrf.mxu1 }
 0x404   : > { %5057 = vst.msk [vmem:[%s8125_s2 + $0xd0] sm:$0xff] %vm394_vm0, %v4650_v13  ;;  %v4635_v17 = vadd.f32 %v8113_v30, %v4619_v7  ;;  %v4604_v1 = vadd.f32 %v4573_v32, %v4324_v38 }
 0x405   : > { %v4328_v51 = vpop.f32.mrf.mxu0  ;;  %v4575_v50 = vpop.f32.mrf.mxu1 }
 0x406   : > { %v4651_v47 = vmax.f32 %v4635_v17, 0.0  ;;  %v4620_v9 = vmul.f32 %v8108_v58, %v4604_v1  ;;  %v4329_v10 = vadd.f32 %v4328_v51, %v8208_v18 }
 0x407   : > { %v4330_v43 = vpop.f32.mrf.mxu0  ;;  %v4578_v6 = vpop.f32.mrf.mxu1 }
 0x408   : > { %5058 = vst.msk [vmem:[%s8125_s2 + $0xd8] sm:$0xff] %vm394_vm0, %v4651_v47  ;;  %v4636_v29 = vadd.f32 %v8113_v30, %v4620_v9  ;;  %v4605_v22 = vadd.f32 %v4578_v6, %v4329_v10 }
 0x409   : > { %v4333_v54 = vpop.f32.mrf.mxu0  ;;  %v4580_v45 = vpop.f32.mrf.mxu1 }
 0x40a   : > { %v4652_v62 = vmax.f32 %v4636_v29, 0.0  ;;  %v4621_v63 = vmul.f32 %v8108_v58, %v4605_v22  ;;  %v4334_v0 = vadd.f32 %v4333_v54, %v8216_v37 }
 0x40b   : > { %v4335_v27 = vpop.f32.mrf.mxu0  ;;  %v4583_v24 = vpop.f32.mrf.mxu1 }
 0x40c   : > { %5059 = vst.msk [vmem:[%s8125_s2 + $0xe0] sm:$0xff] %vm394_vm0, %v4652_v62  ;;  %v4637_v18 = vadd.f32 %v8113_v30, %v4621_v63  ;;  %v4606_v8 = vadd.f32 %v4583_v24, %v4334_v0 }
 0x40d   : > { %v4338_v3 = vpop.f32.mrf.mxu0  ;;  %v4585_v25 = vpop.f32.mrf.mxu1 }
 0x40e   : > { %v4653_v34 = vmax.f32 %v4637_v18, 0.0  ;;  %v4622_v35 = vmul.f32 %v8108_v58, %v4606_v8  ;;  %v4339_v28 = vadd.f32 %v4338_v3, %v8222_v49 }
 0x40f   : > { %v4340_v31 = vpop.f32.mrf.mxu0  ;;  %v4588_v37 = vpop.f32.mrf.mxu1 }
 0x410   : > { %5060 = vst.msk [vmem:[%s8125_s2 + $0xe8] sm:$0xff] %vm394_vm0, %v4653_v34  ;;  %v4638_v19 = vadd.f32 %v8113_v30, %v4622_v35  ;;  %v4607_v33 = vadd.f32 %v4588_v37, %v4339_v28 }
 0x411   : > { %v4590_v41 = vpop.f32.mrf.mxu1 }
 0x412   : > { %v4654_v61 = vmax.f32 %v4638_v19, 0.0  ;;  %v4623_v42 = vmul.f32 %v8108_v58, %v4607_v33 }
 0x414   : > { %5061 = vst.msk [vmem:[%s8125_s2 + $0xf0] sm:$0xff] %vm394_vm0, %v4654_v61  ;;  %v4639_v49 = vadd.f32 %v8113_v30, %v4623_v42 }
 0x416   : > { %v4655_v39 = vmax.f32 %v4639_v49, 0.0 }
 0x418   : > { %5062 = vst.msk [vmem:[%s8125_s2 + $0xf8] sm:$0xff] %vm394_vm0, %v4655_v39 }
 0x419   : > { %5276 = shalt.err (!%p5273_p4)
}
 0x41a   : > { %s5277_s23 = scalar_lea.hbm %s8313_s17, 4096  ;;  %s5281_s15 = scalar_lea.hbm %s8368_s8, 8192 }
 0x41b   : > { %p5278_p5 = scmp.ne.s32.totalorder %s8313_s17, %s5277_s23  ;;  %p5282_p2 = scmp.lt.s32.totalorder %s8313_s17, %s8368_s8 }
 0x41c   : > { %p5283_p6 = scmp.lt.s32.totalorder %s5281_s15, %s5277_s23 }
 0x41d   : > { %p5279_p7 = pnand %p5278_p5, %p8517_p10 }
 0x41e   : > { %p5284_p12 = por %p5283_p6, %p5282_p2 }
 0x41f   : > { %p5280_p8 = pneg %p5279_p7 }
 0x421   : > { %p5285_p0 = pnand %p5284_p12, %p5280_p8 }
 0x423   : > { %5288 = shalt.err (!%p5285_p0)
}
 0x424   : > { %s5350_s20 = smov 128   ;;  %s5351_s2 = smov 8  }
 0x425   : > { %5083 = dma.vmem_to_hbm [thread:$0]  (%p8517_p10), %s8315_s13, 4096, %s8313_s17, %s4674_s26, %s5350_s20, %s5350_s20, %s5351_s2  }
 0x426 PF: > { %s4702_s18 = sand.u32 1, %s5327_s27   ;;  %p8518_p3 = scmp.ne.s32.totalorder %s8433_s12, 0 }
 0x427   : > { %p8519_p11 = scmp.ge.s32.totalorder %s5339_s30, 2  ;;  %s4703_s24 = scalar_lea.sflag [#allocation6], %s4702_s18 }
 0x429   : > { %p5100_p9 = pnand %p8519_p11, %p8518_p3 }
 0x42b   : > { %p5101_p13 = pneg %p5100_p9 }
 0x42d   : > { %5322 = dma.done.wait (%p5101_p13), %s4703_s24, 4096  }
 0x42e   : > { %5324 = vsyncadd (%p5101_p13), %s4703_s24, 4294963200  ;;  %s8520_s11 = sld [smem:[#allocation18_spill]]  ;;  %p25_p1 = scmp.ge.s32.totalorder %s5475_s10, 4  }
 0x42f   : > { %s8521_s29 = sld [smem:[#allocation19_spill]]  ;;  %s8522_s27 = smov %s5331_s28 }
 0x430   : > { %s8524_s30 = smov %s5475_s10  ;;  %27 = sbr.rel (!%p25_p1) target bundleno = 12 (0xc), region = 137 }
 0x434   : > { %s8523_s28 = smov %s8520_s11 }
 0x435   :  { %4708 = vsyncpa [#allocation5], 1 }
 0x436   :  { %4710 = vsyncpa [#allocation5 + $0x1], 1 }
 0x437   :  { %4711 = vsyncpa [#allocation8], 1 }
 0x438   :  { %4713 = vsyncpa [#allocation8 + $0x1], 1 }
 0x439   :  { %4714 = vsyncpa [#allocation11], 1 }
 0x43a   :  { %4715 = vsyncpa [#allocation6], 1 }
 0x43b   :  { %4717 = vsyncpa [#allocation6 + $0x1], 1 }

</bundles_post_ra>
